<compile_context>
chip_gen: v7x
topology: tpu7x:2x2x1
jax: 0.10.0
libtpu: 0.0.40
codegen_flags: <defaults>
</compile_context>

<pallas_src>
import functools

import jax
import jax.numpy as jnp
from jax import lax
from jax.experimental import pallas as pl
from jax.experimental.pallas import tpu as pltpu

WSI_EMBED_DIM = 1024      # wsi_embedding_dim
IMG_EMBED_DIM = 2048      # img_embedding_dim (resnet50 feature dim)
PROJ_DIM = 256            # wsi_projection_dim
HEAD_DIM = PROJ_DIM // 2  # dim_head, heads=1 -> attention output dim = 128
FF_HIDDEN = 512           # FeedForward hidden dim (SurvPath FeedForward)
NUM_SLICES = 3            # number of image tokens == num_pathways split
LN_EPS = 1e-5             # torch.nn.LayerNorm default eps
_GELU_C = 0.7978845608028654   # sqrt(2/pi)

# Packed layout for every small gamma/beta/bias vector: one (1, 2176) f32 operand.
# Each segment width is a multiple of 128 lanes so in-kernel static slices stay
# lane-aligned (no cross-lane shuffles).
_VEC_LAYOUT = (
    ("b_wsi", PROJ_DIM), ("b_img", PROJ_DIM), ("ln1_g", PROJ_DIM), ("ln1_b", PROJ_DIM),
    ("ffln_g", HEAD_DIM), ("ffln_b", HEAD_DIM), ("ff_b2", HEAD_DIM),
    ("ln2_g", HEAD_DIM), ("ln2_b", HEAD_DIM), ("ff_b1", FF_HIDDEN),
)
_VEC_OFFSETS = {}
_off = 0
for _name, _w in _VEC_LAYOUT:
    _VEC_OFFSETS[_name] = (_off, _w)
    _off += _w
_VEC_TOTAL = _off   # 2176


def _survpath_kernel(num_path, n_wsi, tile, tiles_per_core, needs_mask,
                     # inputs
                     wsi_ref, w_wsi_ref, img_ref, w_img_ref, w_qkv_ref,
                     ff_w1_ref, ff_w2_ref, vec_ref,
                     # outputs: per-core pathway-row softmax partials + WSI row-sum
                     m_out, l_out, acc_out, wsum_out,
                     # scratch
                     q_path, k_path, v_path, m_p, l_p, acc_p, wsi_sum):
    H = HEAD_DIM
    c = pl.program_id(0)            # TensorCore split of the WSI token range
    i = pl.program_id(1)            # WSI tile within this core's range
    last = pl.num_programs(1) - 1

    def vseg(name):
        off, width = _VEC_OFFSETS[name]
        return vec_ref[:, off:off + width]

    def ln(x, g, b):
        # var = E[x^2] - E[x]^2: two independent XLU reduces, one elementwise pass.
        mu = jnp.mean(x, axis=-1, keepdims=True)
        ms = jnp.mean(x * x, axis=-1, keepdims=True)
        return (x - mu) * lax.rsqrt(ms - mu * mu + LN_EPS) * g + b

    def qkv_of(tokens_f32):
        # MMAttentionLayer: LayerNorm(256) -> to_qkv (no bias); the 1/sqrt(dim_head)
        # scale is folded into the q columns of w_qkv in prepare_weights().
        xn = ln(tokens_f32, vseg("ln1_g"), vseg("ln1_b"))
        qkv = jnp.dot(xn.astype(jnp.bfloat16), w_qkv_ref[...],
                      preferred_element_type=jnp.float32)
        return qkv[:, :H], qkv[:, H:2 * H], qkv[:, 2 * H:]

    def gelu(x):
        # tanh-approximate GELU: 1 EUP tanh + ~6 VALU ops per element (the erf
        # polynomial was ~15 VALU ops on the (tile, 512) FF hidden tensor).
        return 0.5 * x * (1.0 + jnp.tanh(_GELU_C * (x + 0.044715 * (x * x * x))))

    def ff_block(x_f32):
        # FeedForward(128): LN -> Linear(128,512) -> GELU -> Linear(512,128)
        # (dropout = identity at inference), then the model-level LayerNorm(128).
        h = ln(x_f32, vseg("ffln_g"), vseg("ffln_b"))
        h = jnp.dot(h.astype(jnp.bfloat16), ff_w1_ref[...],
                    preferred_element_type=jnp.float32) + vseg("ff_b1")
        h = gelu(h)
        h = jnp.dot(h.astype(jnp.bfloat16), ff_w2_ref[...],
                    preferred_element_type=jnp.float32) + vseg("ff_b2")
        return ln(h, vseg("ln2_g"), vseg("ln2_b"))

    # ---- per-core init: project the image-slice (pathway) tokens once, cache
    #      their q/k/v and seed the pathway-row online softmax.  Only core 0
    #      seeds with the pathway->pathway block; other cores start neutral and
    #      everything is merged in the tiny plain-JAX epilogue. ----
    @pl.when(i == 0)
    def _init():
        t_img = (jnp.dot(img_ref[...].astype(jnp.bfloat16), w_img_ref[...],
                         preferred_element_type=jnp.float32) + vseg("b_img"))
        qp, kp, vp = qkv_of(t_img)
        q_path[...] = qp
        k_path[...] = kp
        v_path[...] = vp
        s_pp = lax.dot_general(qp, kp, (((1,), (1,)), ((), ())),
                               preferred_element_type=jnp.float32)       # (np, np)
        m0 = jnp.max(s_pp, axis=-1, keepdims=True)
        p0 = jnp.exp(s_pp - m0)
        seed = c == 0
        m_p[...] = jnp.where(seed, m0, jnp.full_like(m0, -jnp.inf))
        l_p[...] = jnp.where(seed, jnp.sum(p0, axis=-1, keepdims=True),
                             jnp.zeros((num_path, 1), jnp.float32))
        acc_p[...] = jnp.where(seed,
                               jnp.dot(p0, vp, preferred_element_type=jnp.float32),
                               jnp.zeros((num_path, H), jnp.float32))
        wsi_sum[...] = jnp.zeros((1, H), jnp.float32)

    # ---- this core's WSI tile: projection + qkv (f32 HBM tile, bf16 cast here) ----
    t_wsi = (jnp.dot(wsi_ref[...].astype(jnp.bfloat16), w_wsi_ref[...],
                     preferred_element_type=jnp.float32) + vseg("b_wsi"))
    qw, kw, vw = qkv_of(t_wsi)

    if needs_mask:
        # No wrapper-side padding: out-of-range rows of the edge block hold
        # unspecified data and are neutralized before every reduce
        # (where-selects discard NaN/Inf lanes).
        row0 = (c * tiles_per_core + i) * tile
        row_valid = (row0 + lax.broadcasted_iota(jnp.int32, (tile, 1), 0)) < n_wsi

    # ---- histology (WSI) rows attend only to the num_path pathway columns ----
    # TODO(synk): on v5e these two degenerate (N=3 / K=3) matmuls could be moved
    # to VPU/XLU broadcast-multiply-reduce form to reclaim MXU passes.
    s_w = lax.dot_general(qw, k_path[...], (((1,), (1,)), ((), ())),
                          preferred_element_type=jnp.float32)            # (tile, np)
    p_w = jnp.exp(s_w - jnp.max(s_w, axis=-1, keepdims=True))
    p_w = p_w * pl.reciprocal(jnp.sum(p_w, axis=-1, keepdims=True), approx=True)
    attn_w = jnp.dot(p_w, v_path[...], preferred_element_type=jnp.float32)
    mm_w = ff_block(attn_w)                                              # (tile, H)
    if needs_mask:
        mm_w = jnp.where(row_valid, mm_w, 0.0)
    wsi_sum[...] += jnp.sum(mm_w, axis=0, keepdims=True)

    # ---- pathway rows attend to this WSI tile (flash-style online softmax) ----
    if needs_mask:
        vw = jnp.where(row_valid, vw, 0.0)
    s_c = lax.dot_general(q_path[...], kw, (((1,), (1,)), ((), ())),
                          preferred_element_type=jnp.float32)            # (np, tile)
    if needs_mask:
        cols = row0 + lax.broadcasted_iota(jnp.int32, (num_path, tile), 1)
        s_c = jnp.where(cols < n_wsi, s_c, jnp.float32(-1e30))
    m_new = jnp.maximum(m_p[...], jnp.max(s_c, axis=-1, keepdims=True))
    alpha = jnp.exp(m_p[...] - m_new)
    p_c = jnp.exp(s_c - m_new)
    l_p[...] = alpha * l_p[...] + jnp.sum(p_c, axis=-1, keepdims=True)
    acc_p[...] = alpha * acc_p[...] + jnp.dot(p_c, vw,
                                              preferred_element_type=jnp.float32)
    m_p[...] = m_new

    # ---- emit this core's partial state on its last tile ----
    @pl.when(i == last)
    def _emit():
        m_out[0] = m_p[...]
        l_out[0] = l_p[...]
        acc_out[0] = acc_p[...]
        wsum_out[0] = wsi_sum[...]


def _chip_budget():
    """(tile_cap, vmem_limit_bytes) per TPU generation (v7x halves VMEM)."""
    try:
        cap = int(getattr(pltpu.get_tpu_info(), "vmem_capacity_bytes", 64 << 20))
    except Exception:
        cap = 64 << 20
    if cap >= (96 << 20):         # v5e / v6e: 128 MiB physical VMEM
        return 2048, 96 << 20
    return 1024, 48 << 20         # v7x: 64 MiB per TensorCore


def init_params(key):
    """Deterministic synthetic parameters matching the module's layer shapes."""
    keys = iter(jax.random.split(key, 16))

    def w(shape):
        return jax.random.normal(next(keys), shape, dtype=jnp.float32) * 0.02

    P, H = PROJ_DIM, HEAD_DIM
    return {
        # wsi_projection_net / img_projection_net
        "w_wsi": w((WSI_EMBED_DIM, P)), "b_wsi": w((P,)),
        "w_img": w((IMG_EMBED_DIM, P)), "b_img": w((P,)),
        # MMAttentionLayer: LayerNorm(256) + to_qkv (no bias), heads=1, dim_head=128
        "ln1_g": jnp.ones((P,), jnp.float32), "ln1_b": jnp.zeros((P,), jnp.float32),
        "w_qkv": w((P, 3 * H)),
        # FeedForward(128)
        "ffln_g": jnp.ones((H,), jnp.float32), "ffln_b": jnp.zeros((H,), jnp.float32),
        "ff_w1": w((H, FF_HIDDEN)), "ff_b1": w((FF_HIDDEN,)),
        "ff_w2": w((FF_HIDDEN, H)), "ff_b2": w((H,)),
        # LayerNorm(128)
        "ln2_g": jnp.ones((H,), jnp.float32), "ln2_b": jnp.zeros((H,), jnp.float32),
        # to_logits: Linear(256,64) -> ReLU -> Linear(64,1)
        "w_cls1": w((P, P // 4)), "b_cls1": w((P // 4,)),
        "w_cls2": w((P // 4, 1)), "b_cls2": w((1,)),
    }


def prepare_weights(params):
    """One-time weight prep (call once, reuse every forward): fold 1/sqrt(dim_head)
    into the q columns of w_qkv, cast MXU operands to bf16, and pack all small
    gamma/beta/bias vectors into a single lane-aligned (1, 2176) f32 operand."""
    H = HEAD_DIM
    scale = H ** -0.5
    w_qkv = params["w_qkv"].at[:, :H].multiply(scale)
    vec = jnp.concatenate(
        [params[name].reshape(1, -1).astype(jnp.float32) for name, _ in _VEC_LAYOUT],
        axis=1)
    assert vec.shape == (1, _VEC_TOTAL)
    prepped = {
        "w_wsi": params["w_wsi"].astype(jnp.bfloat16),
        "w_img": params["w_img"].astype(jnp.bfloat16),
        "w_qkv": w_qkv.astype(jnp.bfloat16),
        "ff_w1": params["ff_w1"].astype(jnp.bfloat16),
        "ff_w2": params["ff_w2"].astype(jnp.bfloat16),
        "vec": vec,
    }
    # f32 copies used only by the tiny (3-row) plain-JAX epilogue and the head.
    for name in ("ffln_g", "ffln_b", "ff_w1", "ff_b1", "ff_w2", "ff_b2",
                 "ln2_g", "ln2_b", "w_cls1", "b_cls1", "w_cls2", "b_cls2"):
        prepped[name + "_f32"] = params[name].astype(jnp.float32)
    return prepped


def survpath_forward(prepped, x_wsi, x_img_features, clinical_data=None, *, tile=None):
    """SurvPath.forward (inference).  Returns logits of shape (1, 1).

    prepped:        output of prepare_weights() (constant across calls).
    x_wsi:          (1, N_wsi, 1024) WSI patch embeddings (kept f32 in HBM).
    x_img_features: (1, NUM_SLICES, 2048) features from the frozen SeqVIT/ResNet50.
    """
    # TODO(synk): the frozen, checkpoint-loaded ResNet50 SeqVIT backbone
    # (self.seq_vit_model) is not translated; its per-slice 2048-d features are
    # taken directly as input.
    del clinical_data  # read but never used in the reference forward
    assert x_wsi.shape[0] == 1 and x_img_features.shape[0] == 1
    x_wsi = x_wsi.astype(jnp.float32)
    x_img = x_img_features.astype(jnp.float32)
    _, n_wsi, d_wsi = x_wsi.shape
    _, num_path, d_img = x_img.shape
    P, H = PROJ_DIM, HEAD_DIM

    # ---- per-generation tile / VMEM budget; WSI token axis laid out on a
    #      (core, tile) grid: outer axis "parallel" (v7x: 2 TensorCores),
    #      inner axis "arbitrary" (sequential online-softmax carry). ----
    tile_cap, vmem_limit = _chip_budget()
    tile = tile_cap if tile is None else min(tile, tile_cap)
    tile = min(tile, n_wsi)
    num_tiles = pl.cdiv(n_wsi, tile)
    num_cores = 2 if num_tiles >= 2 else 1
    tiles_per_core = pl.cdiv(num_tiles, num_cores)
    needs_mask = (num_cores * tiles_per_core * tile) != n_wsi
    clamp = num_cores * tiles_per_core > num_tiles   # last core may run past the end

    def wsi_map(c, i):
        t = c * tiles_per_core + i
        if clamp:
            t = jnp.minimum(t, num_tiles - 1)  # keep edge DMA in bounds; masked in-kernel
        return (0, t, 0)

    const = lambda shape: pl.BlockSpec(shape, lambda c, i: (0, 0))
    pairs = [
        (x_wsi,            pl.BlockSpec((None, tile, d_wsi), wsi_map)),
        (prepped["w_wsi"], const((d_wsi, P))),
        (x_img,            pl.BlockSpec((None, num_path, d_img), lambda c, i: (0, 0, 0))),
        (prepped["w_img"], const((d_img, P))),
        (prepped["w_qkv"], const((P, 3 * H))),
        (prepped["ff_w1"], const((H, FF_HIDDEN))),
        (prepped["ff_w2"], const((FF_HIDDEN, H))),
        (prepped["vec"],   const((1, _VEC_TOTAL))),
    ]
    inputs = [a for a, _ in pairs]
    in_specs = [s for _, s in pairs]

    kernel = functools.partial(_survpath_kernel, num_path, n_wsi, tile,
                               tiles_per_core, needs_mask)
    m_c, l_c, acc_c, wsum_c = pl.pallas_call(
        kernel,
        out_shape=(
            jax.ShapeDtypeStruct((num_cores, num_path, 1), jnp.float32),   # m
            jax.ShapeDtypeStruct((num_cores, num_path, 1), jnp.float32),   # l
            jax.ShapeDtypeStruct((num_cores, num_path, H), jnp.float32),   # acc
            jax.ShapeDtypeStruct((num_cores, 1, H), jnp.float32),          # wsi row-sum
        ),
        grid_spec=pltpu.PrefetchScalarGridSpec(
            num_scalar_prefetch=0,
            grid=(num_cores, tiles_per_core),
            in_specs=in_specs,
            out_specs=(
                pl.BlockSpec((1, num_path, 1), lambda c, i: (c, 0, 0)),
                pl.BlockSpec((1, num_path, 1), lambda c, i: (c, 0, 0)),
                pl.BlockSpec((1, num_path, H), lambda c, i: (c, 0, 0)),
                pl.BlockSpec((1, 1, H), lambda c, i: (c, 0, 0)),
            ),
            scratch_shapes=[
                pltpu.VMEM((num_path, H), jnp.float32),   # q_path
                pltpu.VMEM((num_path, H), jnp.float32),   # k_path
                pltpu.VMEM((num_path, H), jnp.float32),   # v_path
                pltpu.VMEM((num_path, 1), jnp.float32),   # m  (online softmax)
                pltpu.VMEM((num_path, 1), jnp.float32),   # l  (online softmax)
                pltpu.VMEM((num_path, H), jnp.float32),   # acc (p @ v numerator)
                pltpu.VMEM((1, H), jnp.float32),          # per-core WSI token-sum
            ],
        ),
        compiler_params=pltpu.CompilerParams(
            dimension_semantics=("parallel", "arbitrary"),
            vmem_limit_bytes=vmem_limit,
        ),
    )(*inputs)

    # ---- tiny plain-JAX epilogue (3 pathway rows + 1x256 head): merge per-core
    #      online-softmax partials, pathway-row FeedForward + LayerNorm, token
    #      means, concat and the to_logits head. ----
    m_c = m_c[:, :, 0]                                        # (C, np)
    l_c = l_c[:, :, 0]                                        # (C, np)
    m_tot = jnp.max(m_c, axis=0)                              # (np,)
    scale = jnp.exp(m_c - m_tot[None, :])                     # (C, np)
    l_tot = jnp.sum(scale * l_c, axis=0)                      # (np,)
    acc_tot = jnp.sum(scale[:, :, None] * acc_c, axis=0)      # (np, H)
    attn_p = acc_tot / l_tot[:, None]                         # (np, H)

    def ln_rows(x, g, b):
        mu = jnp.mean(x, axis=-1, keepdims=True)
        var = jnp.mean(jnp.square(x - mu), axis=-1, keepdims=True)
        return (x - mu) * lax.rsqrt(var + LN_EPS) * g[None, :] + b[None, :]

    h = ln_rows(attn_p, prepped["ffln_g_f32"], prepped["ffln_b_f32"])
    h = h @ prepped["ff_w1_f32"] + prepped["ff_b1_f32"][None, :]
    h = 0.5 * h * (1.0 + jnp.tanh(_GELU_C * (h + 0.044715 * (h * h * h))))
    h = h @ prepped["ff_w2_f32"] + prepped["ff_b2_f32"][None, :]
    mm_p = ln_rows(h, prepped["ln2_g_f32"], prepped["ln2_b_f32"])              # (np, H)

    paths_mean = jnp.mean(mm_p, axis=0, keepdims=True)                         # (1, H)
    wsi_mean = jnp.sum(wsum_c[:, 0, :], axis=0, keepdims=True) / float(n_wsi)  # (1, H)

    # to_logits: Linear(256,64) -> ReLU -> Linear(64,1) on cat([wsi, paths], dim=1)
    emb = jnp.concatenate([wsi_mean, paths_mean], axis=-1)                     # (1, 2H)
    z = jnp.maximum(emb @ prepped["w_cls1_f32"] + prepped["b_cls1_f32"][None, :], 0.0)
    logits = z @ prepped["w_cls2_f32"] + prepped["b_cls2_f32"][None, :]        # (1, 1)
    return logits


if __name__ == "__main__":
    key = jax.random.PRNGKey(0)
    k_param, k_wsi, k_img, k_clin = jax.random.split(key, 4)

    params = init_params(k_param)
    prepped = prepare_weights(params)     # one-time weight prep (hoisted out of forward)

    n_wsi_tokens = 40
    x_wsi = jax.random.normal(k_wsi, (1, n_wsi_tokens, WSI_EMBED_DIM), jnp.float32)
    x_img_features = jax.random.normal(k_img, (1, NUM_SLICES, IMG_EMBED_DIM), jnp.float32)
    clinical_data = jax.random.normal(k_clin, (1, 4), jnp.float32)

    # tile=16 exercises: the 2-way core split (grid (2, 2)), the multi-step
    # online-softmax carry, and the pad-free ragged edge-block masking path.
    logits = survpath_forward(prepped, x_wsi, x_img_features, clinical_data, tile=16)
    logits = jax.block_until_ready(logits)
    assert logits.shape == (1, 1) and bool(jnp.all(jnp.isfinite(logits)))
    print("KERNEL_OK")
</pallas_src>

<mosaic_0001>
module attributes {stable_mosaic.version = 11 : i64} {
  func.func @_survpath_kernel(%arg0: i32, %arg1: i32, %arg2: memref<1x16x1024xf32, #tpu.memory_space<vmem>>, %arg3: memref<1024x256xbf16, #tpu.memory_space<vmem>>, %arg4: memref<1x3x2048xf32, #tpu.memory_space<vmem>>, %arg5: memref<2048x256xbf16, #tpu.memory_space<vmem>>, %arg6: memref<256x384xbf16, #tpu.memory_space<vmem>>, %arg7: memref<128x512xbf16, #tpu.memory_space<vmem>>, %arg8: memref<512x128xbf16, #tpu.memory_space<vmem>>, %arg9: memref<1x2176xf32, #tpu.memory_space<vmem>>, %arg10: memref<1x3x1xf32, #tpu.memory_space<vmem>>, %arg11: memref<1x3x1xf32, #tpu.memory_space<vmem>>, %arg12: memref<1x3x128xf32, #tpu.memory_space<vmem>>, %arg13: memref<1x1x128xf32, #tpu.memory_space<vmem>>, %arg14: memref<3x128xf32, #tpu.memory_space<vmem>>, %arg15: memref<3x128xf32, #tpu.memory_space<vmem>>, %arg16: memref<3x128xf32, #tpu.memory_space<vmem>>, %arg17: memref<3x1xf32, #tpu.memory_space<vmem>>, %arg18: memref<3x1xf32, #tpu.memory_space<vmem>>, %arg19: memref<3x128xf32, #tpu.memory_space<vmem>>, %arg20: memref<1x128xf32, #tpu.memory_space<vmem>>) attributes {dimension_semantics = [#tpu.dimension_semantics<parallel>, #tpu.dimension_semantics<arbitrary>], iteration_bounds = array<i64: 2, 2>, scalar_prefetch = 0 : i64, scratch_operands = 7 : i64, tpu.core_type = #tpu.core_type<tc>, window_params = [{transform_indices = @transform_0, window_bounds = array<i64: 1, 16, 1024>}, {pipeline_mode = #tpu.pipeline_mode<synchronous>, transform_indices = @transform_1, window_bounds = array<i64: 1024, 256>}, {pipeline_mode = #tpu.pipeline_mode<synchronous>, transform_indices = @transform_2, window_bounds = array<i64: 1, 3, 2048>}, {pipeline_mode = #tpu.pipeline_mode<synchronous>, transform_indices = @transform_3, window_bounds = array<i64: 2048, 256>}, {pipeline_mode = #tpu.pipeline_mode<synchronous>, transform_indices = @transform_4, window_bounds = array<i64: 256, 384>}, {pipeline_mode = #tpu.pipeline_mode<synchronous>, transform_indices = @transform_5, window_bounds = array<i64: 128, 512>}, {pipeline_mode = #tpu.pipeline_mode<synchronous>, transform_indices = @transform_6, window_bounds = array<i64: 512, 128>}, {pipeline_mode = #tpu.pipeline_mode<synchronous>, transform_indices = @transform_7, window_bounds = array<i64: 1, 2176>}, {transform_indices = @transform_8, window_bounds = array<i64: 1, 3, 1>}, {transform_indices = @transform_9, window_bounds = array<i64: 1, 3, 1>}, {transform_indices = @transform_10, window_bounds = array<i64: 1, 3, 128>}, {transform_indices = @transform_11, window_bounds = array<i64: 1, 1, 128>}]} {
    %c0_i32 = arith.constant 0 : i32
    %0 = arith.cmpi eq, %arg1, %c0_i32 : i32
    %1 = arith.extui %0 : i1 to i32
    %c0_i32_0 = arith.constant 0 : i32
    %2 = arith.cmpi ne, %1, %c0_i32_0 : i32
    scf.if %2 {
      %c0_81 = arith.constant 0 : index
      %c0_82 = arith.constant 0 : index
      %c0_83 = arith.constant 0 : index
      %184 = vector.load %arg4[%c0_81, %c0_82, %c0_83] : memref<1x3x2048xf32, #tpu.memory_space<vmem>>, vector<1x3x2048xf32>
      %185 = vector.shape_cast %184 : vector<1x3x2048xf32> to vector<3x2048xf32>
      %186 = arith.truncf %185 : vector<3x2048xf32> to vector<3x2048xbf16>
      %c0_84 = arith.constant 0 : index
      %c0_85 = arith.constant 0 : index
      %187 = vector.load %arg5[%c0_84, %c0_85] : memref<2048x256xbf16, #tpu.memory_space<vmem>>, vector<2048x256xbf16>
      %cst_86 = arith.constant dense<0.000000e+00> : vector<3x256xf32>
      %188 = tpu.matmul %186, %187, %cst_86 {dimension_numbers = #tpu.dot_dimension_numbers<[1], [0], [0], [1], [0, 0, 1, 1], [], []>} : vector<3x2048xbf16>, vector<2048x256xbf16>, vector<3x256xf32> -> vector<3x256xf32>
      %c0_87 = arith.constant 0 : index
      %c256 = arith.constant 256 : index
      %189 = vector.load %arg9[%c0_87, %c256] : memref<1x2176xf32, #tpu.memory_space<vmem>>, vector<1x256xf32>
      %190 = vector.broadcast %189 : vector<1x256xf32> to vector<3x256xf32>
      %191 = arith.addf %188, %190 : vector<3x256xf32>
      %c0_88 = arith.constant 0 : index
      %c512_89 = arith.constant 512 : index
      %192 = vector.load %arg9[%c0_88, %c512_89] : memref<1x2176xf32, #tpu.memory_space<vmem>>, vector<1x256xf32>
      %c0_90 = arith.constant 0 : index
      %c768_91 = arith.constant 768 : index
      %193 = vector.load %arg9[%c0_90, %c768_91] : memref<1x2176xf32, #tpu.memory_space<vmem>>, vector<1x256xf32>
      %cst_92 = arith.constant dense<0.000000e+00> : vector<3xf32>
      %194 = vector.multi_reduction <add>, %191, %cst_92 [1] : vector<3x256xf32> to vector<3xf32>
      %195 = vector.shape_cast %194 : vector<3xf32> to vector<3x1xf32>
      %cst_93 = arith.constant 2.560000e+02 : f32
      %196 = vector.broadcast %cst_93 : f32 to vector<3x1xf32>
      %197 = arith.divf %195, %196 : vector<3x1xf32>
      %198 = arith.mulf %191, %191 : vector<3x256xf32>
      %cst_94 = arith.constant dense<0.000000e+00> : vector<3xf32>
      %199 = vector.multi_reduction <add>, %198, %cst_94 [1] : vector<3x256xf32> to vector<3xf32>
      %200 = vector.shape_cast %199 : vector<3xf32> to vector<3x1xf32>
      %cst_95 = arith.constant 2.560000e+02 : f32
      %201 = vector.broadcast %cst_95 : f32 to vector<3x1xf32>
      %202 = arith.divf %200, %201 : vector<3x1xf32>
      %203 = vector.broadcast %197 : vector<3x1xf32> to vector<3x256xf32>
      %204 = arith.subf %191, %203 : vector<3x256xf32>
      %205 = arith.mulf %197, %197 : vector<3x1xf32>
      %206 = arith.subf %202, %205 : vector<3x1xf32>
      %cst_96 = arith.constant 9.99999974E-6 : f32
      %207 = vector.broadcast %cst_96 : f32 to vector<3x1xf32>
      %208 = arith.addf %206, %207 : vector<3x1xf32>
      %209 = math.rsqrt %208 : vector<3x1xf32>
      %210 = vector.broadcast %209 : vector<3x1xf32> to vector<3x256xf32>
      %211 = arith.mulf %204, %210 : vector<3x256xf32>
      %212 = vector.broadcast %192 : vector<1x256xf32> to vector<3x256xf32>
      %213 = arith.mulf %211, %212 : vector<3x256xf32>
      %214 = vector.broadcast %193 : vector<1x256xf32> to vector<3x256xf32>
      %215 = arith.addf %213, %214 : vector<3x256xf32>
      %216 = arith.truncf %215 : vector<3x256xf32> to vector<3x256xbf16>
      %c0_97 = arith.constant 0 : index
      %c0_98 = arith.constant 0 : index
      %217 = vector.load %arg6[%c0_97, %c0_98] : memref<256x384xbf16, #tpu.memory_space<vmem>>, vector<256x384xbf16>
      %cst_99 = arith.constant dense<0.000000e+00> : vector<3x384xf32>
      %218 = tpu.matmul %216, %217, %cst_99 {dimension_numbers = #tpu.dot_dimension_numbers<[1], [0], [0], [1], [0, 0, 1, 1], [], []>} : vector<3x256xbf16>, vector<256x384xbf16>, vector<3x384xf32> -> vector<3x384xf32>
      %219 = vector.extract_strided_slice %218 {offsets = [0, 0], sizes = [3, 128], strides = [1, 1]} : vector<3x384xf32> to vector<3x128xf32>
      %220 = vector.extract_strided_slice %218 {offsets = [0, 128], sizes = [3, 128], strides = [1, 1]} : vector<3x384xf32> to vector<3x128xf32>
      %221 = vector.extract_strided_slice %218 {offsets = [0, 256], sizes = [3, 128], strides = [1, 1]} : vector<3x384xf32> to vector<3x128xf32>
      %c0_100 = arith.constant 0 : index
      %c0_101 = arith.constant 0 : index
      %222 = vector.load %arg14[%c0_100, %c0_101] : memref<3x128xf32, #tpu.memory_space<vmem>>, vector<3x128xf32>
      tpu.vector_store %arg14[%c0_100, %c0_101], %219 {strides = array<i32>} : memref<3x128xf32, #tpu.memory_space<vmem>>, vector<3x128xf32>,
      %c0_102 = arith.constant 0 : index
      %c0_103 = arith.constant 0 : index
      %223 = vector.load %arg15[%c0_102, %c0_103] : memref<3x128xf32, #tpu.memory_space<vmem>>, vector<3x128xf32>
      tpu.vector_store %arg15[%c0_102, %c0_103], %220 {strides = array<i32>} : memref<3x128xf32, #tpu.memory_space<vmem>>, vector<3x128xf32>,
      %c0_104 = arith.constant 0 : index
      %c0_105 = arith.constant 0 : index
      %224 = vector.load %arg16[%c0_104, %c0_105] : memref<3x128xf32, #tpu.memory_space<vmem>>, vector<3x128xf32>
      tpu.vector_store %arg16[%c0_104, %c0_105], %221 {strides = array<i32>} : memref<3x128xf32, #tpu.memory_space<vmem>>, vector<3x128xf32>,
      %cst_106 = arith.constant dense<0.000000e+00> : vector<3x3xf32>
      %225 = tpu.matmul %219, %220, %cst_106 {dimension_numbers = #tpu.dot_dimension_numbers<[1], [1], [0], [0], [0, 0, 1, 0], [], []>} : vector<3x128xf32>, vector<3x128xf32>, vector<3x3xf32> -> vector<3x3xf32>
      %cst_107 = arith.constant dense<0xFF800000> : vector<3xf32>
      %226 = vector.multi_reduction <maximumf>, %225, %cst_107 [1] : vector<3x3xf32> to vector<3xf32>
      %227 = vector.shape_cast %226 : vector<3xf32> to vector<3x1xf32>
      %228 = vector.broadcast %227 : vector<3x1xf32> to vector<3x3xf32>
      %229 = arith.subf %225, %228 : vector<3x3xf32>
      %230 = math.exp %229 : vector<3x3xf32>
      %c0_i32_108 = arith.constant 0 : i32
      %231 = arith.cmpi eq, %arg0, %c0_i32_108 : i32
      %cst_109 = arith.constant 0xFF800000 : f32
      %232 = vector.broadcast %cst_109 : f32 to vector<3x1xf32>
      %233 = arith.select %231, %227, %232 : vector<3x1xf32>
      %c0_110 = arith.constant 0 : index
      %c0_111 = arith.constant 0 : index
      %234 = vector.load %arg17[%c0_110, %c0_111] : memref<3x1xf32, #tpu.memory_space<vmem>>, vector<3x1xf32>
      tpu.vector_store %arg17[%c0_110, %c0_111], %233 {strides = array<i32>} : memref<3x1xf32, #tpu.memory_space<vmem>>, vector<3x1xf32>,
      %cst_112 = arith.constant dense<0.000000e+00> : vector<3xf32>
      %235 = vector.multi_reduction <add>, %230, %cst_112 [1] : vector<3x3xf32> to vector<3xf32>
      %236 = vector.shape_cast %235 : vector<3xf32> to vector<3x1xf32>
      %cst_113 = arith.constant 0.000000e+00 : f32
      %237 = vector.broadcast %cst_113 : f32 to vector<3x1xf32>
      %238 = arith.select %231, %236, %237 : vector<3x1xf32>
      %c0_114 = arith.constant 0 : index
      %c0_115 = arith.constant 0 : index
      %239 = vector.load %arg18[%c0_114, %c0_115] : memref<3x1xf32, #tpu.memory_space<vmem>>, vector<3x1xf32>
      tpu.vector_store %arg18[%c0_114, %c0_115], %238 {strides = array<i32>} : memref<3x1xf32, #tpu.memory_space<vmem>>, vector<3x1xf32>,
      %cst_116 = arith.constant dense<0.000000e+00> : vector<3x128xf32>
      %240 = tpu.matmul %230, %221, %cst_116 {dimension_numbers = #tpu.dot_dimension_numbers<[1], [0], [0], [1], [0, 0, 1, 1], [], []>} : vector<3x3xf32>, vector<3x128xf32>, vector<3x128xf32> -> vector<3x128xf32>
      %cst_117 = arith.constant 0.000000e+00 : f32
      %241 = vector.broadcast %cst_117 : f32 to vector<3x128xf32>
      %242 = arith.select %231, %240, %241 : vector<3x128xf32>
      %c0_118 = arith.constant 0 : index
      %c0_119 = arith.constant 0 : index
      %243 = vector.load %arg19[%c0_118, %c0_119] : memref<3x128xf32, #tpu.memory_space<vmem>>, vector<3x128xf32>
      tpu.vector_store %arg19[%c0_118, %c0_119], %242 {strides = array<i32>} : memref<3x128xf32, #tpu.memory_space<vmem>>, vector<3x128xf32>,
      %cst_120 = arith.constant 0.000000e+00 : f32
      %244 = vector.broadcast %cst_120 : f32 to vector<1x128xf32>
      %c0_121 = arith.constant 0 : index
      %c0_122 = arith.constant 0 : index
      %245 = vector.load %arg20[%c0_121, %c0_122] : memref<1x128xf32, #tpu.memory_space<vmem>>, vector<1x128xf32>
      tpu.vector_store %arg20[%c0_121, %c0_122], %244 {strides = array<i32>} : memref<1x128xf32, #tpu.memory_space<vmem>>, vector<1x128xf32>,
    } else {
    }
    %c0 = arith.constant 0 : index
    %c0_1 = arith.constant 0 : index
    %c0_2 = arith.constant 0 : index
    %3 = vector.load %arg2[%c0, %c0_1, %c0_2] : memref<1x16x1024xf32, #tpu.memory_space<vmem>>, vector<1x16x1024xf32>
    %4 = vector.shape_cast %3 : vector<1x16x1024xf32> to vector<16x1024xf32>
    %5 = arith.truncf %4 : vector<16x1024xf32> to vector<16x1024xbf16>
    %c0_3 = arith.constant 0 : index
    %c0_4 = arith.constant 0 : index
    %6 = vector.load %arg3[%c0_3, %c0_4] : memref<1024x256xbf16, #tpu.memory_space<vmem>>, vector<1024x256xbf16>
    %cst = arith.constant dense<0.000000e+00> : vector<16x256xf32>
    %7 = tpu.matmul %5, %6, %cst {dimension_numbers = #tpu.dot_dimension_numbers<[1], [0], [0], [1], [0, 0, 1, 1], [], []>} : vector<16x1024xbf16>, vector<1024x256xbf16>, vector<16x256xf32> -> vector<16x256xf32>
    %c0_5 = arith.constant 0 : index
    %c0_6 = arith.constant 0 : index
    %8 = vector.load %arg9[%c0_5, %c0_6] : memref<1x2176xf32, #tpu.memory_space<vmem>>, vector<1x256xf32>
    %9 = vector.broadcast %8 : vector<1x256xf32> to vector<16x256xf32>
    %10 = arith.addf %7, %9 : vector<16x256xf32>
    %c0_7 = arith.constant 0 : index
    %c512 = arith.constant 512 : index
    %11 = vector.load %arg9[%c0_7, %c512] : memref<1x2176xf32, #tpu.memory_space<vmem>>, vector<1x256xf32>
    %c0_8 = arith.constant 0 : index
    %c768 = arith.constant 768 : index
    %12 = vector.load %arg9[%c0_8, %c768] : memref<1x2176xf32, #tpu.memory_space<vmem>>, vector<1x256xf32>
    %cst_9 = arith.constant dense<0.000000e+00> : vector<16xf32>
    %13 = vector.multi_reduction <add>, %10, %cst_9 [1] : vector<16x256xf32> to vector<16xf32>
    %14 = vector.shape_cast %13 : vector<16xf32> to vector<16x1xf32>
    %cst_10 = arith.constant 2.560000e+02 : f32
    %15 = vector.broadcast %cst_10 : f32 to vector<16x1xf32>
    %16 = arith.divf %14, %15 : vector<16x1xf32>
    %17 = arith.mulf %10, %10 : vector<16x256xf32>
    %cst_11 = arith.constant dense<0.000000e+00> : vector<16xf32>
    %18 = vector.multi_reduction <add>, %17, %cst_11 [1] : vector<16x256xf32> to vector<16xf32>
    %19 = vector.shape_cast %18 : vector<16xf32> to vector<16x1xf32>
    %cst_12 = arith.constant 2.560000e+02 : f32
    %20 = vector.broadcast %cst_12 : f32 to vector<16x1xf32>
    %21 = arith.divf %19, %20 : vector<16x1xf32>
    %22 = vector.broadcast %16 : vector<16x1xf32> to vector<16x256xf32>
    %23 = arith.subf %10, %22 : vector<16x256xf32>
    %24 = arith.mulf %16, %16 : vector<16x1xf32>
    %25 = arith.subf %21, %24 : vector<16x1xf32>
    %cst_13 = arith.constant 9.99999974E-6 : f32
    %26 = vector.broadcast %cst_13 : f32 to vector<16x1xf32>
    %27 = arith.addf %25, %26 : vector<16x1xf32>
    %28 = math.rsqrt %27 : vector<16x1xf32>
    %29 = vector.broadcast %28 : vector<16x1xf32> to vector<16x256xf32>
    %30 = arith.mulf %23, %29 : vector<16x256xf32>
    %31 = vector.broadcast %11 : vector<1x256xf32> to vector<16x256xf32>
    %32 = arith.mulf %30, %31 : vector<16x256xf32>
    %33 = vector.broadcast %12 : vector<1x256xf32> to vector<16x256xf32>
    %34 = arith.addf %32, %33 : vector<16x256xf32>
    %35 = arith.truncf %34 : vector<16x256xf32> to vector<16x256xbf16>
    %c0_14 = arith.constant 0 : index
    %c0_15 = arith.constant 0 : index
    %36 = vector.load %arg6[%c0_14, %c0_15] : memref<256x384xbf16, #tpu.memory_space<vmem>>, vector<256x384xbf16>
    %cst_16 = arith.constant dense<0.000000e+00> : vector<16x384xf32>
    %37 = tpu.matmul %35, %36, %cst_16 {dimension_numbers = #tpu.dot_dimension_numbers<[1], [0], [0], [1], [0, 0, 1, 1], [], []>} : vector<16x256xbf16>, vector<256x384xbf16>, vector<16x384xf32> -> vector<16x384xf32>
    %38 = vector.extract_strided_slice %37 {offsets = [0, 0], sizes = [16, 128], strides = [1, 1]} : vector<16x384xf32> to vector<16x128xf32>
    %39 = vector.extract_strided_slice %37 {offsets = [0, 128], sizes = [16, 128], strides = [1, 1]} : vector<16x384xf32> to vector<16x128xf32>
    %40 = vector.extract_strided_slice %37 {offsets = [0, 256], sizes = [16, 128], strides = [1, 1]} : vector<16x384xf32> to vector<16x128xf32>
    %c2_i32 = arith.constant 2 : i32
    %41 = arith.muli %arg0, %c2_i32 : i32
    %42 = arith.addi %41, %arg1 : i32
    %c16_i32 = arith.constant 16 : i32
    %43 = arith.muli %42, %c16_i32 : i32
    %44 = tpu.iota {dimensions = array<i32: 0>} : vector<16x1xi32>
    %45 = vector.broadcast %43 : i32 to vector<16x1xi32>
    %46 = arith.addi %45, %44 : vector<16x1xi32>
    %c40_i32 = arith.constant 40 : i32
    %47 = vector.broadcast %c40_i32 : i32 to vector<16x1xi32>
    %48 = arith.cmpi slt, %46, %47 : vector<16x1xi32>
    %c0_17 = arith.constant 0 : index
    %c0_18 = arith.constant 0 : index
    %49 = vector.load %arg15[%c0_17, %c0_18] : memref<3x128xf32, #tpu.memory_space<vmem>>, vector<3x128xf32>
    %cst_19 = arith.constant dense<0.000000e+00> : vector<16x3xf32>
    %50 = tpu.matmul %38, %49, %cst_19 {dimension_numbers = #tpu.dot_dimension_numbers<[1], [1], [0], [0], [0, 0, 1, 0], [], []>} : vector<16x128xf32>, vector<3x128xf32>, vector<16x3xf32> -> vector<16x3xf32>
    %cst_20 = arith.constant dense<0xFF800000> : vector<16xf32>
    %51 = vector.multi_reduction <maximumf>, %50, %cst_20 [1] : vector<16x3xf32> to vector<16xf32>
    %52 = vector.shape_cast %51 : vector<16xf32> to vector<16x1xf32>
    %53 = vector.broadcast %52 : vector<16x1xf32> to vector<16x3xf32>
    %54 = arith.subf %50, %53 : vector<16x3xf32>
    %55 = math.exp %54 : vector<16x3xf32>
    %cst_21 = arith.constant dense<0.000000e+00> : vector<16xf32>
    %56 = vector.multi_reduction <add>, %55, %cst_21 [1] : vector<16x3xf32> to vector<16xf32>
    %57 = vector.shape_cast %56 : vector<16xf32> to vector<16x1xf32>
    %58 = tpu.reciprocal %57 {approx = true} : vector<16x1xf32> -> vector<16x1xf32>
    %59 = vector.broadcast %58 : vector<16x1xf32> to vector<16x3xf32>
    %60 = arith.mulf %55, %59 : vector<16x3xf32>
    %c0_22 = arith.constant 0 : index
    %c0_23 = arith.constant 0 : index
    %61 = vector.load %arg16[%c0_22, %c0_23] : memref<3x128xf32, #tpu.memory_space<vmem>>, vector<3x128xf32>
    %cst_24 = arith.constant dense<0.000000e+00> : vector<16x128xf32>
    %62 = tpu.matmul %60, %61, %cst_24 {dimension_numbers = #tpu.dot_dimension_numbers<[1], [0], [0], [1], [0, 0, 1, 1], [], []>} : vector<16x3xf32>, vector<3x128xf32>, vector<16x128xf32> -> vector<16x128xf32>
    %c0_25 = arith.constant 0 : index
    %c1024 = arith.constant 1024 : index
    %63 = vector.load %arg9[%c0_25, %c1024] : memref<1x2176xf32, #tpu.memory_space<vmem>>, vector<1x128xf32>
    %c0_26 = arith.constant 0 : index
    %c1152 = arith.constant 1152 : index
    %64 = vector.load %arg9[%c0_26, %c1152] : memref<1x2176xf32, #tpu.memory_space<vmem>>, vector<1x128xf32>
    %cst_27 = arith.constant dense<0.000000e+00> : vector<16xf32>
    %65 = vector.multi_reduction <add>, %62, %cst_27 [1] : vector<16x128xf32> to vector<16xf32>
    %66 = vector.shape_cast %65 : vector<16xf32> to vector<16x1xf32>
    %cst_28 = arith.constant 1.280000e+02 : f32
    %67 = vector.broadcast %cst_28 : f32 to vector<16x1xf32>
    %68 = arith.divf %66, %67 : vector<16x1xf32>
    %69 = arith.mulf %62, %62 : vector<16x128xf32>
    %cst_29 = arith.constant dense<0.000000e+00> : vector<16xf32>
    %70 = vector.multi_reduction <add>, %69, %cst_29 [1] : vector<16x128xf32> to vector<16xf32>
    %71 = vector.shape_cast %70 : vector<16xf32> to vector<16x1xf32>
    %cst_30 = arith.constant 1.280000e+02 : f32
    %72 = vector.broadcast %cst_30 : f32 to vector<16x1xf32>
    %73 = arith.divf %71, %72 : vector<16x1xf32>
    %74 = vector.broadcast %68 : vector<16x1xf32> to vector<16x128xf32>
    %75 = arith.subf %62, %74 : vector<16x128xf32>
    %76 = arith.mulf %68, %68 : vector<16x1xf32>
    %77 = arith.subf %73, %76 : vector<16x1xf32>
    %cst_31 = arith.constant 9.99999974E-6 : f32
    %78 = vector.broadcast %cst_31 : f32 to vector<16x1xf32>
    %79 = arith.addf %77, %78 : vector<16x1xf32>
    %80 = math.rsqrt %79 : vector<16x1xf32>
    %81 = vector.broadcast %80 : vector<16x1xf32> to vector<16x128xf32>
    %82 = arith.mulf %75, %81 : vector<16x128xf32>
    %83 = vector.broadcast %63 : vector<1x128xf32> to vector<16x128xf32>
    %84 = arith.mulf %82, %83 : vector<16x128xf32>
    %85 = vector.broadcast %64 : vector<1x128xf32> to vector<16x128xf32>
    %86 = arith.addf %84, %85 : vector<16x128xf32>
    %87 = arith.truncf %86 : vector<16x128xf32> to vector<16x128xbf16>
    %c0_32 = arith.constant 0 : index
    %c0_33 = arith.constant 0 : index
    %88 = vector.load %arg7[%c0_32, %c0_33] : memref<128x512xbf16, #tpu.memory_space<vmem>>, vector<128x512xbf16>
    %cst_34 = arith.constant dense<0.000000e+00> : vector<16x512xf32>
    %89 = tpu.matmul %87, %88, %cst_34 {dimension_numbers = #tpu.dot_dimension_numbers<[1], [0], [0], [1], [0, 0, 1, 1], [], []>} : vector<16x128xbf16>, vector<128x512xbf16>, vector<16x512xf32> -> vector<16x512xf32>
    %c0_35 = arith.constant 0 : index
    %c1664 = arith.constant 1664 : index
    %90 = vector.load %arg9[%c0_35, %c1664] : memref<1x2176xf32, #tpu.memory_space<vmem>>, vector<1x512xf32>
    %91 = vector.broadcast %90 : vector<1x512xf32> to vector<16x512xf32>
    %92 = arith.addf %89, %91 : vector<16x512xf32>
    %cst_36 = arith.constant 5.000000e-01 : f32
    %93 = vector.broadcast %cst_36 : f32 to vector<16x512xf32>
    %94 = arith.mulf %93, %92 : vector<16x512xf32>
    %95 = arith.mulf %92, %92 : vector<16x512xf32>
    %96 = arith.mulf %95, %92 : vector<16x512xf32>
    %cst_37 = arith.constant 4.471500e-02 : f32
    %97 = vector.broadcast %cst_37 : f32 to vector<16x512xf32>
    %98 = arith.mulf %97, %96 : vector<16x512xf32>
    %99 = arith.addf %92, %98 : vector<16x512xf32>
    %cst_38 = arith.constant 0.797884583 : f32
    %100 = vector.broadcast %cst_38 : f32 to vector<16x512xf32>
    %101 = arith.mulf %100, %99 : vector<16x512xf32>
    %102 = math.tanh %101 : vector<16x512xf32>
    %cst_39 = arith.constant 1.000000e+00 : f32
    %103 = vector.broadcast %cst_39 : f32 to vector<16x512xf32>
    %104 = arith.addf %103, %102 : vector<16x512xf32>
    %105 = arith.mulf %94, %104 : vector<16x512xf32>
    %106 = arith.truncf %105 : vector<16x512xf32> to vector<16x512xbf16>
    %c0_40 = arith.constant 0 : index
    %c0_41 = arith.constant 0 : index
    %107 = vector.load %arg8[%c0_40, %c0_41] : memref<512x128xbf16, #tpu.memory_space<vmem>>, vector<512x128xbf16>
    %cst_42 = arith.constant dense<0.000000e+00> : vector<16x128xf32>
    %108 = tpu.matmul %106, %107, %cst_42 {dimension_numbers = #tpu.dot_dimension_numbers<[1], [0], [0], [1], [0, 0, 1, 1], [], []>} : vector<16x512xbf16>, vector<512x128xbf16>, vector<16x128xf32> -> vector<16x128xf32>
    %c0_43 = arith.constant 0 : index
    %c1280 = arith.constant 1280 : index
    %109 = vector.load %arg9[%c0_43, %c1280] : memref<1x2176xf32, #tpu.memory_space<vmem>>, vector<1x128xf32>
    %110 = vector.broadcast %109 : vector<1x128xf32> to vector<16x128xf32>
    %111 = arith.addf %108, %110 : vector<16x128xf32>
    %c0_44 = arith.constant 0 : index
    %c1408 = arith.constant 1408 : index
    %112 = vector.load %arg9[%c0_44, %c1408] : memref<1x2176xf32, #tpu.memory_space<vmem>>, vector<1x128xf32>
    %c0_45 = arith.constant 0 : index
    %c1536 = arith.constant 1536 : index
    %113 = vector.load %arg9[%c0_45, %c1536] : memref<1x2176xf32, #tpu.memory_space<vmem>>, vector<1x128xf32>
    %cst_46 = arith.constant dense<0.000000e+00> : vector<16xf32>
    %114 = vector.multi_reduction <add>, %111, %cst_46 [1] : vector<16x128xf32> to vector<16xf32>
    %115 = vector.shape_cast %114 : vector<16xf32> to vector<16x1xf32>
    %cst_47 = arith.constant 1.280000e+02 : f32
    %116 = vector.broadcast %cst_47 : f32 to vector<16x1xf32>
    %117 = arith.divf %115, %116 : vector<16x1xf32>
    %118 = arith.mulf %111, %111 : vector<16x128xf32>
    %cst_48 = arith.constant dense<0.000000e+00> : vector<16xf32>
    %119 = vector.multi_reduction <add>, %118, %cst_48 [1] : vector<16x128xf32> to vector<16xf32>
    %120 = vector.shape_cast %119 : vector<16xf32> to vector<16x1xf32>
    %cst_49 = arith.constant 1.280000e+02 : f32
    %121 = vector.broadcast %cst_49 : f32 to vector<16x1xf32>
    %122 = arith.divf %120, %121 : vector<16x1xf32>
    %123 = vector.broadcast %117 : vector<16x1xf32> to vector<16x128xf32>
    %124 = arith.subf %111, %123 : vector<16x128xf32>
    %125 = arith.mulf %117, %117 : vector<16x1xf32>
    %126 = arith.subf %122, %125 : vector<16x1xf32>
    %cst_50 = arith.constant 9.99999974E-6 : f32
    %127 = vector.broadcast %cst_50 : f32 to vector<16x1xf32>
    %128 = arith.addf %126, %127 : vector<16x1xf32>
    %129 = math.rsqrt %128 : vector<16x1xf32>
    %130 = vector.broadcast %129 : vector<16x1xf32> to vector<16x128xf32>
    %131 = arith.mulf %124, %130 : vector<16x128xf32>
    %132 = vector.broadcast %112 : vector<1x128xf32> to vector<16x128xf32>
    %133 = arith.mulf %131, %132 : vector<16x128xf32>
    %134 = vector.broadcast %113 : vector<1x128xf32> to vector<16x128xf32>
    %135 = arith.addf %133, %134 : vector<16x128xf32>
    %cst_51 = arith.constant 0.000000e+00 : f32
    %136 = vector.shape_cast %48 : vector<16x1xi1> to vector<16x1xi1>
    %137 = vector.broadcast %136 : vector<16x1xi1> to vector<16x128xi1>
    %138 = vector.broadcast %cst_51 : f32 to vector<16x128xf32>
    %139 = arith.select %137, %135, %138 : vector<16x128xi1>, vector<16x128xf32>
    %c0_52 = arith.constant 0 : index
    %c0_53 = arith.constant 0 : index
    %140 = vector.load %arg20[%c0_52, %c0_53] : memref<1x128xf32, #tpu.memory_space<vmem>>, vector<1x128xf32>
    %cst_54 = arith.constant dense<0.000000e+00> : vector<128xf32>
    %141 = vector.multi_reduction <add>, %139, %cst_54 [0] : vector<16x128xf32> to vector<128xf32>
    %142 = vector.shape_cast %141 : vector<128xf32> to vector<1x128xf32>
    %143 = arith.addf %140, %142 : vector<1x128xf32>
    %c0_55 = arith.constant 0 : index
    %c0_56 = arith.constant 0 : index
    %144 = vector.load %arg20[%c0_55, %c0_56] : memref<1x128xf32, #tpu.memory_space<vmem>>, vector<1x128xf32>
    tpu.vector_store %arg20[%c0_55, %c0_56], %143 {strides = array<i32>} : memref<1x128xf32, #tpu.memory_space<vmem>>, vector<1x128xf32>,
    %cst_57 = arith.constant 0.000000e+00 : f32
    %145 = vector.shape_cast %48 : vector<16x1xi1> to vector<16x1xi1>
    %146 = vector.broadcast %145 : vector<16x1xi1> to vector<16x128xi1>
    %147 = vector.broadcast %cst_57 : f32 to vector<16x128xf32>
    %148 = arith.select %146, %40, %147 : vector<16x128xi1>, vector<16x128xf32>
    %c0_58 = arith.constant 0 : index
    %c0_59 = arith.constant 0 : index
    %149 = vector.load %arg14[%c0_58, %c0_59] : memref<3x128xf32, #tpu.memory_space<vmem>>, vector<3x128xf32>
    %cst_60 = arith.constant dense<0.000000e+00> : vector<3x16xf32>
    %150 = tpu.matmul %149, %39, %cst_60 {dimension_numbers = #tpu.dot_dimension_numbers<[1], [1], [0], [0], [0, 0, 1, 0], [], []>} : vector<3x128xf32>, vector<16x128xf32>, vector<3x16xf32> -> vector<3x16xf32>
    %151 = tpu.iota {dimensions = array<i32: 1>} : vector<3x16xi32>
    %152 = vector.broadcast %43 : i32 to vector<3x16xi32>
    %153 = arith.addi %152, %151 : vector<3x16xi32>
    %c40_i32_61 = arith.constant 40 : i32
    %154 = vector.broadcast %c40_i32_61 : i32 to vector<3x16xi32>
    %155 = arith.cmpi slt, %153, %154 : vector<3x16xi32>
    %cst_62 = arith.constant -1.000000e+30 : f32
    %156 = vector.broadcast %cst_62 : f32 to vector<3x16xf32>
    %157 = arith.select %155, %150, %156 : vector<3x16xi1>, vector<3x16xf32>
    %c0_63 = arith.constant 0 : index
    %c0_64 = arith.constant 0 : index
    %158 = vector.load %arg17[%c0_63, %c0_64] : memref<3x1xf32, #tpu.memory_space<vmem>>, vector<3x1xf32>
    %cst_65 = arith.constant dense<0xFF800000> : vector<3xf32>
    %159 = vector.multi_reduction <maximumf>, %157, %cst_65 [1] : vector<3x16xf32> to vector<3xf32>
    %160 = vector.shape_cast %159 : vector<3xf32> to vector<3x1xf32>
    %161 = arith.maximumf %158, %160 : vector<3x1xf32>
    %c0_66 = arith.constant 0 : index
    %c0_67 = arith.constant 0 : index
    %162 = vector.load %arg17[%c0_66, %c0_67] : memref<3x1xf32, #tpu.memory_space<vmem>>, vector<3x1xf32>
    %163 = arith.subf %162, %161 : vector<3x1xf32>
    %164 = math.exp %163 : vector<3x1xf32>
    %165 = vector.broadcast %161 : vector<3x1xf32> to vector<3x16xf32>
    %166 = arith.subf %157, %165 : vector<3x16xf32>
    %167 = math.exp %166 : vector<3x16xf32>
    %c0_68 = arith.constant 0 : index
    %c0_69 = arith.constant 0 : index
    %168 = vector.load %arg18[%c0_68, %c0_69] : memref<3x1xf32, #tpu.memory_space<vmem>>, vector<3x1xf32>
    %169 = arith.mulf %164, %168 : vector<3x1xf32>
    %cst_70 = arith.constant dense<0.000000e+00> : vector<3xf32>
    %170 = vector.multi_reduction <add>, %167, %cst_70 [1] : vector<3x16xf32> to vector<3xf32>
    %171 = vector.shape_cast %170 : vector<3xf32> to vector<3x1xf32>
    %172 = arith.addf %169, %171 : vector<3x1xf32>
    %c0_71 = arith.constant 0 : index
    %c0_72 = arith.constant 0 : index
    %173 = vector.load %arg18[%c0_71, %c0_72] : memref<3x1xf32, #tpu.memory_space<vmem>>, vector<3x1xf32>
    tpu.vector_store %arg18[%c0_71, %c0_72], %172 {strides = array<i32>} : memref<3x1xf32, #tpu.memory_space<vmem>>, vector<3x1xf32>,
    %c0_73 = arith.constant 0 : index
    %c0_74 = arith.constant 0 : index
    %174 = vector.load %arg19[%c0_73, %c0_74] : memref<3x128xf32, #tpu.memory_space<vmem>>, vector<3x128xf32>
    %175 = vector.broadcast %164 : vector<3x1xf32> to vector<3x128xf32>
    %176 = arith.mulf %175, %174 : vector<3x128xf32>
    %cst_75 = arith.constant dense<0.000000e+00> : vector<3x128xf32>
    %177 = tpu.matmul %167, %148, %cst_75 {dimension_numbers = #tpu.dot_dimension_numbers<[1], [0], [0], [1], [0, 0, 1, 1], [], []>} : vector<3x16xf32>, vector<16x128xf32>, vector<3x128xf32> -> vector<3x128xf32>
    %178 = arith.addf %176, %177 : vector<3x128xf32>
    %c0_76 = arith.constant 0 : index
    %c0_77 = arith.constant 0 : index
    %179 = vector.load %arg19[%c0_76, %c0_77] : memref<3x128xf32, #tpu.memory_space<vmem>>, vector<3x128xf32>
    tpu.vector_store %arg19[%c0_76, %c0_77], %178 {strides = array<i32>} : memref<3x128xf32, #tpu.memory_space<vmem>>, vector<3x128xf32>,
    %c0_78 = arith.constant 0 : index
    %c0_79 = arith.constant 0 : index
    %180 = vector.load %arg17[%c0_78, %c0_79] : memref<3x1xf32, #tpu.memory_space<vmem>>, vector<3x1xf32>
    tpu.vector_store %arg17[%c0_78, %c0_79], %161 {strides = array<i32>} : memref<3x1xf32, #tpu.memory_space<vmem>>, vector<3x1xf32>,
    %c1_i32 = arith.constant 1 : i32
    %181 = arith.cmpi eq, %arg1, %c1_i32 : i32
    %182 = arith.extui %181 : i1 to i32
    %c0_i32_80 = arith.constant 0 : i32
    %183 = arith.cmpi ne, %182, %c0_i32_80 : i32
    scf.if %183 {
      %c0_81 = arith.constant 0 : index
      %c0_82 = arith.constant 0 : index
      %184 = vector.load %arg17[%c0_81, %c0_82] : memref<3x1xf32, #tpu.memory_space<vmem>>, vector<3x1xf32>
      %c0_83 = arith.constant 0 : index
      %c0_84 = arith.constant 0 : index
      %c0_85 = arith.constant 0 : index
      %185 = vector.load %arg10[%c0_83, %c0_84, %c0_85] : memref<1x3x1xf32, #tpu.memory_space<vmem>>, vector<1x3x1xf32>
      %186 = vector.shape_cast %185 : vector<1x3x1xf32> to vector<3x1xf32>
      %187 = vector.shape_cast %184 : vector<3x1xf32> to vector<1x3x1xf32>
      tpu.vector_store %arg10[%c0_83, %c0_84, %c0_85], %187 {strides = array<i32>} : memref<1x3x1xf32, #tpu.memory_space<vmem>>, vector<1x3x1xf32>,
      %c0_86 = arith.constant 0 : index
      %c0_87 = arith.constant 0 : index
      %188 = vector.load %arg18[%c0_86, %c0_87] : memref<3x1xf32, #tpu.memory_space<vmem>>, vector<3x1xf32>
      %c0_88 = arith.constant 0 : index
      %c0_89 = arith.constant 0 : index
      %c0_90 = arith.constant 0 : index
      %189 = vector.load %arg11[%c0_88, %c0_89, %c0_90] : memref<1x3x1xf32, #tpu.memory_space<vmem>>, vector<1x3x1xf32>
      %190 = vector.shape_cast %189 : vector<1x3x1xf32> to vector<3x1xf32>
      %191 = vector.shape_cast %188 : vector<3x1xf32> to vector<1x3x1xf32>
      tpu.vector_store %arg11[%c0_88, %c0_89, %c0_90], %191 {strides = array<i32>} : memref<1x3x1xf32, #tpu.memory_space<vmem>>, vector<1x3x1xf32>,
      %c0_91 = arith.constant 0 : index
      %c0_92 = arith.constant 0 : index
      %192 = vector.load %arg19[%c0_91, %c0_92] : memref<3x128xf32, #tpu.memory_space<vmem>>, vector<3x128xf32>
      %c0_93 = arith.constant 0 : index
      %c0_94 = arith.constant 0 : index
      %c0_95 = arith.constant 0 : index
      %193 = vector.load %arg12[%c0_93, %c0_94, %c0_95] : memref<1x3x128xf32, #tpu.memory_space<vmem>>, vector<1x3x128xf32>
      %194 = vector.shape_cast %193 : vector<1x3x128xf32> to vector<3x128xf32>
      %195 = vector.shape_cast %192 : vector<3x128xf32> to vector<1x3x128xf32>
      tpu.vector_store %arg12[%c0_93, %c0_94, %c0_95], %195 {strides = array<i32>} : memref<1x3x128xf32, #tpu.memory_space<vmem>>, vector<1x3x128xf32>,
      %c0_96 = arith.constant 0 : index
      %c0_97 = arith.constant 0 : index
      %196 = vector.load %arg20[%c0_96, %c0_97] : memref<1x128xf32, #tpu.memory_space<vmem>>, vector<1x128xf32>
      %c0_98 = arith.constant 0 : index
      %c0_99 = arith.constant 0 : index
      %c0_100 = arith.constant 0 : index
      %197 = vector.load %arg13[%c0_98, %c0_99, %c0_100] : memref<1x1x128xf32, #tpu.memory_space<vmem>>, vector<1x1x128xf32>
      %198 = vector.shape_cast %197 : vector<1x1x128xf32> to vector<1x128xf32>
      %199 = vector.shape_cast %196 : vector<1x128xf32> to vector<1x1x128xf32>
      tpu.vector_store %arg13[%c0_98, %c0_99, %c0_100], %199 {strides = array<i32>} : memref<1x1x128xf32, #tpu.memory_space<vmem>>, vector<1x1x128xf32>,
    } else {
    }
    return
  }
  func.func @transform_0(%arg0: i32, %arg1: i32) -> (i32, i32, i32) {
    %c2_i32 = arith.constant 2 : i32
    %0 = arith.muli %arg0, %c2_i32 : i32
    %1 = arith.addi %0, %arg1 : i32
    %c2_i32_0 = arith.constant 2 : i32
    %2 = arith.minsi %1, %c2_i32_0 : i32
    %c0_i32 = arith.constant 0 : i32
    %c0_i32_1 = arith.constant 0 : i32
    %c0_i32_2 = arith.constant 0 : i32
    return %c0_i32, %2, %c0_i32_1 : i32, i32, i32
  }
  func.func @transform_1(%arg0: i32, %arg1: i32) -> (i32, i32) {
    %c0_i32 = arith.constant 0 : i32
    %c0_i32_0 = arith.constant 0 : i32
    %c0_i32_1 = arith.constant 0 : i32
    return %c0_i32, %c0_i32_0 : i32, i32
  }
  func.func @transform_2(%arg0: i32, %arg1: i32) -> (i32, i32, i32) {
    %c0_i32 = arith.constant 0 : i32
    %c0_i32_0 = arith.constant 0 : i32
    %c0_i32_1 = arith.constant 0 : i32
    %c0_i32_2 = arith.constant 0 : i32
    return %c0_i32, %c0_i32_0, %c0_i32_1 : i32, i32, i32
  }
  func.func @transform_3(%arg0: i32, %arg1: i32) -> (i32, i32) {
    %c0_i32 = arith.constant 0 : i32
    %c0_i32_0 = arith.constant 0 : i32
    %c0_i32_1 = arith.constant 0 : i32
    return %c0_i32, %c0_i32_0 : i32, i32
  }
  func.func @transform_4(%arg0: i32, %arg1: i32) -> (i32, i32) {
    %c0_i32 = arith.constant 0 : i32
    %c0_i32_0 = arith.constant 0 : i32
    %c0_i32_1 = arith.constant 0 : i32
    return %c0_i32, %c0_i32_0 : i32, i32
  }
  func.func @transform_5(%arg0: i32, %arg1: i32) -> (i32, i32) {
    %c0_i32 = arith.constant 0 : i32
    %c0_i32_0 = arith.constant 0 : i32
    %c0_i32_1 = arith.constant 0 : i32
    return %c0_i32, %c0_i32_0 : i32, i32
  }
  func.func @transform_6(%arg0: i32, %arg1: i32) -> (i32, i32) {
    %c0_i32 = arith.constant 0 : i32
    %c0_i32_0 = arith.constant 0 : i32
    %c0_i32_1 = arith.constant 0 : i32
    return %c0_i32, %c0_i32_0 : i32, i32
  }
  func.func @transform_7(%arg0: i32, %arg1: i32) -> (i32, i32) {
    %c0_i32 = arith.constant 0 : i32
    %c0_i32_0 = arith.constant 0 : i32
    %c0_i32_1 = arith.constant 0 : i32
    return %c0_i32, %c0_i32_0 : i32, i32
  }
  func.func @transform_8(%arg0: i32, %arg1: i32) -> (i32, i32, i32) {
    %c0_i32 = arith.constant 0 : i32
    %c0_i32_0 = arith.constant 0 : i32
    %c0_i32_1 = arith.constant 0 : i32
    return %arg0, %c0_i32, %c0_i32_0 : i32, i32, i32
  }
  func.func @transform_9(%arg0: i32, %arg1: i32) -> (i32, i32, i32) {
    %c0_i32 = arith.constant 0 : i32
    %c0_i32_0 = arith.constant 0 : i32
    %c0_i32_1 = arith.constant 0 : i32
    return %arg0, %c0_i32, %c0_i32_0 : i32, i32, i32
  }
  func.func @transform_10(%arg0: i32, %arg1: i32) -> (i32, i32, i32) {
    %c0_i32 = arith.constant 0 : i32
    %c0_i32_0 = arith.constant 0 : i32
    %c0_i32_1 = arith.constant 0 : i32
    return %arg0, %c0_i32, %c0_i32_0 : i32, i32, i32
  }
  func.func @transform_11(%arg0: i32, %arg1: i32) -> (i32, i32, i32) {
    %c0_i32 = arith.constant 0 : i32
    %c0_i32_0 = arith.constant 0 : i32
    %c0_i32_1 = arith.constant 0 : i32
    return %arg0, %c0_i32, %c0_i32_0 : i32, i32, i32
  }
}

</mosaic_0001>

<bundles_post_ra>
// kernel: tpu_custom_call.1
= control target key start
LH: loop header
LB: loop body
LE: loop exit
PB: predicated region body
PF: predicated region fallthrough
CT: control target
= control target key end

     0   :  { %s8855_s0 = inlined_call_operand.hbm [shape: f32[1,40,1024], index: 0, kind: input, shape index: {}]   ;;  %s8856_s1 = inlined_call_operand.hbm [shape: bf16[1024,256], index: 1, kind: input, shape index: {}]   ;;  %s8857_s2 = inlined_call_operand.vmem [shape: f32[1,3,2048], index: 2, kind: input, shape index: {}]   ;;  %s8858_s3 = inlined_call_operand.hbm [shape: bf16[2048,256], index: 3, kind: input, shape index: {}]   ;;  %s8859_s4 = inlined_call_operand.hbm [shape: bf16[256,384], index: 4, kind: input, shape index: {}]   ;;  %s8860_s5 = inlined_call_operand.hbm [shape: bf16[128,512], index: 5, kind: input, shape index: {}]   ;;  %s8861_s6 = inlined_call_operand.hbm [shape: bf16[512,128], index: 6, kind: input, shape index: {}]   ;;  %s8862_s7 = inlined_call_operand.vmem [shape: f32[1,2176], index: 7, kind: input, shape index: {}]   ;;  %s8863_s8 = inlined_call_operand.vmem [shape: f32[2,3,1], index: 8, kind: output, shape index: {0}]   ;;  %s8864_s9 = inlined_call_operand.vmem [shape: f32[2,3,1], index: 9, kind: output, shape index: {1}]   ;;  %s8865_s10 = inlined_call_operand.vmem [shape: f32[2,3,128], index: 10, kind: output, shape index: {2}]   ;;  %s8866_s11 = inlined_call_operand.hbm [shape: f32[2,1,128], index: 11, kind: output, shape index: {3}]  }
   0x1   :  { %8892 = sst [smem:[#allocation39_spill]] %s8856_s1 }
   0x2   :  { %8893 = sst [smem:[#allocation40_spill]] %s8857_s2 }
   0x3   :  { %8894 = sst [smem:[#allocation41_spill]] %s8862_s7 }
   0x4   :  { %8895 = sst [smem:[#allocation42_spill]] %s8863_s8 }
   0x5   :  { %8896 = sst [smem:[#allocation43_spill]] %s8864_s9 }
   0x6   :  { %8897 = sst [smem:[#allocation44_spill]] %s8865_s10 }
   0x7   :  { %8898 = sst [smem:[#allocation45_spill]] %s8866_s11 }
   0x8   :  { %17 = vsyncpa [#allocation10], 0 }
   0x9   :  { %19 = vsyncpa [#allocation10 + $0x1], 0 }
   0xa   :  { %20 = vsyncpa [#allocation13], 0 }
   0xb   :  { %21 = vsyncpa [#allocation16], 0 }
   0xc   :  { %22 = vsyncpa [#allocation19], 0 }
   0xd   :  { %23 = vsyncpa [#allocation11], 0 }
   0xe   :  { %25 = vsyncpa [#allocation11 + $0x1], 0  ;;  %s8185_s17 = smov 0   ;;  %s8187_s18 = smov 0  }
   0xf   :  { %s8189_s19 = smov 0   ;;  %s8191_s20 = smov 0  }
  0x10   :  { %s8193_s21 = smov 0   ;;  %s8195_s22 = smov 0  }
  0x11   :  { %s8197_s23 = smov 0   ;;  %s8199_s24 = smov 0  }
  0x12   :  { %s8201_s25 = smov 0   ;;  %s8203_s26 = smov 0  }
  0x13   :  { %s8205_s27 = smov 0  }
  0x14 LB: > { %8899 = sst [smem:[#allocation26_spill]] %s8060_s17  ;;  %s8872_s28 = sadd.s32 4294967295, %s8100_s27   ;;  %s8100_s27 = sphi %s8205_s27, %s31_s27   ;;  %s8096_s26 = sphi %s8203_s26, %s8962_s26   ;;  %s8092_s25 = sphi %s8201_s25, %s8961_s25   ;;  %s8088_s24 = sphi %s8199_s24, %s8960_s24   ;;  %s8084_s23 = sphi %s8197_s23, %s8966_s23   ;;  %s8080_s22 = sphi %s8195_s22, %s8965_s22   ;;  %s8076_s21 = sphi %s8193_s21, %s8964_s21   ;;  %s8072_s20 = sphi %s8191_s20, %s8963_s20   ;;  %s8068_s19 = sphi %s8189_s19, %s8957_s19   ;;  %s8064_s18 = sphi %s8187_s18, %s8956_s18   ;;  %s8060_s17 = sphi %s8185_s17, %s8955_s17  }
  0x15   : > { %8900 = sst [smem:[#allocation27_spill]] %s8064_s18  ;;  %s40_s30 = sadd.s32 1, %s8092_s25 }
  0x16   : > { %8901 = sst [smem:[#allocation28_spill]] %s8068_s19  ;;  %s43_s12 = sadd.s32 1, %s8096_s26 }
  0x17   : > { %8902 = sst [smem:[#allocation29_spill]] %s8084_s23  ;;  %p41_p0 = scmp.ge.s32.totalorder %s40_s30, 2 }
  0x18   : > { %8903 = sst [smem:[#allocation30_spill]] %s8088_s24  ;;  %s6012_s13 = sshll.u32 %s8096_s26, 1 }
  0x19   : > { %8904 = sst [smem:[#allocation31_spill]] %s8092_s25  ;;  %s48_s14 = sadd.s32 %s8092_s25, %s6012_s13 }
  0x1a   : > { %8905 = sst [smem:[#allocation32_spill]] %s8096_s26  ;;  %s58_s15 = sadd.s32 1, %s8080_s22 }
  0x1b   : > { %s8968_s30 = smov (%p41_p0, %s40_s30), 0  ;;  %s8970_s12 = smov (!%p41_p0, %s43_s12), %s8096_s26 }
  0x1c   : > { %8906 = sst [smem:[#allocation33_spill]] %s8968_s30  ;;  %p49_p1 = scmp.lt.s32.totalorder %s48_s14, 2 }
  0x1d   : > { %p65_p2 = scmp.ne.s32.totalorder %s8080_s22, %s8076_s21  ;;  %p45_p3 = scmp.ge.s32.totalorder %s8970_s12, 2 }
  0x1e   : > { %p66_p4 = scmp.eq.s32.totalorder %s8100_s27, 0  ;;  %s8972_s14 = smov (!%p49_p1, %s48_s14), 2 }
  0x1f   : > { %s8974_s12 = smov (%p45_p3, %s8970_s12), 0  ;;  %p71_p6 = scmp.ne.s32.totalorder %s8076_s21, %s8072_s20 }
  0x20   : > { %8907 = sst [smem:[#allocation34_spill]] %s8974_s12  ;;  %p8257_p5 = por %p66_p4, %p65_p2 }
  0x21   : > { %s6013_s13 = sshll.u32 %s8974_s12, 1  ;;  %p8266_p7 = scmp.eq.s32.totalorder %s8872_s28, 0 }
  0x22   : > { %s8908_s16 = scalar_select %p8257_p5, 1, 0 }
  0x23   : > { %s8909_s29 = scalar_select %p8266_p7, 1, 0 }
  0x24   : > { %s52_s25 = sadd.s32 %s6013_s13, %s8968_s30  ;;  %s306_s11 = ssub.s32 %s8096_s26, %s8974_s12 }
  0x25   : > { %p53_p8 = scmp.lt.s32.totalorder %s52_s25, 2  ;;  %p8275_p9 = por %p8266_p7, %p71_p6 }
  0x26   : > { %p307_p10 = scmp.eq.s32.totalorder %s306_s11, 0  ;;  %s309_s20 = sadd.s32 1, %s8068_s19 }
  0x27   : > { %s8910_s7 = scalar_select %p8275_p9, 1, 0 }
  0x28   : > { %s8976_s25 = smov (!%p53_p8, %s52_s25), 2  ;;  %p319_p11 = scmp.ne.s32.totalorder %s8068_s19, %s8064_s18 }
  0x29   : > { %s8281_s2 = scalar_select %p307_p10, %s8068_s19, %s309_s20  }
  0x2a   : > { %s55_s28 = ssub.s32 %s8972_s14, %s8976_s25  ;;  %s8912_s23 = sadd.s32 4294967295, %s8100_s27  }
  0x2b   : > { %8911 = sst [smem:[#allocation35_spill]] %s8281_s2  ;;  %p56_p12 = scmp.eq.s32.totalorder %s55_s28, 0 }
  0x2c   : > { %p320_p13 = scmp.eq.s32.totalorder %s8912_s23, 3  ;;  %p325_p0 = scmp.ne.s32.totalorder %s8064_s18, %s8060_s17 }
  0x2d   : > { %s8913_s13 = sadd.s32 4294967294, %s8100_s27   ;;  %p6014_p4 = scmp.ge.s32.totalorder %s8100_s27, 1 }
  0x2e   : > { %p326_p1 = scmp.eq.s32.totalorder %s8913_s13, 3  ;;  %p8295_p2 = por %p320_p13, %p319_p11 }
  0x2f   : > { %s8293_s12 = scalar_select %p56_p12, %s8080_s22, %s58_s15  }
  0x30   : > { %s8915_s30 = scalar_select %p8295_p2, 1, 0 }
  0x31   : > { %8914 = sst [smem:[#allocation36_spill]] %s8293_s12  ;;  %p8299_p3 = por %p326_p1, %p325_p0 }
  0x32   : > { %8916 = sst [smem:[#allocation37_spill]] %s8915_s30  ;;  %p333_p6 = scmp.lt.s32.totalorder %s8100_s27, 5 }
  0x33   : > { %s8917_s11 = scalar_select %p8299_p3, 1, 0 }
  0x34   : > { %p8305_p8 = pnand %p6014_p4, %p333_p6  ;;  %s8102_s23 = smov [#allocation12]  }
  0x35   : > { %8918 = sst [smem:[#allocation38_spill]] %s8917_s11  ;;  %s345_s28 = sshll.u32 %s8102_s23, 4  ;;  %s346_s28 = int_to_ptr.vmem [resolvable:$true] %s345_s28 }
  0x36   : > { %s8919_s25 = scalar_select %p8305_p8, 1, 0 }
  0x37   : > { %p6820_p10 = pneg %p8305_p8  ;;  %s8103_s20 = smov [#allocation15]  }
  0x38   : > { %s374_s13 = sshll.u32 %s8103_s20, 4  ;;  %s8921_s1 = sld [smem:[#allocation39_spill]]  ;;  %s8317_s13 = int_to_ptr.vmem [resolvable:$true] %s374_s13 }
  0x39   : > { %p8313_p11 = pnand %p6820_p10, %p8266_p7 }
  0x3b   : > { %p8327_p13 = pneg %p8313_p11 }
  0x3e   : > { %s7798_s2 = scalar_lea.hbm %s8921_s1, 16384 }
  0x3f   : > { %p7799_p12 = scmp.ne.s32.totalorder %s8921_s1, %s7798_s2  ;;  %p7805_p4 = scmp.lt.u32.totalorder %s7798_s2, %s8921_s1 }
  0x41   : > { %p7801_p0 = pnand %p8327_p13, %p7799_p12 }
  0x43   : > { %p7802_p1 = pneg %p7801_p0 }
  0x45   : > { %p7807_p6 = pnand %p7805_p4, %p7802_p1 }
  0x47   : > { %7810 = shalt.err (!%p7807_p6)
}
  0x48   : > { %s7811_s26 = scalar_lea.vmem %s346_s28, 16384  ;;  %p7819_p7 = scmp.lt.s32.totalorder %s346_s28, %s346_s28 }
  0x49   : > { %p7812_p10 = scmp.ne.s32.totalorder %s346_s28, %s7811_s26  ;;  %p7820_p9 = scmp.lt.s32.totalorder %s7811_s26, %s7811_s26 }
  0x4b   : > { %p7814_p3 = pnand %p7812_p10, %p8327_p13  ;;  %p7821_p8 = por %p7820_p9, %p7819_p7 }
  0x4d   : > { %p7815_p2 = pneg %p7814_p3 }
  0x4f   : > { %p7822_p5 = pnand %p7821_p8, %p7815_p2 }
  0x51   : > { %7825 = shalt.err (!%p7822_p5)
}
  0x52   : > { %s8887_s19 = smov 128   ;;  %s8888_s12 = smov 8  }
  0x53   : > { %6823 = dma.hbm_to_vmem [thread:$0]  (!%p8313_p11), %s8921_s1, 16384, %s346_s28, [#allocation13], %s8887_s19, %s8887_s19, %s8888_s12  }
  0x54   : > { %s7826_s30 = scalar_lea.hbm %s8859_s4, 6144 }
  0x55   : > { %p7827_p5 = scmp.ne.s32.totalorder %s8859_s4, %s7826_s30  ;;  %p7833_p2 = scmp.lt.u32.totalorder %s7826_s30, %s8859_s4 }
  0x57   : > { %p7829_p7 = pnand %p7827_p5, %p8327_p13 }
  0x59   : > { %p7830_p9 = pneg %p7829_p7 }
  0x5b   : > { %p7835_p3 = pnand %p7833_p2, %p7830_p9 }
  0x5d   : > { %7838 = shalt.err (!%p7835_p3)
}
  0x5e   : > { %s7839_s28 = scalar_lea.vmem %s8317_s13, 6144  ;;  %p7847_p1 = scmp.lt.s32.totalorder %s8317_s13, %s8317_s13 }
  0x5f   : > { %p7840_p8 = scmp.ne.s32.totalorder %s8317_s13, %s7839_s28  ;;  %p7848_p4 = scmp.lt.s32.totalorder %s7839_s28, %s7839_s28 }
  0x61   : > { %p7842_p12 = pnand %p7840_p8, %p8327_p13  ;;  %p7849_p6 = por %p7848_p4, %p7847_p1 }
  0x63   : > { %p7843_p0 = pneg %p7842_p12 }
  0x65   : > { %p7850_p10 = pnand %p7849_p6, %p7843_p0 }
  0x67   : > { %7853 = shalt.err (!%p7850_p10)
}
  0x68   : > { %s8106_s10 = smov 192   ;;  %s8107_s8 = smov 12  }
  0x69   : > { %6829 = dma.hbm_to_vmem [thread:$0]  (!%p8313_p11), %s8859_s4, 6144, %s8317_s13, [#allocation16], %s8106_s10, %s8106_s10, %s8107_s8  }
  0x6a   : > { %s8108_s2 = smov [#allocation14]   ;;  %s8109_s11 = smov [#allocation17]  }
  0x6b   : > { %s361_s17 = sshll.u32 %s8108_s2, 4  ;;  %s387_s20 = sshll.u32 %s8109_s11, 4  ;;  %s362_s17 = int_to_ptr.vmem [resolvable:$true] %s361_s17  ;;  %s388_s20 = int_to_ptr.vmem [resolvable:$true] %s387_s20 }
  0x6c   : > { %s7854_s19 = scalar_lea.hbm %s8858_s3, 32768 }
  0x6d   : > { %p7855_p5 = scmp.ne.s32.totalorder %s8858_s3, %s7854_s19  ;;  %p7861_p2 = scmp.lt.u32.totalorder %s7854_s19, %s8858_s3 }
  0x6f   : > { %p7857_p7 = pnand %p7855_p5, %p8327_p13 }
  0x71   : > { %p7858_p9 = pneg %p7857_p7 }
  0x73   : > { %p7863_p3 = pnand %p7861_p2, %p7858_p9 }
  0x75   : > { %7866 = shalt.err (!%p7863_p3)
}
  0x76   : > { %s7867_s13 = scalar_lea.vmem %s362_s17, 32768  ;;  %p7875_p1 = scmp.lt.s32.totalorder %s362_s17, %s362_s17 }
  0x77   : > { %p7868_p8 = scmp.ne.s32.totalorder %s362_s17, %s7867_s13  ;;  %p7876_p4 = scmp.lt.s32.totalorder %s7867_s13, %s7867_s13 }
  0x79   : > { %p7870_p12 = pnand %p7868_p8, %p8327_p13  ;;  %p7877_p6 = por %p7876_p4, %p7875_p1 }
  0x7b   : > { %p7871_p0 = pneg %p7870_p12 }
  0x7d   : > { %p7878_p10 = pnand %p7877_p6, %p7871_p0 }
  0x7f   : > { %7881 = shalt.err (!%p7878_p10)
}
  0x80   : > { %s8923_s1 = smov 8   ;;  %s8924_s12 = smov 128  }
  0x81   : > { %6826 = dma.hbm_to_vmem [thread:$0]  (!%p8313_p11), %s8858_s3, 32768, %s362_s17, [#allocation13], %s8924_s12, %s8924_s12, %s8923_s1  }
  0x82   : > { %s7882_s8 = scalar_lea.hbm %s8860_s5, 4096 }
  0x83   : > { %p7883_p5 = scmp.ne.s32.totalorder %s8860_s5, %s7882_s8  ;;  %p7889_p2 = scmp.lt.u32.totalorder %s7882_s8, %s8860_s5 }
  0x85   : > { %p7885_p7 = pnand %p7883_p5, %p8327_p13 }
  0x87   : > { %p7886_p9 = pneg %p7885_p7 }
  0x89   : > { %p7891_p3 = pnand %p7889_p2, %p7886_p9 }
  0x8b   : > { %7894 = shalt.err (!%p7891_p3)
}
  0x8c   : > { %s7895_s26 = scalar_lea.vmem %s388_s20, 4096  ;;  %p7903_p1 = scmp.lt.s32.totalorder %s388_s20, %s388_s20 }
  0x8d   : > { %p7896_p8 = scmp.ne.s32.totalorder %s388_s20, %s7895_s26  ;;  %p7904_p4 = scmp.lt.s32.totalorder %s7895_s26, %s7895_s26 }
  0x8f   : > { %p7898_p12 = pnand %p7896_p8, %p8327_p13  ;;  %p7905_p6 = por %p7904_p4, %p7903_p1 }
  0x91   : > { %p7899_p0 = pneg %p7898_p12 }
  0x93   : > { %p7906_p10 = pnand %p7905_p6, %p7899_p0 }
  0x95   : > { %7909 = shalt.err (!%p7906_p10)
}
  0x96   : > { %s8110_s17 = smov 256   ;;  %s8111_s28 = smov 16  }
  0x97   : > { %6832 = dma.hbm_to_vmem [thread:$0]  (!%p8313_p11), %s8860_s5, 4096, %s388_s20, [#allocation16], %s8110_s17, %s8110_s17, %s8111_s28  }
  0x98   : > { %s8112_s12 = smov [#allocation18]   ;;  %s7910_s10 = scalar_lea.hbm %s8861_s6, 4096 }
  0x99   : > { %s400_s18 = sshll.u32 %s8112_s12, 4  ;;  %p7911_p5 = scmp.ne.s32.totalorder %s8861_s6, %s7910_s10  ;;  %s401_s18 = int_to_ptr.vmem [resolvable:$true] %s400_s18 }
  0x9a   : > { %p7917_p2 = scmp.lt.u32.totalorder %s7910_s10, %s8861_s6 }
  0x9b   : > { %p7913_p7 = pnand %p7911_p5, %p8327_p13 }
  0x9d   : > { %p7914_p9 = pneg %p7913_p7 }
  0x9f   : > { %p7919_p3 = pnand %p7917_p2, %p7914_p9 }
  0xa1   : > { %7922 = shalt.err (!%p7919_p3)
}
  0xa2   : > { %s7923_s20 = scalar_lea.vmem %s401_s18, 4096  ;;  %p7931_p1 = scmp.lt.s32.totalorder %s401_s18, %s401_s18 }
  0xa3   : > { %p7924_p8 = scmp.ne.s32.totalorder %s401_s18, %s7923_s20  ;;  %p7932_p4 = scmp.lt.s32.totalorder %s7923_s20, %s7923_s20 }
  0xa5   : > { %p7926_p12 = pnand %p7924_p8, %p8327_p13  ;;  %p7933_p6 = por %p7932_p4, %p7931_p1 }
  0xa7   : > { %p7927_p0 = pneg %p7926_p12 }
  0xa9   : > { %p7934_p10 = pnand %p7933_p6, %p7927_p0 }
  0xab   : > { %7937 = shalt.err (!%p7934_p10)
}
  0xac   : > { %s8113_s11 = smov 64   ;;  %s8114_s26 = smov 4  }
  0xad   : > { %6835 = dma.hbm_to_vmem [thread:$0]  (!%p8313_p11), %s8861_s6, 4096, %s401_s18, [#allocation19], %s8113_s11, %s8113_s11, %s8114_s26  }
  0xae   : > { %p6020_p5 = scmp.ge.s32.totalorder %s8100_s27, 4 }
  0xaf   : > { %p8925_p7 = scmp.ne.s32.totalorder (!%p6020_p5), %s8908_s16, 0 }
  0xb0   : > { %413 = sbr.rel (%p6020_p5) target bundleno = 218 (0xda), region = 44 }
  0xb7   : > { %416 = sbr.rel (!%p8925_p7) target bundleno = 218 (0xda), region = 48  ;;  %s417_s23 = sand.u32 (%p8925_p7), 1, %s8080_s22  }
  0xb8   : > { %s6023_s13 = sshll.u32 (%p8925_p7), %s8972_s14, 1  ;;  %s6021_s1 = sshll.u32 (%p8925_p7), %s417_s23, 7 }
  0xb9   : > { %s427_s12 = ssub.s32 (%p8925_p7), 5, %s6023_s13  ;;  %s8434_s19 = scalar_lea.sflag (%p8925_p7), [#allocation10], %s417_s23 }
  0xba   : > { %p428_p13 = scmp.lt.s32.totalorder (%p8925_p7), %s427_s12, 2  ;;  %s421_s18 = scalar_lea.vmem (%p8925_p7), [#allocation9], %s6021_s1 }
  0xbe   : > { %s8978_s12 = smov (!%p428_p13, %s427_s12), 2 }
  0xbf   : > { %s8431_s24 = sshll.u32 %s8978_s12, 10 }
  0xc0   : > { %s433_s15 = ssub.s32 2048, %s8431_s24 }
  0xc1   : > { %434 = vsyncadd %s8434_s19, %s433_s15  ;;  %p6026_p11 = scmp.ne.s32.totalorder %s8431_s24, 0  ;;  %s6607_s16 = sshll.u32 %s8972_s14, 11 }
  0xc2   : > { %s8442_s9 = scalar_lea.hbm %s8855_s0, %s6607_s16  ;;  %s440_s30 = sshll.u32 %s421_s18, 4  ;;  %s8444_s30 = int_to_ptr.vmem [resolvable:$true] %s440_s30 }
  0xc3   : > { %s7938_s2 = scalar_lea.hbm %s8442_s9, %s8431_s24  ;;  %s7942_s14 = scalar_lea.hbm %s8855_s0, 5120 }
  0xc4   : > { %p7939_p9 = scmp.ne.s32.totalorder %s8442_s9, %s7938_s2  ;;  %p7943_p8 = scmp.lt.u32.totalorder %s8442_s9, %s8855_s0 }
  0xc5   : > { %p7944_p12 = scmp.lt.u32.totalorder %s7942_s14, %s7938_s2  ;;  %p7946_p1 = scmp.lt.u32.totalorder %s7938_s2, %s8442_s9 }
  0xc6   : > { %p7940_p2 = pnand %p7939_p9, %p6026_p11 }
  0xc7   : > { %p7945_p0 = por %p7944_p12, %p7943_p8 }
  0xc8   : > { %p7941_p3 = pneg %p7940_p2 }
  0xc9   : > { %p7947_p4 = por %p7946_p1, %p7945_p0 }
  0xcb   : > { %p7948_p6 = pnand %p7947_p4, %p7941_p3 }
  0xcd   : > { %7951 = shalt.err (!%p7948_p6)
}
  0xce   : > { %s7952_s28 = scalar_lea.vmem %s8444_s30, %s8431_s24  ;;  %s8115_s23 = smov [#allocation9]  }
  0xcf   : > { %p7953_p10 = scmp.ne.s32.totalorder %s8444_s30, %s7952_s28  ;;  %s7956_s13 = sshll.u32 %s8115_s23, 4  ;;  %s7957_s13 = int_to_ptr.vmem [resolvable:$false] %s7956_s13 }
  0xd0   : > { %s7958_s1 = scalar_lea.vmem %s7957_s13, 4096  ;;  %p7959_p13 = scmp.lt.s32.totalorder %s8444_s30, %s7957_s13 }
  0xd1   : > { %p7954_p5 = pnand %p7953_p10, %p6026_p11  ;;  %p7960_p9 = scmp.lt.s32.totalorder %s7958_s1, %s7952_s28 }
  0xd3   : > { %p7955_p7 = pneg %p7954_p5  ;;  %p7961_p2 = por %p7960_p9, %p7959_p13 }
  0xd5   : > { %p7962_p8 = pnand %p7961_p2, %p7955_p7 }
  0xd7   : > { %7965 = shalt.err (!%p7962_p8)
}
  0xd8   : > { %s8116_s12 = smov 1024   ;;  %s8117_s15 = smov 64  }
  0xd9   : > { %446 = dma.hbm_to_vmem [thread:$0]  (%p6026_p11), %s8442_s9, %s8431_s24, %s8444_s30, %s8434_s19, %s8116_s12, %s8116_s12, %s8117_s15  }
  0xda PF: > { %p8926_p3 = scmp.ne.s32.totalorder %s8919_s25, 0 }
  0xdb   : > { %s454_s18 = sand.u32 (!%p8926_p3), 1, %s8076_s21   ;;  %p8927_p12 = scmp.ne.s32.totalorder (!%p8926_p3), %s8910_s7, 0 }
  0xdc   : > { %452 = sbr.rel (%p8926_p3) target bundleno = 4571 (0x11db), region = 52  ;;  %s6032_s16 = sshll.u32 (!%p8926_p3), %s454_s18, 7 }
  0xdd   : > { %s455_s10 = scalar_lea.sflag (!%p8926_p3), [#allocation10], %s454_s18  ;;  %s8474_s8 = scalar_lea.vmem (!%p8926_p3), [#allocation9], %s6032_s16 }
  0xe3   : > { %8039 = dma.done.wait (%p8927_p12), %s455_s10, 2048  }
  0xe4   : > { %8041 = vsyncadd (%p8927_p12), %s455_s10, 4294965248  ;;  %p8928_p0 = scmp.ne.s32.totalorder %s8909_s29, 0 }
  0xe6   : > { %8043 = dma.done.wait (%p8928_p0), [#allocation13], 49152  }
  0xe7   : > { %8045 = vsyncadd (%p8928_p0), [#allocation13], 4294918144 }
  0xe8   : > { %8047 = dma.done.wait (%p8928_p0), [#allocation16], 10240  }
  0xe9   : > { %8049 = vsyncadd (%p8928_p0), [#allocation16], 4294957056 }
  0xea   : > { %8051 = dma.done.wait (%p8928_p0), [#allocation19], 4096  }
  0xeb   : > { %8053 = vsyncadd (%p8928_p0), [#allocation19], 4294963200  ;;  %s8929_s7 = sld [smem:[#allocation27_spill]]  ;;  %s8930_s25 = sld [smem:[#allocation30_spill]] }
  0xec   : > { %s8931_s2 = sld [smem:[#allocation42_spill]]  ;;  %s8932_s29 = sld [smem:[#allocation43_spill]] }
  0xed   : > { %s8933_s23 = sld [smem:[#allocation44_spill]]  ;;  %s8934_s12 = sld [smem:[#allocation29_spill]] }
  0xf1   : > { %s526_s24 = sand.u32 1, %s8929_s7   ;;  %p538_p11 = scmp.lt.s32.totalorder %s8930_s25, 1 }
  0xf2   : > { %s8511_s1 = scalar_lea.vmem [#allocation20], %s526_s24 }
  0xf3   : > { %s8980_s25 = smov (!%p538_p11, %s8930_s25), 1  ;;  %p6041_p1 = scmp.ne.s32.totalorder %s8934_s12, 0 }
  0xf4   : > { %s8495_s19 = sshll.u32 %s8980_s25, 2  ;;  %v6960_v0 = vld [vmem:[#allocation14 + $0x4] ss:$8 sps:$4 sm:$0xff] (!%p6041_p1)   ;;  %v6964_v2 = vld [vmem:[#allocation14] ss:$8 sps:$4 sm:$0xff] (!%p6041_p1)   ;;  %s8935_s16 = sld [smem:[#allocation40_spill]] (!%p6041_p1) }
  0xf5   : > { %s541_s20 = scalar_lea.vmem %s8931_s2, %s8495_s19  ;;  %s545_s26 = scalar_lea.vmem %s8932_s29, %s8495_s19  ;;  %v6962_v1 = vld [vmem:[#allocation14 + $0x304] ss:$8 sps:$4 sm:$0xff] (!%p6041_p1)   ;;  %2151 = vmatprep.subr.bf16.mxu1 (!%p6041_p1), %v6960_v0  ;;  %v6965_v3 = vld [vmem:[#allocation14 + $0x300] ss:$8 sps:$4 sm:$0xff] (!%p6041_p1)   ;;  %v6966_v4 = vld [vmem:[#allocation14 + $0x14] ss:$8 sps:$4 sm:$0xff] (!%p6041_p1)  }
  0xf6   : > { %s549_s13 = scalar_lea.vmem %s8933_s23, %s8495_s19  ;;  %554 = sbr.rel (%p6041_p1) target bundleno = 1756 (0x6dc), region = 80  ;;  %2274 = vmatprep.subr.bf16.mxu0 (!%p6041_p1), %v6962_v1  ;;  %2152 = vmatpush1.bf16.msra.mxu1 (!%p6041_p1), %v6964_v2  ;;  %v6968_v5 = vld [vmem:[#allocation14 + $0x314] ss:$8 sps:$4 sm:$0xff] (!%p6041_p1)   ;;  %v6970_v6 = vld [vmem:[#allocation14 + $0x10] ss:$8 sps:$4 sm:$0xff] (!%p6041_p1)   ;;  %vm2481_vm0 = vcmask (!%p6041_p1), 1042432  }
  0xf7   : > { %2275 = vmatpush1.bf16.msra.mxu0 (!%p6041_p1), %v6965_v3  ;;  %2153 = vmatprep.subr.bf16.mxu1 (!%p6041_p1), %v6966_v4  ;;  %v6971_v7 = vld [vmem:[#allocation14 + $0x310] ss:$8 sps:$4 sm:$0xff] (!%p6041_p1)   ;;  %v6972_v8 = vld [vmem:[#allocation14 + $0x24] ss:$8 sps:$4 sm:$0xff] (!%p6041_p1)   ;;  %v6976_v10 = vld [vmem:[#allocation14 + $0x20] ss:$8 sps:$4 sm:$0xff] (!%p6041_p1)  }
  0xf8   : > { %2276 = vmatprep.subr.bf16.mxu0 (!%p6041_p1), %v6968_v5  ;;  %v6974_v9 = vld [vmem:[#allocation14 + $0x324] ss:$8 sps:$4 sm:$0xff] (!%p6041_p1)   ;;  %v6977_v11 = vld [vmem:[#allocation14 + $0x320] ss:$8 sps:$4 sm:$0xff] (!%p6041_p1)   ;;  %v6978_v12 = vld [vmem:[#allocation14 + $0x34] ss:$8 sps:$4 sm:$0xff] (!%p6041_p1)  }
  0xf9   : > { %v6980_v13 = vld [vmem:[#allocation14 + $0x334] ss:$8 sps:$4 sm:$0xff] (!%p6041_p1)   ;;  %v6982_v14 = vld [vmem:[#allocation14 + $0x30] ss:$8 sps:$4 sm:$0xff] (!%p6041_p1)   ;;  %v6984_v16 = vld [vmem:[#allocation14 + $0x44] ss:$8 sps:$4 sm:$0xff] (!%p6041_p1)  }
  0xfa   : > { %2154 = vmatpush1.bf16.msra.mxu1 (!%p6041_p1), %v6970_v6  ;;  %v6983_v15 = vld [vmem:[#allocation14 + $0x330] ss:$8 sps:$4 sm:$0xff] (!%p6041_p1)   ;;  %v6986_v17 = vld [vmem:[#allocation14 + $0x344] ss:$8 sps:$4 sm:$0xff] (!%p6041_p1)   ;;  %v6988_v18 = vld [vmem:[#allocation14 + $0x40] ss:$8 sps:$4 sm:$0xff] (!%p6041_p1)  }
  0xfb   : > { %2277 = vmatpush1.bf16.msra.mxu0 (!%p6041_p1), %v6971_v7  ;;  %2155 = vmatprep.subr.bf16.mxu1 (!%p6041_p1), %v6972_v8  ;;  %v6989_v19 = vld [vmem:[#allocation14 + $0x340] ss:$8 sps:$4 sm:$0xff] (!%p6041_p1)   ;;  %v6990_v20 = vld [vmem:[#allocation14 + $0x54] ss:$8 sps:$4 sm:$0xff] (!%p6041_p1)   ;;  %v6994_v22 = vld [vmem:[#allocation14 + $0x50] ss:$8 sps:$4 sm:$0xff] (!%p6041_p1)  }
  0xfc   : > { %2278 = vmatprep.subr.bf16.mxu0 (!%p6041_p1), %v6974_v9  ;;  %v6992_v21 = vld [vmem:[#allocation14 + $0x354] ss:$8 sps:$4 sm:$0xff] (!%p6041_p1)   ;;  %v6995_v23 = vld [vmem:[#allocation14 + $0x350] ss:$8 sps:$4 sm:$0xff] (!%p6041_p1)   ;;  %v6996_v24 = vld [vmem:[#allocation14 + $0x64] ss:$8 sps:$4 sm:$0xff] (!%p6041_p1)  }
  0xfd   : > { %v6998_v25 = vld [vmem:[#allocation14 + $0x364] ss:$8 sps:$4 sm:$0xff]   ;;  %v7000_v26 = vld [vmem:[#allocation14 + $0x60] ss:$8 sps:$4 sm:$0xff]   ;;  %v7002_v28 = vld [vmem:[#allocation14 + $0x74] ss:$8 sps:$4 sm:$0xff]  }
  0xfe   : > { %2156 = vmatpush1.bf16.msra.mxu1 %v6976_v10  ;;  %v7001_v27 = vld [vmem:[#allocation14 + $0x360] ss:$8 sps:$4 sm:$0xff]   ;;  %v7004_v29 = vld [vmem:[#allocation14 + $0x374] ss:$8 sps:$4 sm:$0xff]   ;;  %v7006_v30 = vld [vmem:[#allocation14 + $0x70] ss:$8 sps:$4 sm:$0xff]  }
  0xff   : > { %2279 = vmatpush1.bf16.msra.mxu0 %v6977_v11  ;;  %2157 = vmatprep.subr.bf16.mxu1 %v6978_v12  ;;  %v7007_v31 = vld [vmem:[#allocation14 + $0x370] ss:$8 sps:$4 sm:$0xff]   ;;  %v7008_v32 = vld [vmem:[#allocation14 + $0x84] ss:$8 sps:$4 sm:$0xff]   ;;  %v7012_v34 = vld [vmem:[#allocation14 + $0x80] ss:$8 sps:$4 sm:$0xff]  }
 0x100   : > { %2280 = vmatprep.subr.bf16.mxu0 %v6980_v13  ;;  %v7010_v33 = vld [vmem:[#allocation14 + $0x384] ss:$8 sps:$4 sm:$0xff]   ;;  %v7013_v35 = vld [vmem:[#allocation14 + $0x380] ss:$8 sps:$4 sm:$0xff]   ;;  %v7014_v36 = vld [vmem:[#allocation14 + $0x94] ss:$8 sps:$4 sm:$0xff]  }
 0x101   : > { %v7016_v37 = vld [vmem:[#allocation14 + $0x394] ss:$8 sps:$4 sm:$0xff]   ;;  %v7018_v38 = vld [vmem:[#allocation14 + $0x90] ss:$8 sps:$4 sm:$0xff]   ;;  %v7020_v40 = vld [vmem:[#allocation14 + $0xa4] ss:$8 sps:$4 sm:$0xff]  }
 0x102   : > { %2158 = vmatpush1.bf16.msra.mxu1 %v6982_v14  ;;  %v7019_v39 = vld [vmem:[#allocation14 + $0x390] ss:$8 sps:$4 sm:$0xff]   ;;  %v7022_v41 = vld [vmem:[#allocation14 + $0x3a4] ss:$8 sps:$4 sm:$0xff]   ;;  %v7024_v42 = vld [vmem:[#allocation14 + $0xa0] ss:$8 sps:$4 sm:$0xff]  }
 0x103   : > { %2281 = vmatpush1.bf16.msra.mxu0 %v6983_v15  ;;  %2159 = vmatprep.subr.bf16.mxu1 %v6984_v16  ;;  %v7025_v43 = vld [vmem:[#allocation14 + $0x3a0] ss:$8 sps:$4 sm:$0xff]   ;;  %v7026_v44 = vld [vmem:[#allocation14 + $0xb4] ss:$8 sps:$4 sm:$0xff]   ;;  %v7030_v47 = vld [vmem:[#allocation14 + $0xb0] ss:$8 sps:$4 sm:$0xff]  }
 0x104   : > { %2282 = vmatprep.subr.bf16.mxu0 %v6986_v17  ;;  %v7028_v45 = vld [vmem:[#allocation14 + $0x3b4] ss:$8 sps:$4 sm:$0xff]   ;;  %v555_v46 = vld [vmem:[%s8935_s16] sm:$0x77]  ;;  %v7031_v49 = vld [vmem:[#allocation14 + $0x3b0] ss:$8 sps:$4 sm:$0xff]  }
 0x105   : > { %v571_v48 = vcombine.high %v555_v46, %v555_v46  ;;  %v558_v50 = vld [vmem:[%s8935_s16 + $0x18] sm:$0x77]  ;;  %v7042_v60 = vld [vmem:[#allocation14 + $0xd0] ss:$8 sps:$4 sm:$0xff]   ;;  %v587_v8 = vpack.c.bf16 %v555_v46, %v555_v46  ;;  %s8936_s7 = sld [smem:[#allocation41_spill]]  ;;  %vm8119_vm1 = vmmov 0  }
 0x106   : > { %2160 = vmatpush1.bf16.msra.mxu1 %v6988_v18  ;;  %v7032_v51 = vld [vmem:[#allocation14 + $0xc4] ss:$8 sps:$4 sm:$0xff]   ;;  %v574_v54 = vcombine.high %v558_v50, %v558_v50  ;;  %v7036_v56 = vld [vmem:[#allocation14 + $0xc0] ss:$8 sps:$4 sm:$0xff]   ;;  %v7038_v58 = vld [vmem:[#allocation14 + $0xd4] ss:$8 sps:$4 sm:$0xff]   ;;  %v593_v9 = vpack.c.bf16 %v558_v50, %v558_v50 }
 0x107   : > { %2283 = vmatpush1.bf16.msra.mxu0 %v6989_v19  ;;  %2161 = vmatprep.subr.bf16.mxu1 %v6990_v20  ;;  %v7034_v52 = vld [vmem:[#allocation14 + $0x3c4] ss:$8 sps:$4 sm:$0xff]   ;;  %v588_v53 = vpack.c.bf16 %v571_v48, %v571_v48  ;;  %v7037_v57 = vld [vmem:[#allocation14 + $0x3c0] ss:$8 sps:$4 sm:$0xff]   ;;  %v7040_v59 = vld [vmem:[#allocation14 + $0x3d4] ss:$8 sps:$4 sm:$0xff]  }
 0x108   : > { %2284 = vmatprep.subr.bf16.mxu0 %v6992_v21  ;;  %v594_v55 = vpack.c.bf16 %v574_v54, %v574_v54  ;;  %v7043_v61 = vld [vmem:[#allocation14 + $0x3d0] ss:$8 sps:$4 sm:$0xff]   ;;  %v7044_v62 = vld [vmem:[#allocation14 + $0xe4] ss:$8 sps:$4 sm:$0xff]   ;;  %v7048_v0 = vld [vmem:[#allocation14 + $0xe0] ss:$8 sps:$4 sm:$0xff]  }
 0x109   : > { %2183 = vmatprep.mubr.bf16.mxu1 %v588_v53  ;;  %v7046_v63 = vld [vmem:[#allocation14 + $0x3e4] ss:$8 sps:$4 sm:$0xff]   ;;  %v7049_v1 = vld [vmem:[#allocation14 + $0x3e0] ss:$8 sps:$4 sm:$0xff]   ;;  %v7050_v2 = vld [vmem:[#allocation14 + $0xf4] ss:$8 sps:$4 sm:$0xff]  }
 0x10a   : > { %2162 = vmatpush1.bf16.msra.mxu1 %v6994_v22  ;;  %2306 = vmatprep.mubr.bf16.mxu0 %v594_v55  ;;  %v7052_v3 = vld [vmem:[#allocation14 + $0x3f4] ss:$8 sps:$4 sm:$0xff]   ;;  %v7054_v4 = vld [vmem:[#allocation14 + $0xf0] ss:$8 sps:$4 sm:$0xff]   ;;  %v7059_v6 = vld [vmem:[#allocation14 + $0x104] ss:$8 sps:$4 sm:$0xff]  }
 0x10b   : > { %2285 = vmatpush1.bf16.msra.mxu0 %v6995_v23  ;;  %2163 = vmatprep.subr.bf16.mxu1 %v6996_v24  ;;  %v7055_v5 = vld [vmem:[#allocation14 + $0x3f0] ss:$8 sps:$4 sm:$0xff]   ;;  %v7063_v7 = vld [vmem:[#allocation14 + $0x404] ss:$8 sps:$4 sm:$0xff]   ;;  %v7057_v10 = vld [vmem:[#allocation14 + $0x100] ss:$8 sps:$4 sm:$0xff]  }
 0x10c   : > { %2286 = vmatprep.subr.bf16.mxu0 %v6998_v25  ;;  %v7061_v11 = vld [vmem:[#allocation14 + $0x400] ss:$8 sps:$4 sm:$0xff]   ;;  %v7066_v12 = vld [vmem:[#allocation14 + $0x114] ss:$8 sps:$4 sm:$0xff]   ;;  %v7064_v14 = vld [vmem:[#allocation14 + $0x110] ss:$8 sps:$4 sm:$0xff]  }
 0x10d   : > { %v7069_v13 = vld [vmem:[#allocation14 + $0x414] ss:$8 sps:$4 sm:$0xff]   ;;  %v7067_v15 = vld [vmem:[#allocation14 + $0x410] ss:$8 sps:$4 sm:$0xff]   ;;  %v7072_v16 = vld [vmem:[#allocation14 + $0x124] ss:$8 sps:$4 sm:$0xff]  }
 0x10e   : > { %2164 = vmatpush1.bf16.msra.mxu1 %v7000_v26  ;;  %v7075_v17 = vld [vmem:[#allocation14 + $0x424] ss:$8 sps:$4 sm:$0xff]   ;;  %v7070_v18 = vld [vmem:[#allocation14 + $0x120] ss:$8 sps:$4 sm:$0xff]   ;;  %v7078_v20 = vld [vmem:[#allocation14 + $0x134] ss:$8 sps:$4 sm:$0xff]  }
 0x10f   : > { %2287 = vmatpush1.bf16.msra.mxu0 %v7001_v27  ;;  %2165 = vmatprep.subr.bf16.mxu1 %v7002_v28  ;;  %v7073_v19 = vld [vmem:[#allocation14 + $0x420] ss:$8 sps:$4 sm:$0xff]   ;;  %v7081_v21 = vld [vmem:[#allocation14 + $0x434] ss:$8 sps:$4 sm:$0xff]   ;;  %v7076_v22 = vld [vmem:[#allocation14 + $0x130] ss:$8 sps:$4 sm:$0xff]  }
 0x110   : > { %2288 = vmatprep.subr.bf16.mxu0 %v7004_v29  ;;  %v7079_v23 = vld [vmem:[#allocation14 + $0x430] ss:$8 sps:$4 sm:$0xff]   ;;  %v7084_v24 = vld [vmem:[#allocation14 + $0x144] ss:$8 sps:$4 sm:$0xff]   ;;  %v7082_v26 = vld [vmem:[#allocation14 + $0x140] ss:$8 sps:$4 sm:$0xff]  }
 0x111   : > { %v7087_v25 = vld [vmem:[#allocation14 + $0x444] ss:$8 sps:$4 sm:$0xff]   ;;  %v7085_v27 = vld [vmem:[#allocation14 + $0x440] ss:$8 sps:$4 sm:$0xff]   ;;  %v7090_v28 = vld [vmem:[#allocation14 + $0x154] ss:$8 sps:$4 sm:$0xff]  }
 0x112   : > { %2166 = vmatpush1.bf16.msra.mxu1 %v7006_v30  ;;  %v7093_v29 = vld [vmem:[#allocation14 + $0x454] ss:$8 sps:$4 sm:$0xff]   ;;  %v7088_v30 = vld [vmem:[#allocation14 + $0x150] ss:$8 sps:$4 sm:$0xff]   ;;  %v7108_v46 = vld [vmem:[#allocation14 + $0x184] ss:$8 sps:$4 sm:$0xff]  }
 0x113   : > { %2289 = vmatpush1.bf16.msra.mxu0 %v7007_v31  ;;  %2167 = vmatprep.subr.bf16.mxu1 %v7008_v32  ;;  %v7091_v31 = vld [vmem:[#allocation14 + $0x450] ss:$8 sps:$4 sm:$0xff]   ;;  %v7096_v32 = vld [vmem:[#allocation14 + $0x164] ss:$8 sps:$4 sm:$0xff]   ;;  %v7106_v48 = vld [vmem:[#allocation14 + $0x180] ss:$8 sps:$4 sm:$0xff]  }
 0x114   : > { %2290 = vmatprep.subr.bf16.mxu0 %v7010_v33  ;;  %v7099_v33 = vld [vmem:[#allocation14 + $0x464] ss:$8 sps:$4 sm:$0xff]   ;;  %v7114_v50 = vld [vmem:[#allocation14 + $0x194] ss:$8 sps:$4 sm:$0xff]   ;;  %v7115_v53 = vld [vmem:[#allocation14 + $0x490] ss:$8 sps:$4 sm:$0xff]  }
 0x115   : > { %v7120_v54 = vld [vmem:[#allocation14 + $0x1a4] ss:$8 sps:$4 sm:$0xff]   ;;  %s8937_s11 = sld [smem:[#allocation30_spill]]  ;;  %vm3007_vm2 = vcmask 18432   ;;  %vm3019_vm4 = vcmask 2048   ;;  %vm3026_vm5 = vcmask 23552  }
 0x116   : > { %2168 = vmatpush1.bf16.msra.mxu1 %v7012_v34  ;;  %v8523_v34 = vld [vmem:[%s8935_s16 + $0x8] sm:$0x77] }
 0x117   : > { %2291 = vmatpush1.bf16.msra.mxu0 %v7013_v35  ;;  %2169 = vmatprep.subr.bf16.mxu1 %v7014_v36  ;;  %v7094_v35 = vld [vmem:[#allocation14 + $0x160] ss:$8 sps:$4 sm:$0xff]   ;;  %v7123_v55 = vld [vmem:[#allocation14 + $0x4a4] ss:$8 sps:$4 sm:$0xff]  }
 0x118   : > { %2292 = vmatprep.subr.bf16.mxu0 %v7016_v37  ;;  %v7097_v36 = vld [vmem:[#allocation14 + $0x460] ss:$8 sps:$4 sm:$0xff]   ;;  %v572_v37 = vcombine.high %v8523_v34, %v8523_v34 }
 0x11a   : > { %2170 = vmatpush1.bf16.msra.mxu1 %v7018_v38  ;;  %v8530_v38 = vld [vmem:[%s8935_s16 + $0x20] sm:$0x77] }
 0x11b   : > { %2293 = vmatpush1.bf16.msra.mxu0 %v7019_v39  ;;  %2171 = vmatprep.subr.bf16.mxu1 %v7020_v40  ;;  %v7102_v39 = vld [vmem:[#allocation14 + $0x174] ss:$8 sps:$4 sm:$0xff]   ;;  %v575_v40 = vcombine.high %v8530_v38, %v8530_v38  ;;  %p3014_p4 = scmp.eq.s32.totalorder %s8937_s11, 0 }
 0x11c   : > { %2294 = vmatprep.subr.bf16.mxu0 %v7022_v41  ;;  %v7105_v41 = vld [vmem:[#allocation14 + $0x474] ss:$8 sps:$4 sm:$0xff]  }
 0x11d   : > { %s3015_s14 = scalar_select %p3014_p4, 1, 0 }
 0x11e   : > { %2172 = vmatpush1.bf16.msra.mxu1 %v7024_v42  ;;  %v590_v42 = vpack.c.bf16 %v572_v37, %v572_v37  ;;  %v7177_v37 = vld [vmem:[#allocation14 + $0x530] ss:$8 sps:$4 sm:$0xff]  }
 0x11f   : > { %2295 = vmatpush1.bf16.msra.mxu0 %v7025_v43  ;;  %2173 = vmatprep.subr.bf16.mxu1 %v7026_v44  ;;  %v596_v43 = vpack.c.bf16 %v575_v40, %v575_v40  ;;  %v7100_v44 = vld [vmem:[#allocation14 + $0x170] ss:$8 sps:$4 sm:$0xff]   ;;  %v7180_v40 = vld [vmem:[#allocation14 + $0x240] ss:$8 sps:$4 sm:$0xff]  }
 0x120   : > { %2296 = vmatprep.subr.bf16.mxu0 %v7028_v45  ;;  %v7103_v45 = vld [vmem:[#allocation14 + $0x470] ss:$8 sps:$4 sm:$0xff]  }
 0x122   : > { %2174 = vmatpush1.bf16.msra.mxu1 %v7030_v47  ;;  %v7111_v47 = vld [vmem:[#allocation14 + $0x484] ss:$8 sps:$4 sm:$0xff]  }
 0x123   : > { %2297 = vmatpush1.bf16.msra.mxu0 %v7031_v49  ;;  %2175 = vmatprep.subr.bf16.mxu1 %v7032_v51  ;;  %v7109_v49 = vld [vmem:[#allocation14 + $0x480] ss:$8 sps:$4 sm:$0xff]   ;;  %v7117_v51 = vld [vmem:[#allocation14 + $0x494] ss:$8 sps:$4 sm:$0xff]  }
 0x124   : > { %2298 = vmatprep.subr.bf16.mxu0 %v7034_v52  ;;  %v7112_v52 = vld [vmem:[#allocation14 + $0x190] ss:$8 sps:$4 sm:$0xff]  }
 0x126   : > { %2176 = vmatpush1.bf16.msra.mxu1 %v7036_v56  ;;  %v7118_v56 = vld [vmem:[#allocation14 + $0x1a0] ss:$8 sps:$4 sm:$0xff]  }
 0x127   : > { %2299 = vmatpush1.bf16.msra.mxu0 %v7037_v57  ;;  %2177 = vmatprep.subr.bf16.mxu1 %v7038_v58  ;;  %v7121_v57 = vld [vmem:[#allocation14 + $0x4a0] ss:$8 sps:$4 sm:$0xff]   ;;  %v7126_v58 = vld [vmem:[#allocation14 + $0x1b4] ss:$8 sps:$4 sm:$0xff]  }
 0x128   : > { %2300 = vmatprep.subr.bf16.mxu0 %v7040_v59  ;;  %v7129_v59 = vld [vmem:[#allocation14 + $0x4b4] ss:$8 sps:$4 sm:$0xff]  }
 0x12a   : > { %2178 = vmatpush1.bf16.msra.mxu1 %v7042_v60  ;;  %v7124_v60 = vld [vmem:[#allocation14 + $0x1b0] ss:$8 sps:$4 sm:$0xff]  }
 0x12b   : > { %2301 = vmatpush1.bf16.msra.mxu0 %v7043_v61  ;;  %2179 = vmatprep.subr.bf16.mxu1 %v7044_v62  ;;  %v7127_v61 = vld [vmem:[#allocation14 + $0x4b0] ss:$8 sps:$4 sm:$0xff]   ;;  %v7132_v62 = vld [vmem:[#allocation14 + $0x1c4] ss:$8 sps:$4 sm:$0xff]  }
 0x12c   : > { %2302 = vmatprep.subr.bf16.mxu0 %v7046_v63  ;;  %v7135_v63 = vld [vmem:[#allocation14 + $0x4c4] ss:$8 sps:$4 sm:$0xff]  }
 0x12e   : > { %2180 = vmatpush1.bf16.msra.mxu1 %v7048_v0  ;;  %v7130_v0 = vld [vmem:[#allocation14 + $0x1c0] ss:$8 sps:$4 sm:$0xff]  }
 0x12f   : > { %2303 = vmatpush1.bf16.msra.mxu0 %v7049_v1  ;;  %2181 = vmatprep.subr.bf16.mxu1 %v7050_v2  ;;  %v7133_v1 = vld [vmem:[#allocation14 + $0x4c0] ss:$8 sps:$4 sm:$0xff]   ;;  %v7138_v2 = vld [vmem:[#allocation14 + $0x1d4] ss:$8 sps:$4 sm:$0xff]  }
 0x130   : > { %2304 = vmatprep.subr.bf16.mxu0 %v7052_v3  ;;  %v7141_v3 = vld [vmem:[#allocation14 + $0x4d4] ss:$8 sps:$4 sm:$0xff]  }
 0x132   : > { %2182 = vmatpush1.bf16.msra.mxu1 %v7054_v4  ;;  %v7136_v4 = vld [vmem:[#allocation14 + $0x1d0] ss:$8 sps:$4 sm:$0xff]  }
 0x133   : > { %2305 = vmatpush1.bf16.msra.mxu0 %v7055_v5  ;;  %2192 = vmatprep.subr.bf16.mxu1 %v7059_v6  ;;  %v7139_v5 = vld [vmem:[#allocation14 + $0x4d0] ss:$8 sps:$4 sm:$0xff]   ;;  %v7144_v6 = vld [vmem:[#allocation14 + $0x1e4] ss:$8 sps:$4 sm:$0xff]  }
 0x134   : > { %2315 = vmatprep.subr.bf16.mxu0 %v7063_v7  ;;  %v7147_v7 = vld [vmem:[#allocation14 + $0x4e4] ss:$8 sps:$4 sm:$0xff]  }
 0x135   : > { %2184 = vmatmul.mubr.bf16.vlgmr.msra.gmra.mrb[0].mxu1 %v587_v8  ;;  %v7142_v8 = vld [vmem:[#allocation14 + $0x1e0] ss:$8 sps:$4 sm:$0xff]  }
 0x136   : > { %2307 = vmatmul.mubr.bf16.vlgmr.msra.gmra.mrb[0].mxu0 %v593_v9  ;;  %2193 = vmatpush1.bf16.msra.mxu1 %v7057_v10  ;;  %v7145_v9 = vld [vmem:[#allocation14 + $0x4e0] ss:$8 sps:$4 sm:$0xff]   ;;  %v7150_v10 = vld [vmem:[#allocation14 + $0x1f4] ss:$8 sps:$4 sm:$0xff]  }
 0x137   : > { %2316 = vmatpush1.bf16.msra.mxu0 %v7061_v11  ;;  %2194 = vmatprep.subr.bf16.mxu1 %v7066_v12  ;;  %v7153_v11 = vld [vmem:[#allocation14 + $0x4f4] ss:$8 sps:$4 sm:$0xff]   ;;  %v7148_v12 = vld [vmem:[#allocation14 + $0x1f0] ss:$8 sps:$4 sm:$0xff]  }
 0x138   : > { %2317 = vmatprep.subr.bf16.mxu0 %v7069_v13  ;;  %2224 = vmatprep.mubr.bf16.mxu1 %v590_v42  ;;  %v7151_v13 = vld [vmem:[#allocation14 + $0x4f0] ss:$8 sps:$4 sm:$0xff]   ;;  %v7188_v42 = vld [vmem:[#allocation14 + $0x254] ss:$8 sps:$4 sm:$0xff]  }
 0x139   : > { %2347 = vmatprep.mubr.bf16.mxu0 %v596_v43  ;;  %v7191_v43 = vld [vmem:[#allocation14 + $0x554] ss:$8 sps:$4 sm:$0xff]  }
 0x13a   : > { %2195 = vmatpush1.bf16.msra.mxu1 %v7064_v14  ;;  %v7157_v14 = vld [vmem:[#allocation14 + $0x204] ss:$8 sps:$4 sm:$0xff]  }
 0x13b   : > { %2318 = vmatpush1.bf16.msra.mxu0 %v7067_v15  ;;  %2196 = vmatprep.subr.bf16.mxu1 %v7072_v16  ;;  %v7161_v15 = vld [vmem:[#allocation14 + $0x504] ss:$8 sps:$4 sm:$0xff]   ;;  %v589_v16 = vpack.c.bf16 %v8523_v34, %v8523_v34  ;;  %v7176_v34 = vld [vmem:[#allocation14 + $0x234] ss:$8 sps:$4 sm:$0xff]  }
 0x13c   : > { %2319 = vmatprep.subr.bf16.mxu0 %v7075_v17  ;;  %v7155_v17 = vld [vmem:[#allocation14 + $0x200] ss:$8 sps:$4 sm:$0xff]  }
 0x13e   : > { %2197 = vmatpush1.bf16.msra.mxu1 %v7070_v18  ;;  %v595_v18 = vpack.c.bf16 %v8530_v38, %v8530_v38  ;;  %v7182_v38 = vld [vmem:[#allocation14 + $0x244] ss:$8 sps:$4 sm:$0xff]  }
 0x13f   : > { %2320 = vmatpush1.bf16.msra.mxu0 %v7073_v19  ;;  %2198 = vmatprep.subr.bf16.mxu1 %v7078_v20  ;;  %v7159_v19 = vld [vmem:[#allocation14 + $0x500] ss:$8 sps:$4 sm:$0xff]   ;;  %v7164_v20 = vld [vmem:[#allocation14 + $0x214] ss:$8 sps:$4 sm:$0xff]  }
 0x140   : > { %2321 = vmatprep.subr.bf16.mxu0 %v7081_v21  ;;  %v7167_v21 = vld [vmem:[#allocation14 + $0x514] ss:$8 sps:$4 sm:$0xff]  }
 0x142   : > { %2199 = vmatpush1.bf16.msra.mxu1 %v7076_v22  ;;  %v8541_v22 = vld [vmem:[%s8935_s16 + $0x10] sm:$0x77] }
 0x143   : > { %2322 = vmatpush1.bf16.msra.mxu0 %v7079_v23  ;;  %2200 = vmatprep.subr.bf16.mxu1 %v7084_v24  ;;  %v8546_v23 = vld [vmem:[%s8935_s16 + $0x28] sm:$0x77]  ;;  %v573_v24 = vcombine.high %v8541_v22, %v8541_v22 }
 0x144   : > { %2323 = vmatprep.subr.bf16.mxu0 %v7087_v25  ;;  %v576_v25 = vcombine.high %v8546_v23, %v8546_v23 }
 0x146   : > { %2201 = vmatpush1.bf16.msra.mxu1 %v7082_v26  ;;  %v7162_v26 = vld [vmem:[#allocation14 + $0x210] ss:$8 sps:$4 sm:$0xff]  }
 0x147   : > { %2324 = vmatpush1.bf16.msra.mxu0 %v7085_v27  ;;  %2202 = vmatprep.subr.bf16.mxu1 %v7090_v28  ;;  %v7165_v27 = vld [vmem:[#allocation14 + $0x510] ss:$8 sps:$4 sm:$0xff]   ;;  %v592_v28 = vpack.c.bf16 %v573_v24, %v573_v24 }
 0x148   : > { %2325 = vmatprep.subr.bf16.mxu0 %v7093_v29  ;;  %v598_v29 = vpack.c.bf16 %v576_v25, %v576_v25  ;;  %v7249_v24 = vld [vmem:[#allocation14 + $0x5f0] ss:$8 sps:$4 sm:$0xff]  }
 0x14a   : > { %2203 = vmatpush1.bf16.msra.mxu1 %v7088_v30  ;;  %v7170_v30 = vld [vmem:[#allocation14 + $0x224] ss:$8 sps:$4 sm:$0xff]  }
 0x14b   : > { %2326 = vmatpush1.bf16.msra.mxu0 %v7091_v31  ;;  %2204 = vmatprep.subr.bf16.mxu1 %v7096_v32  ;;  %v7173_v31 = vld [vmem:[#allocation14 + $0x524] ss:$8 sps:$4 sm:$0xff]   ;;  %v7168_v32 = vld [vmem:[#allocation14 + $0x220] ss:$8 sps:$4 sm:$0xff]  }
 0x14c   : > { %2327 = vmatprep.subr.bf16.mxu0 %v7099_v33  ;;  %v7171_v33 = vld [vmem:[#allocation14 + $0x520] ss:$8 sps:$4 sm:$0xff]  }
 0x14e   : > { %2205 = vmatpush1.bf16.msra.mxu1 %v7094_v35  ;;  %v7179_v35 = vld [vmem:[#allocation14 + $0x534] ss:$8 sps:$4 sm:$0xff]  }
 0x14f   : > { %2328 = vmatpush1.bf16.msra.mxu0 %v7097_v36  ;;  %2206 = vmatprep.subr.bf16.mxu1 %v7102_v39  ;;  %v7174_v36 = vld [vmem:[#allocation14 + $0x230] ss:$8 sps:$4 sm:$0xff]   ;;  %v7185_v39 = vld [vmem:[#allocation14 + $0x544] ss:$8 sps:$4 sm:$0xff]  }
 0x150   : > { %2329 = vmatprep.subr.bf16.mxu0 %v7105_v41  ;;  %v7183_v41 = vld [vmem:[#allocation14 + $0x540] ss:$8 sps:$4 sm:$0xff]  }
 0x152   : > { %2207 = vmatpush1.bf16.msra.mxu1 %v7100_v44  ;;  %v7186_v44 = vld [vmem:[#allocation14 + $0x250] ss:$8 sps:$4 sm:$0xff]  }
 0x153   : > { %2330 = vmatpush1.bf16.msra.mxu0 %v7103_v45  ;;  %2208 = vmatprep.subr.bf16.mxu1 %v7108_v46  ;;  %v7189_v45 = vld [vmem:[#allocation14 + $0x550] ss:$8 sps:$4 sm:$0xff]   ;;  %v7194_v46 = vld [vmem:[#allocation14 + $0x264] ss:$8 sps:$4 sm:$0xff]  }
 0x154   : > { %2331 = vmatprep.subr.bf16.mxu0 %v7111_v47  ;;  %v7197_v47 = vld [vmem:[#allocation14 + $0x564] ss:$8 sps:$4 sm:$0xff]  }
 0x156   : > { %2209 = vmatpush1.bf16.msra.mxu1 %v7106_v48  ;;  %v7192_v48 = vld [vmem:[#allocation14 + $0x260] ss:$8 sps:$4 sm:$0xff]  }
 0x157   : > { %2332 = vmatpush1.bf16.msra.mxu0 %v7109_v49  ;;  %2210 = vmatprep.subr.bf16.mxu1 %v7114_v50  ;;  %v7195_v49 = vld [vmem:[#allocation14 + $0x560] ss:$8 sps:$4 sm:$0xff]   ;;  %v7200_v50 = vld [vmem:[#allocation14 + $0x274] ss:$8 sps:$4 sm:$0xff]  }
 0x158   : > { %2333 = vmatprep.subr.bf16.mxu0 %v7117_v51  ;;  %v7203_v51 = vld [vmem:[#allocation14 + $0x574] ss:$8 sps:$4 sm:$0xff]  }
 0x15a   : > { %2211 = vmatpush1.bf16.msra.mxu1 %v7112_v52  ;;  %v7198_v52 = vld [vmem:[#allocation14 + $0x270] ss:$8 sps:$4 sm:$0xff]  }
 0x15b   : > { %2334 = vmatpush1.bf16.msra.mxu0 %v7115_v53  ;;  %2212 = vmatprep.subr.bf16.mxu1 %v7120_v54  ;;  %v7201_v53 = vld [vmem:[#allocation14 + $0x570] ss:$8 sps:$4 sm:$0xff]   ;;  %v7206_v54 = vld [vmem:[#allocation14 + $0x284] ss:$8 sps:$4 sm:$0xff]  }
 0x15c   : > { %2335 = vmatprep.subr.bf16.mxu0 %v7123_v55  ;;  %v7209_v55 = vld [vmem:[#allocation14 + $0x584] ss:$8 sps:$4 sm:$0xff]  }
 0x15e   : > { %2213 = vmatpush1.bf16.msra.mxu1 %v7118_v56  ;;  %v7204_v56 = vld [vmem:[#allocation14 + $0x280] ss:$8 sps:$4 sm:$0xff]  }
 0x15f   : > { %2336 = vmatpush1.bf16.msra.mxu0 %v7121_v57  ;;  %2214 = vmatprep.subr.bf16.mxu1 %v7126_v58  ;;  %v7207_v57 = vld [vmem:[#allocation14 + $0x580] ss:$8 sps:$4 sm:$0xff]   ;;  %v7212_v58 = vld [vmem:[#allocation14 + $0x294] ss:$8 sps:$4 sm:$0xff]  }
 0x160   : > { %2337 = vmatprep.subr.bf16.mxu0 %v7129_v59  ;;  %v7215_v59 = vld [vmem:[#allocation14 + $0x594] ss:$8 sps:$4 sm:$0xff]  }
 0x162   : > { %2215 = vmatpush1.bf16.msra.mxu1 %v7124_v60  ;;  %v7210_v60 = vld [vmem:[#allocation14 + $0x290] ss:$8 sps:$4 sm:$0xff]  }
 0x163   : > { %2338 = vmatpush1.bf16.msra.mxu0 %v7127_v61  ;;  %2216 = vmatprep.subr.bf16.mxu1 %v7132_v62  ;;  %v7213_v61 = vld [vmem:[#allocation14 + $0x590] ss:$8 sps:$4 sm:$0xff]   ;;  %v7218_v62 = vld [vmem:[#allocation14 + $0x2a4] ss:$8 sps:$4 sm:$0xff]  }
 0x164   : > { %2339 = vmatprep.subr.bf16.mxu0 %v7135_v63  ;;  %v7221_v63 = vld [vmem:[#allocation14 + $0x5a4] ss:$8 sps:$4 sm:$0xff]  }
 0x166   : > { %2217 = vmatpush1.bf16.msra.mxu1 %v7130_v0  ;;  %v7216_v0 = vld [vmem:[#allocation14 + $0x2a0] ss:$8 sps:$4 sm:$0xff]  }
 0x167   : > { %2340 = vmatpush1.bf16.msra.mxu0 %v7133_v1  ;;  %2218 = vmatprep.subr.bf16.mxu1 %v7138_v2  ;;  %v7219_v1 = vld [vmem:[#allocation14 + $0x5a0] ss:$8 sps:$4 sm:$0xff]   ;;  %v7224_v2 = vld [vmem:[#allocation14 + $0x2b4] ss:$8 sps:$4 sm:$0xff]  }
 0x168   : > { %2341 = vmatprep.subr.bf16.mxu0 %v7141_v3  ;;  %v7227_v3 = vld [vmem:[#allocation14 + $0x5b4] ss:$8 sps:$4 sm:$0xff]  }
 0x16a   : > { %2219 = vmatpush1.bf16.msra.mxu1 %v7136_v4  ;;  %v7222_v4 = vld [vmem:[#allocation14 + $0x2b0] ss:$8 sps:$4 sm:$0xff]  }
 0x16b   : > { %2342 = vmatpush1.bf16.msra.mxu0 %v7139_v5  ;;  %2220 = vmatprep.subr.bf16.mxu1 %v7144_v6  ;;  %v7225_v5 = vld [vmem:[#allocation14 + $0x5b0] ss:$8 sps:$4 sm:$0xff]   ;;  %v7230_v6 = vld [vmem:[#allocation14 + $0x2c4] ss:$8 sps:$4 sm:$0xff]  }
 0x16c   : > { %2343 = vmatprep.subr.bf16.mxu0 %v7147_v7  ;;  %v7233_v7 = vld [vmem:[#allocation14 + $0x5c4] ss:$8 sps:$4 sm:$0xff]  }
 0x16e   : > { %2221 = vmatpush1.bf16.msra.mxu1 %v7142_v8  ;;  %v7228_v8 = vld [vmem:[#allocation14 + $0x2c0] ss:$8 sps:$4 sm:$0xff]  }
 0x16f   : > { %2344 = vmatpush1.bf16.msra.mxu0 %v7145_v9  ;;  %2222 = vmatprep.subr.bf16.mxu1 %v7150_v10  ;;  %v7231_v9 = vld [vmem:[#allocation14 + $0x5c0] ss:$8 sps:$4 sm:$0xff]   ;;  %v7236_v10 = vld [vmem:[#allocation14 + $0x2d4] ss:$8 sps:$4 sm:$0xff]  }
 0x170   : > { %2345 = vmatprep.subr.bf16.mxu0 %v7153_v11  ;;  %v7239_v11 = vld [vmem:[#allocation14 + $0x5d4] ss:$8 sps:$4 sm:$0xff]  }
 0x172   : > { %2223 = vmatpush1.bf16.msra.mxu1 %v7148_v12  ;;  %v7234_v12 = vld [vmem:[#allocation14 + $0x2d0] ss:$8 sps:$4 sm:$0xff]  }
 0x173   : > { %2346 = vmatpush1.bf16.msra.mxu0 %v7151_v13  ;;  %2233 = vmatprep.subr.bf16.mxu1 %v7157_v14  ;;  %v7237_v13 = vld [vmem:[#allocation14 + $0x5d0] ss:$8 sps:$4 sm:$0xff]   ;;  %v7242_v14 = vld [vmem:[#allocation14 + $0x2e4] ss:$8 sps:$4 sm:$0xff]  }
 0x174   : > { %2356 = vmatprep.subr.bf16.mxu0 %v7161_v15  ;;  %v7245_v15 = vld [vmem:[#allocation14 + $0x5e4] ss:$8 sps:$4 sm:$0xff]  }
 0x175   : > { %2225 = vmatmul.mubr.bf16.vlgmr.msra.gmra.mrb[0].mxu1 %v589_v16  ;;  %v7240_v16 = vld [vmem:[#allocation14 + $0x2e0] ss:$8 sps:$4 sm:$0xff]  }
 0x176   : > { %2348 = vmatmul.mubr.bf16.vlgmr.msra.gmra.mrb[0].mxu0 %v595_v18  ;;  %2234 = vmatpush1.bf16.msra.mxu1 %v7155_v17  ;;  %v7243_v17 = vld [vmem:[#allocation14 + $0x5e0] ss:$8 sps:$4 sm:$0xff]   ;;  %v7248_v18 = vld [vmem:[#allocation14 + $0x2f4] ss:$8 sps:$4 sm:$0xff]  }
 0x177   : > { %2357 = vmatpush1.bf16.msra.mxu0 %v7159_v19  ;;  %2235 = vmatprep.subr.bf16.mxu1 %v7164_v20  ;;  %v7251_v19 = vld [vmem:[#allocation14 + $0x5f4] ss:$8 sps:$4 sm:$0xff]  }
 0x178   : > { %2358 = vmatprep.subr.bf16.mxu0 %v7167_v21  ;;  %2265 = vmatprep.mubr.bf16.mxu1 %v592_v28  ;;  %v8555_v20 = vld [vmem:[%s8935_s16 + $0x30] sm:$0x77]  ;;  %v591_v28 = vpack.c.bf16 %v8541_v22, %v8541_v22 }
 0x179   : > { %2388 = vmatprep.mubr.bf16.mxu0 %v598_v29  ;;  %v7246_v21 = vld [vmem:[#allocation14 + $0x2f0] ss:$8 sps:$4 sm:$0xff]   ;;  %v577_v25 = vcombine.high %v8555_v20, %v8555_v20  ;;  %v597_v29 = vpack.c.bf16 %v8546_v23, %v8546_v23  ;;  %v7268_v23 = vld [vmem:[#allocation14 + $0x644] ss:$8 sps:$4 sm:$0xff]  }
 0x17a   : > { %2236 = vmatpush1.bf16.msra.mxu1 %v7162_v26  ;;  %v7256_v26 = vld [vmem:[#allocation14 + $0x604] ss:$8 sps:$4 sm:$0xff]   ;;  %v7263_v22 = vld [vmem:[#allocation14 + $0x630] ss:$8 sps:$4 sm:$0xff]  }
 0x17b   : > { %2359 = vmatpush1.bf16.msra.mxu0 %v7165_v27  ;;  %2237 = vmatprep.subr.bf16.mxu1 %v7170_v30  ;;  %v7254_v27 = vld [vmem:[#allocation14 + $0x600] ss:$8 sps:$4 sm:$0xff]   ;;  %v7259_v30 = vld [vmem:[#allocation14 + $0x614] ss:$8 sps:$4 sm:$0xff]  }
 0x17c   : > { %2360 = vmatprep.subr.bf16.mxu0 %v7173_v31  ;;  %v600_v31 = vpack.c.bf16 %v577_v25, %v577_v25  ;;  %v7341_v25 = vld [vmem:[#allocation14 + $0x7c4] ss:$8 sps:$4 sm:$0xff]  }
 0x17e   : > { %2238 = vmatpush1.bf16.msra.mxu1 %v7168_v32  ;;  %v7257_v32 = vld [vmem:[#allocation14 + $0x610] ss:$8 sps:$4 sm:$0xff]  }
 0x17f   : > { %2361 = vmatpush1.bf16.msra.mxu0 %v7171_v33  ;;  %2239 = vmatprep.subr.bf16.mxu1 %v7176_v34  ;;  %v7262_v33 = vld [vmem:[#allocation14 + $0x624] ss:$8 sps:$4 sm:$0xff]   ;;  %v7260_v34 = vld [vmem:[#allocation14 + $0x620] ss:$8 sps:$4 sm:$0xff]  }
 0x180   : > { %2362 = vmatprep.subr.bf16.mxu0 %v7179_v35  ;;  %v7265_v35 = vld [vmem:[#allocation14 + $0x634] ss:$8 sps:$4 sm:$0xff]  }
 0x182   : > { %2240 = vmatpush1.bf16.msra.mxu1 %v7174_v36  ;;  %v7266_v36 = vld [vmem:[#allocation14 + $0x640] ss:$8 sps:$4 sm:$0xff]  }
 0x183   : > { %2363 = vmatpush1.bf16.msra.mxu0 %v7177_v37  ;;  %2241 = vmatprep.subr.bf16.mxu1 %v7182_v38  ;;  %v7271_v37 = vld [vmem:[#allocation14 + $0x654] ss:$8 sps:$4 sm:$0xff]   ;;  %v7269_v38 = vld [vmem:[#allocation14 + $0x650] ss:$8 sps:$4 sm:$0xff]  }
 0x184   : > { %2364 = vmatprep.subr.bf16.mxu0 %v7185_v39  ;;  %v7274_v39 = vld [vmem:[#allocation14 + $0x664] ss:$8 sps:$4 sm:$0xff]  }
 0x186   : > { %2242 = vmatpush1.bf16.msra.mxu1 %v7180_v40  ;;  %v7272_v40 = vld [vmem:[#allocation14 + $0x660] ss:$8 sps:$4 sm:$0xff]  }
 0x187   : > { %2365 = vmatpush1.bf16.msra.mxu0 %v7183_v41  ;;  %2243 = vmatprep.subr.bf16.mxu1 %v7188_v42  ;;  %v7277_v41 = vld [vmem:[#allocation14 + $0x674] ss:$8 sps:$4 sm:$0xff]   ;;  %v7275_v42 = vld [vmem:[#allocation14 + $0x670] ss:$8 sps:$4 sm:$0xff]  }
 0x188   : > { %2366 = vmatprep.subr.bf16.mxu0 %v7191_v43  ;;  %v7280_v43 = vld [vmem:[#allocation14 + $0x684] ss:$8 sps:$4 sm:$0xff]  }
 0x18a   : > { %2244 = vmatpush1.bf16.msra.mxu1 %v7186_v44  ;;  %v7278_v44 = vld [vmem:[#allocation14 + $0x680] ss:$8 sps:$4 sm:$0xff]  }
 0x18b   : > { %2367 = vmatpush1.bf16.msra.mxu0 %v7189_v45  ;;  %2245 = vmatprep.subr.bf16.mxu1 %v7194_v46  ;;  %v7283_v45 = vld [vmem:[#allocation14 + $0x694] ss:$8 sps:$4 sm:$0xff]   ;;  %v7281_v46 = vld [vmem:[#allocation14 + $0x690] ss:$8 sps:$4 sm:$0xff]  }
 0x18c   : > { %2368 = vmatprep.subr.bf16.mxu0 %v7197_v47  ;;  %v7286_v47 = vld [vmem:[#allocation14 + $0x6a4] ss:$8 sps:$4 sm:$0xff]  }
 0x18e   : > { %2246 = vmatpush1.bf16.msra.mxu1 %v7192_v48  ;;  %v7284_v48 = vld [vmem:[#allocation14 + $0x6a0] ss:$8 sps:$4 sm:$0xff]  }
 0x18f   : > { %2369 = vmatpush1.bf16.msra.mxu0 %v7195_v49  ;;  %2247 = vmatprep.subr.bf16.mxu1 %v7200_v50  ;;  %v7289_v49 = vld [vmem:[#allocation14 + $0x6b4] ss:$8 sps:$4 sm:$0xff]   ;;  %v7287_v50 = vld [vmem:[#allocation14 + $0x6b0] ss:$8 sps:$4 sm:$0xff]  }
 0x190   : > { %2370 = vmatprep.subr.bf16.mxu0 %v7203_v51  ;;  %v7292_v51 = vld [vmem:[#allocation14 + $0x6c4] ss:$8 sps:$4 sm:$0xff]  }
 0x192   : > { %2248 = vmatpush1.bf16.msra.mxu1 %v7198_v52  ;;  %v7290_v52 = vld [vmem:[#allocation14 + $0x6c0] ss:$8 sps:$4 sm:$0xff]  }
 0x193   : > { %2371 = vmatpush1.bf16.msra.mxu0 %v7201_v53  ;;  %2249 = vmatprep.subr.bf16.mxu1 %v7206_v54  ;;  %v7295_v53 = vld [vmem:[#allocation14 + $0x6d4] ss:$8 sps:$4 sm:$0xff]   ;;  %v7293_v54 = vld [vmem:[#allocation14 + $0x6d0] ss:$8 sps:$4 sm:$0xff]  }
 0x194   : > { %2372 = vmatprep.subr.bf16.mxu0 %v7209_v55  ;;  %v7298_v55 = vld [vmem:[#allocation14 + $0x6e4] ss:$8 sps:$4 sm:$0xff]  }
 0x196   : > { %2250 = vmatpush1.bf16.msra.mxu1 %v7204_v56  ;;  %v7296_v56 = vld [vmem:[#allocation14 + $0x6e0] ss:$8 sps:$4 sm:$0xff]  }
 0x197   : > { %2373 = vmatpush1.bf16.msra.mxu0 %v7207_v57  ;;  %2251 = vmatprep.subr.bf16.mxu1 %v7212_v58  ;;  %v7301_v57 = vld [vmem:[#allocation14 + $0x6f4] ss:$8 sps:$4 sm:$0xff]  }
 0x198   : > { %2374 = vmatprep.subr.bf16.mxu0 %v7215_v59  ;;  %v8566_v58 = vld [vmem:[%s8935_s16 + $0x38] sm:$0x77]  ;;  %v7299_v59 = vld [vmem:[#allocation14 + $0x6f0] ss:$8 sps:$4 sm:$0xff]  }
 0x19a   : > { %2252 = vmatpush1.bf16.msra.mxu1 %v7210_v60  ;;  %v578_v60 = vcombine.high %v8566_v58, %v8566_v58 }
 0x19b   : > { %2375 = vmatpush1.bf16.msra.mxu0 %v7213_v61  ;;  %2253 = vmatprep.subr.bf16.mxu1 %v7218_v62  ;;  %v7305_v61 = vld [vmem:[#allocation14 + $0x704] ss:$8 sps:$4 sm:$0xff]   ;;  %v599_v62 = vpack.c.bf16 %v8555_v20, %v8555_v20  ;;  %v7333_v20 = vld [vmem:[#allocation14 + $0x7a0] ss:$8 sps:$4 sm:$0xff]  }
 0x19c   : > { %2376 = vmatprep.subr.bf16.mxu0 %v7221_v63  ;;  %v7303_v63 = vld [vmem:[#allocation14 + $0x700] ss:$8 sps:$4 sm:$0xff]  }
 0x19e   : > { %2254 = vmatpush1.bf16.msra.mxu1 %v7216_v0  ;;  %v602_v0 = vpack.c.bf16 %v578_v60, %v578_v60 }
 0x19f   : > { %2377 = vmatpush1.bf16.msra.mxu0 %v7219_v1  ;;  %2255 = vmatprep.subr.bf16.mxu1 %v7224_v2  ;;  %v7308_v1 = vld [vmem:[#allocation14 + $0x714] ss:$8 sps:$4 sm:$0xff]   ;;  %v7306_v2 = vld [vmem:[#allocation14 + $0x710] ss:$8 sps:$4 sm:$0xff]  }
 0x1a0   : > { %2378 = vmatprep.subr.bf16.mxu0 %v7227_v3  ;;  %v7311_v3 = vld [vmem:[#allocation14 + $0x724] ss:$8 sps:$4 sm:$0xff]  }
 0x1a2   : > { %2256 = vmatpush1.bf16.msra.mxu1 %v7222_v4  ;;  %v7309_v4 = vld [vmem:[#allocation14 + $0x720] ss:$8 sps:$4 sm:$0xff]  }
 0x1a3   : > { %2379 = vmatpush1.bf16.msra.mxu0 %v7225_v5  ;;  %2257 = vmatprep.subr.bf16.mxu1 %v7230_v6  ;;  %v7314_v5 = vld [vmem:[#allocation14 + $0x734] ss:$8 sps:$4 sm:$0xff]   ;;  %v7312_v6 = vld [vmem:[#allocation14 + $0x730] ss:$8 sps:$4 sm:$0xff]  }
 0x1a4   : > { %2380 = vmatprep.subr.bf16.mxu0 %v7233_v7  ;;  %v7317_v7 = vld [vmem:[#allocation14 + $0x744] ss:$8 sps:$4 sm:$0xff]  }
 0x1a6   : > { %2258 = vmatpush1.bf16.msra.mxu1 %v7228_v8  ;;  %v7315_v8 = vld [vmem:[#allocation14 + $0x740] ss:$8 sps:$4 sm:$0xff]  }
 0x1a7   : > { %2381 = vmatpush1.bf16.msra.mxu0 %v7231_v9  ;;  %2259 = vmatprep.subr.bf16.mxu1 %v7236_v10  ;;  %v7320_v9 = vld [vmem:[#allocation14 + $0x754] ss:$8 sps:$4 sm:$0xff]   ;;  %v7318_v10 = vld [vmem:[#allocation14 + $0x750] ss:$8 sps:$4 sm:$0xff]  }
 0x1a8   : > { %2382 = vmatprep.subr.bf16.mxu0 %v7239_v11  ;;  %v7323_v11 = vld [vmem:[#allocation14 + $0x764] ss:$8 sps:$4 sm:$0xff]  }
 0x1aa   : > { %2260 = vmatpush1.bf16.msra.mxu1 %v7234_v12  ;;  %v7321_v12 = vld [vmem:[#allocation14 + $0x760] ss:$8 sps:$4 sm:$0xff]  }
 0x1ab   : > { %2383 = vmatpush1.bf16.msra.mxu0 %v7237_v13  ;;  %2261 = vmatprep.subr.bf16.mxu1 %v7242_v14  ;;  %v7326_v13 = vld [vmem:[#allocation14 + $0x774] ss:$8 sps:$4 sm:$0xff]   ;;  %v7324_v14 = vld [vmem:[#allocation14 + $0x770] ss:$8 sps:$4 sm:$0xff]  }
 0x1ac   : > { %2384 = vmatprep.subr.bf16.mxu0 %v7245_v15  ;;  %v7329_v15 = vld [vmem:[#allocation14 + $0x784] ss:$8 sps:$4 sm:$0xff]  }
 0x1ae   : > { %2262 = vmatpush1.bf16.msra.mxu1 %v7240_v16  ;;  %v7327_v16 = vld [vmem:[#allocation14 + $0x780] ss:$8 sps:$4 sm:$0xff]  }
 0x1af   : > { %2385 = vmatpush1.bf16.msra.mxu0 %v7243_v17  ;;  %2263 = vmatprep.subr.bf16.mxu1 %v7248_v18  ;;  %v7332_v17 = vld [vmem:[#allocation14 + $0x794] ss:$8 sps:$4 sm:$0xff]   ;;  %v7330_v18 = vld [vmem:[#allocation14 + $0x790] ss:$8 sps:$4 sm:$0xff]  }
 0x1b0   : > { %2386 = vmatprep.subr.bf16.mxu0 %v7251_v19  ;;  %v7335_v19 = vld [vmem:[#allocation14 + $0x7a4] ss:$8 sps:$4 sm:$0xff]  }
 0x1b2   : > { %2264 = vmatpush1.bf16.msra.mxu1 %v7246_v21  ;;  %v7338_v21 = vld [vmem:[#allocation14 + $0x7b4] ss:$8 sps:$4 sm:$0xff]  }
 0x1b3   : > { %2387 = vmatpush1.bf16.msra.mxu0 %v7249_v24  ;;  %v7336_v24 = vld [vmem:[#allocation14 + $0x7b0] ss:$8 sps:$4 sm:$0xff]  }
 0x1b4   : > { %2397 = vmatprep.subr.bf16.mxu0 %v7256_v26  ;;  %v7339_v26 = vld [vmem:[#allocation14 + $0x7c0] ss:$8 sps:$4 sm:$0xff]  }
 0x1b5   : > { %2266 = vmatmul.mubr.bf16.vlgmr.msra.gmra.mrb[0].mxu1 %v591_v28  ;;  %v7342_v28 = vld [vmem:[#allocation14 + $0x7d0] ss:$8 sps:$4 sm:$0xff]  }
 0x1b6   : > { %2389 = vmatmul.mubr.bf16.vlgmr.msra.gmra.mrb[0].mxu0 %v597_v29  ;;  %v7347_v29 = vld [vmem:[#allocation14 + $0x7e4] ss:$8 sps:$4 sm:$0xff]  }
 0x1b7   : > { %2398 = vmatpush1.bf16.msra.mxu0 %v7254_v27  ;;  %2429 = vmatprep.mubr.bf16.mxu0 %v600_v31  ;;  %v7344_v27 = vld [vmem:[#allocation14 + $0x7d4] ss:$8 sps:$4 sm:$0xff]  }
 0x1b8   : > { %2399 = vmatprep.subr.bf16.mxu0 %v7259_v30  ;;  %v7345_v30 = vld [vmem:[#allocation14 + $0x7e0] ss:$8 sps:$4 sm:$0xff]   ;;  %v7350_v31 = vld [vmem:[#allocation14 + $0x7f4] ss:$8 sps:$4 sm:$0xff]  }
 0x1bb   : > { %2400 = vmatpush1.bf16.msra.mxu0 %v7257_v32  ;;  %v7348_v32 = vld [vmem:[#allocation14 + $0x7f0] ss:$8 sps:$4 sm:$0xff]  }
 0x1bc   : > { %2401 = vmatprep.subr.bf16.mxu0 %v7262_v33  ;;  %v601_v33 = vpack.c.bf16 %v8566_v58, %v8566_v58 }
 0x1bf   : > { %2402 = vmatpush1.bf16.msra.mxu0 %v7260_v34 }
 0x1c0   : > { %2403 = vmatprep.subr.bf16.mxu0 %v7265_v35 }
 0x1c3   : > { %2404 = vmatpush1.bf16.msra.mxu0 %v7263_v22 }
 0x1c4   : > { %2405 = vmatprep.subr.bf16.mxu0 %v7268_v23 }
 0x1c7   : > { %2406 = vmatpush1.bf16.msra.mxu0 %v7266_v36  ;;  %v7352_v36 = vld [vmem:[#allocation15] ss:$12 sps:$4 sm:$0xff]  }
 0x1c8   : > { %2407 = vmatprep.subr.bf16.mxu0 %v7271_v37  ;;  %v7354_v37 = vld [vmem:[#allocation15 + $0x4] ss:$12 sps:$4 sm:$0xff]  }
 0x1c9   : > { %2853 = vmatprep.subr.bf16.mxu1 %v7354_v37 }
 0x1ca   : > { %2854 = vmatpush1.bf16.msra.mxu1 %v7352_v36  ;;  %v2480_v36 = vld [vmem:[%s8936_s7 + $0x6] sm:$0x3] }
 0x1cb   : > { %2408 = vmatpush1.bf16.msra.mxu0 %v7269_v38  ;;  %v7357_v38 = vld [vmem:[#allocation15 + $0x1c] ss:$12 sps:$4 sm:$0xff]  }
 0x1cc   : > { %2409 = vmatprep.subr.bf16.mxu0 %v7274_v39  ;;  %v7355_v39 = vld [vmem:[#allocation15 + $0x18] ss:$12 sps:$4 sm:$0xff]   ;;  %2855 = vmatprep.subr.bf16.mxu1 %v7357_v38 }
 0x1ce   : > { %2856 = vmatpush1.bf16.msra.mxu1 %v7355_v39 }
 0x1cf   : > { %2410 = vmatpush1.bf16.msra.mxu0 %v7272_v40  ;;  %v7360_v40 = vld [vmem:[#allocation15 + $0x34] ss:$12 sps:$4 sm:$0xff]  }
 0x1d0   : > { %2411 = vmatprep.subr.bf16.mxu0 %v7277_v41  ;;  %v7358_v41 = vld [vmem:[#allocation15 + $0x30] ss:$12 sps:$4 sm:$0xff]   ;;  %2857 = vmatprep.subr.bf16.mxu1 %v7360_v40 }
 0x1d2   : > { %2858 = vmatpush1.bf16.msra.mxu1 %v7358_v41 }
 0x1d3   : > { %2412 = vmatpush1.bf16.msra.mxu0 %v7275_v42  ;;  %v7363_v42 = vld [vmem:[#allocation15 + $0x4c] ss:$12 sps:$4 sm:$0xff]  }
 0x1d4   : > { %2413 = vmatprep.subr.bf16.mxu0 %v7280_v43  ;;  %v7361_v43 = vld [vmem:[#allocation15 + $0x48] ss:$12 sps:$4 sm:$0xff]   ;;  %2859 = vmatprep.subr.bf16.mxu1 %v7363_v42 }
 0x1d6   : > { %2860 = vmatpush1.bf16.msra.mxu1 %v7361_v43 }
 0x1d7   : > { %2414 = vmatpush1.bf16.msra.mxu0 %v7278_v44  ;;  %v7366_v44 = vld [vmem:[#allocation15 + $0x64] ss:$12 sps:$4 sm:$0xff]  }
 0x1d8   : > { %2415 = vmatprep.subr.bf16.mxu0 %v7283_v45  ;;  %v7364_v45 = vld [vmem:[#allocation15 + $0x60] ss:$12 sps:$4 sm:$0xff]   ;;  %2861 = vmatprep.subr.bf16.mxu1 %v7366_v44 }
 0x1da   : > { %2862 = vmatpush1.bf16.msra.mxu1 %v7364_v45 }
 0x1db   : > { %2416 = vmatpush1.bf16.msra.mxu0 %v7281_v46  ;;  %v7369_v46 = vld [vmem:[#allocation15 + $0x7c] ss:$12 sps:$4 sm:$0xff]  }
 0x1dc   : > { %2417 = vmatprep.subr.bf16.mxu0 %v7286_v47  ;;  %v7367_v47 = vld [vmem:[#allocation15 + $0x78] ss:$12 sps:$4 sm:$0xff]   ;;  %2863 = vmatprep.subr.bf16.mxu1 %v7369_v46 }
 0x1de   : > { %2864 = vmatpush1.bf16.msra.mxu1 %v7367_v47 }
 0x1df   : > { %2418 = vmatpush1.bf16.msra.mxu0 %v7284_v48  ;;  %v7372_v48 = vld [vmem:[#allocation15 + $0x94] ss:$12 sps:$4 sm:$0xff]  }
 0x1e0   : > { %2419 = vmatprep.subr.bf16.mxu0 %v7289_v49  ;;  %v7370_v49 = vld [vmem:[#allocation15 + $0x90] ss:$12 sps:$4 sm:$0xff]   ;;  %2865 = vmatprep.subr.bf16.mxu1 %v7372_v48 }
 0x1e2   : > { %2866 = vmatpush1.bf16.msra.mxu1 %v7370_v49 }
 0x1e3   : > { %2420 = vmatpush1.bf16.msra.mxu0 %v7287_v50  ;;  %v7375_v50 = vld [vmem:[#allocation15 + $0xac] ss:$12 sps:$4 sm:$0xff]  }
 0x1e4   : > { %2421 = vmatprep.subr.bf16.mxu0 %v7292_v51  ;;  %v7373_v51 = vld [vmem:[#allocation15 + $0xa8] ss:$12 sps:$4 sm:$0xff]   ;;  %2867 = vmatprep.subr.bf16.mxu1 %v7375_v50 }
 0x1e6   : > { %2868 = vmatpush1.bf16.msra.mxu1 %v7373_v51 }
 0x1e7   : > { %2422 = vmatpush1.bf16.msra.mxu0 %v7290_v52  ;;  %v7378_v52 = vld [vmem:[#allocation15 + $0xc4] ss:$12 sps:$4 sm:$0xff]  }
 0x1e8   : > { %2423 = vmatprep.subr.bf16.mxu0 %v7295_v53  ;;  %v7376_v53 = vld [vmem:[#allocation15 + $0xc0] ss:$12 sps:$4 sm:$0xff]   ;;  %2869 = vmatprep.subr.bf16.mxu1 %v7378_v52  ;;  %v7401_v52 = vld [vmem:[#allocation15 + $0x8] ss:$12 sps:$4 sm:$0xff]  }
 0x1ea   : > { %2870 = vmatpush1.bf16.msra.mxu1 %v7376_v53  ;;  %v7402_v53 = vld [vmem:[#allocation15 + $0xe0] ss:$12 sps:$4 sm:$0xff]  }
 0x1eb   : > { %2424 = vmatpush1.bf16.msra.mxu0 %v7293_v54  ;;  %v861_v54 = vlaneseq }
 0x1ec   : > { %2425 = vmatprep.subr.bf16.mxu0 %v7298_v55 }
 0x1ed   : > { %v862_v55 = vshrl.u32 %v861_v54, 7  ;;  %v7403_v54 = vld [vmem:[#allocation15 + $0x20] ss:$12 sps:$4 sm:$0xff]  }
 0x1ef   : > { %2426 = vmatpush1.bf16.msra.mxu0 %v7296_v56  ;;  %v8574_v56 = vsub.s32 0, %v862_v55  ;;  %v8579_v58 = vsub.s32 1, %v862_v55  ;;  %v7404_v55 = vld [vmem:[#allocation15 + $0xf8] ss:$12 sps:$4 sm:$0xff]  }
 0x1f0   : > { %2427 = vmatprep.subr.bf16.mxu0 %v7301_v57  ;;  %v859_v57 = vld [vmem:[%s8936_s7 + $0x2] sm:$0x3] }
 0x1f1   : > { %v868_v60 = vrot.slane %v859_v57, %v8579_v58  ;;  %v2522_v43 = vrot.slane %v2480_v36, %v8574_v56  ;;  %v2526_v44 = vrot.slane %v2480_v36, %v8579_v58 }
 0x1f3   : > { %2428 = vmatpush1.bf16.msra.mxu0 %v7299_v59  ;;  %v864_v59 = vrot.slane %v859_v57, %v8574_v56  ;;  %v7406_v57 = vld [vmem:[#allocation15 + $0x110] ss:$12 sps:$4 sm:$0xff]  }
 0x1f4   : > { %2438 = vmatprep.subr.bf16.mxu0 %v7305_v61 }
 0x1f6   : > { %2430 = vmatmul.mubr.bf16.vlgmr.msra.gmra.mrb[0].mxu0 %v599_v62 }
 0x1f7   : > { %2439 = vmatpush1.bf16.msra.mxu0 %v7303_v63  ;;  %2470 = vmatprep.mubr.bf16.mxu0 %v602_v0 }
 0x1f8   : > { %2440 = vmatprep.subr.bf16.mxu0 %v7308_v1 }
 0x1fb   : > { %2441 = vmatpush1.bf16.msra.mxu0 %v7306_v2 }
 0x1fc   : > { %2442 = vmatprep.subr.bf16.mxu0 %v7311_v3 }
 0x1ff   : > { %2443 = vmatpush1.bf16.msra.mxu0 %v7309_v4 }
 0x200   : > { %2444 = vmatprep.subr.bf16.mxu0 %v7314_v5 }
 0x203   : > { %2445 = vmatpush1.bf16.msra.mxu0 %v7312_v6 }
 0x204   : > { %2446 = vmatprep.subr.bf16.mxu0 %v7317_v7 }
 0x207   : > { %2447 = vmatpush1.bf16.msra.mxu0 %v7315_v8 }
 0x208   : > { %2448 = vmatprep.subr.bf16.mxu0 %v7320_v9 }
 0x20b   : > { %2449 = vmatpush1.bf16.msra.mxu0 %v7318_v10 }
 0x20c   : > { %2450 = vmatprep.subr.bf16.mxu0 %v7323_v11 }
 0x20f   : > { %2451 = vmatpush1.bf16.msra.mxu0 %v7321_v12 }
 0x210   : > { %2452 = vmatprep.subr.bf16.mxu0 %v7326_v13  ;;  %v7381_v13 = vld [vmem:[#allocation15 + $0xdc] ss:$12 sps:$4 sm:$0xff]  }
 0x211   : > { %2871 = vmatprep.subr.bf16.mxu1 %v7381_v13 }
 0x213   : > { %2453 = vmatpush1.bf16.msra.mxu0 %v7324_v14  ;;  %v7379_v14 = vld [vmem:[#allocation15 + $0xd8] ss:$12 sps:$4 sm:$0xff]  }
 0x214   : > { %2454 = vmatprep.subr.bf16.mxu0 %v7329_v15  ;;  %2872 = vmatpush1.bf16.msra.mxu1 %v7379_v14  ;;  %v7384_v15 = vld [vmem:[#allocation15 + $0xf4] ss:$12 sps:$4 sm:$0xff]  }
 0x215   : > { %2873 = vmatprep.subr.bf16.mxu1 %v7384_v15 }
 0x217   : > { %2455 = vmatpush1.bf16.msra.mxu0 %v7327_v16  ;;  %v7382_v16 = vld [vmem:[#allocation15 + $0xf0] ss:$12 sps:$4 sm:$0xff]  }
 0x218   : > { %2456 = vmatprep.subr.bf16.mxu0 %v7332_v17  ;;  %2874 = vmatpush1.bf16.msra.mxu1 %v7382_v16  ;;  %v7387_v17 = vld [vmem:[#allocation15 + $0x10c] ss:$12 sps:$4 sm:$0xff]   ;;  %v3016_v16 = vstv %s3015_s14 }
 0x219   : > { %2875 = vmatprep.subr.bf16.mxu1 %v7387_v17  ;;  %vm8606_vm3 = vcmp.eq.s32.totalorder %v3016_v16, 1 }
 0x21b   : > { %2457 = vmatpush1.bf16.msra.mxu0 %v7330_v18  ;;  %v7385_v18 = vld [vmem:[#allocation15 + $0x108] ss:$12 sps:$4 sm:$0xff]  }
 0x21c   : > { %2458 = vmatprep.subr.bf16.mxu0 %v7335_v19  ;;  %2876 = vmatpush1.bf16.msra.mxu1 %v7385_v18  ;;  %v7388_v19 = vld [vmem:[#allocation15 + $0x120] ss:$12 sps:$4 sm:$0xff]  }
 0x21f   : > { %2459 = vmatpush1.bf16.msra.mxu0 %v7333_v20  ;;  %v7390_v20 = vld [vmem:[#allocation15 + $0x124] ss:$12 sps:$4 sm:$0xff]  }
 0x220   : > { %2460 = vmatprep.subr.bf16.mxu0 %v7338_v21  ;;  %v7393_v21 = vld [vmem:[#allocation15 + $0x13c] ss:$12 sps:$4 sm:$0xff]   ;;  %2877 = vmatprep.subr.bf16.mxu1 %v7390_v20 }
 0x221   : > { %2878 = vmatpush1.bf16.msra.mxu1 %v7388_v19 }
 0x222   : > { %2879 = vmatprep.subr.bf16.mxu1 %v7393_v21 }
 0x223   : > { %2461 = vmatpush1.bf16.msra.mxu0 %v7336_v24  ;;  %v7391_v24 = vld [vmem:[#allocation15 + $0x138] ss:$12 sps:$4 sm:$0xff]  }
 0x224   : > { %2462 = vmatprep.subr.bf16.mxu0 %v7341_v25  ;;  %v7396_v25 = vld [vmem:[#allocation15 + $0x154] ss:$12 sps:$4 sm:$0xff]  }
 0x225   : > { %2880 = vmatpush1.bf16.msra.mxu1 %v7391_v24 }
 0x226   : > { %2881 = vmatprep.subr.bf16.mxu1 %v7396_v25 }
 0x227   : > { %2463 = vmatpush1.bf16.msra.mxu0 %v7339_v26  ;;  %v7394_v26 = vld [vmem:[#allocation15 + $0x150] ss:$12 sps:$4 sm:$0xff]  }
 0x228   : > { %2464 = vmatprep.subr.bf16.mxu0 %v7344_v27  ;;  %v7399_v27 = vld [vmem:[#allocation15 + $0x16c] ss:$12 sps:$4 sm:$0xff]  }
 0x229   : > { %2882 = vmatpush1.bf16.msra.mxu1 %v7394_v26 }
 0x22a   : > { %2883 = vmatprep.subr.bf16.mxu1 %v7399_v27 }
 0x22b   : > { %2465 = vmatpush1.bf16.msra.mxu0 %v7342_v28  ;;  %v7397_v28 = vld [vmem:[#allocation15 + $0x168] ss:$12 sps:$4 sm:$0xff]  }
 0x22c   : > { %2466 = vmatprep.subr.bf16.mxu0 %v7347_v29  ;;  %v7400_v29 = vld [vmem:[#allocation15 + $0xc8] ss:$12 sps:$4 sm:$0xff]  }
 0x22d   : > { %2884 = vmatpush1.bf16.msra.mxu1 %v7397_v28 }
 0x22e   : > { %6608 = vmatprep.subr.bf16.mxu1 %v7400_v29 }
 0x22f   : > { %2467 = vmatpush1.bf16.msra.mxu0 %v7345_v30 }
 0x230   : > { %2468 = vmatprep.subr.bf16.mxu0 %v7350_v31 }
 0x233   : > { %2469 = vmatpush1.bf16.msra.mxu0 %v7348_v32 }
 0x236   : > { %2471 = vmatmul.mubr.bf16.vlgmr.msra.gmra.mrb[0].mxu0 %v601_v33 }
 0x288   : > { %v2267_v34 = vpop.f32.mrb[0].mxu1 }
 0x289   : > { %v2269_v35 = vpop.f32.mrb[1].mxu1  ;;  %v6753_v61 = vadd.f32 %v2267_v34, %v864_v59  ;;  %v7408_v59 = vld [vmem:[#allocation15 + $0x128] ss:$12 sps:$4 sm:$0xff]  }
 0x28a   : > { %v2271_v22 = vpop.f32.mrb[2].mxu1  ;;  %v6755_v62 = vadd.f32 %v2269_v35, %v868_v60  ;;  %v7409_v60 = vld [vmem:[#allocation15 + $0x68] ss:$12 sps:$4 sm:$0xff]  }
 0x28b   : > { %v2272_v23 = vpop.f32.mrb[3].mxu1 }
 0x28c   : > { %v2479_v23 = vld [vmem:[%s8936_s7 + $0x4] sm:$0x3] }
 0x28d   : > { %v2509_v39 = vrot.slane %v2479_v23, %v8574_v56  ;;  %v2513_v40 = vrot.slane %v2479_v23, %v8579_v58  ;;  %v7405_v56 = vld [vmem:[#allocation15 + $0x38] ss:$12 sps:$4 sm:$0xff]   ;;  %v7407_v58 = vld [vmem:[#allocation15 + $0x50] ss:$12 sps:$4 sm:$0xff]  }
 0x309   : > { %v2472_v63 = vpop.f32.mrb[0].mxu0 }
 0x30a   : > { %v8583_v0 = vadd.f32 %v6753_v61, %v2472_v63  ;;  %v2474_v1 = vpop.f32.mrb[1].mxu0  ;;  %v7410_v61 = vld [vmem:[#allocation15 + $0x140] ss:$12 sps:$4 sm:$0xff]   ;;  %v7412_v63 = vld [vmem:[#allocation15 + $0x158] ss:$12 sps:$4 sm:$0xff]  }
 0x30b   : > { %v6756_v2 = vadd.f32 %v6755_v62, %v2474_v1  ;;  %v2476_v3 = vpop.f32.mrb[2].mxu0  ;;  %v7411_v62 = vld [vmem:[#allocation15 + $0x80] ss:$12 sps:$4 sm:$0xff]   ;;  %v7414_v1 = vld [vmem:[#allocation15 + $0x170] ss:$12 sps:$4 sm:$0xff]  }
 0x30c   : > { %v2477_v4 = vpop.f32.mrb[3].mxu0  ;;  %v2482_v5 = vsel %vm2481_vm0, %v8583_v0, 0.0  ;;  %v2489_v6 = vmul.f32 %v8583_v0, %v8583_v0  ;;  %v8118_v3 = vmov 0.0  }
 0x30d   : > { %v2483_v7 = vsel %vm2481_vm0, %v6756_v2, 0.0  ;;  %v2490_v8 = vmul.f32 %v6756_v2, %v6756_v2  ;;  %3105 = vst [vmem:[#allocation8] sm:$0x1] %v8118_v3 }
 0x30e   : > { %v2484_v9 = vadd.f32 %v2483_v7, %v2482_v5  ;;  %v2491_v10 = vsel %vm2481_vm0, %v2489_v6, 0.0 }
 0x30f   : > { %v2492_v11 = vsel %vm2481_vm0, %v2490_v8, 0.0 }
 0x310   : > { %2485 = vadd.xlane.f32.xlu0 %v2484_v9  ;;  %v2493_v12 = vadd.f32 %v2492_v11, %v2491_v10 }
 0x314   : > { %2494 = vadd.xlane.f32.xlu0 %v2493_v12 }
 0x39d   : > { %v2486_v30 = vpop.xlane.xlu0 %2485 }
 0x39e   : > { %v2488_v31 = vmul.f32 0.00390625, %v2486_v30 }
 0x3a0   : > { %v2499_v33 = vmul.f32 %v2488_v31, %v2488_v31  ;;  %v2497_v37 = vsub.f32 %v8583_v0, %v2488_v31  ;;  %v2498_v38 = vsub.f32 %v6756_v2, %v2488_v31  ;;  %v7413_v0 = vld [vmem:[#allocation15 + $0x98] ss:$12 sps:$4 sm:$0xff]   ;;  %v7415_v2 = vld [vmem:[#allocation15 + $0xb0] ss:$12 sps:$4 sm:$0xff]  }
 0x3a1   : > { %v2495_v32 = vpop.xlane.xlu0 %2494 }
 0x3a2   : > { %v2496_v34 = vmul.f32 0.00390625, %v2495_v32 }
 0x3a4   : > { %v2500_v35 = vsub.f32 %v2496_v34, %v2499_v33 }
 0x3a6   : > { %v2501_v22 = vadd.f32 1e-05, %v2500_v35 }
 0x3a8   : > { %7416 = vrsqrt.f32 %v2501_v22 }
 0x3b2   : > { %v7417_v41 = vpop.eup %7416 }
 0x3b3   : > { %v2504_v42 = vmul.f32 %v7417_v41, %v2498_v38  ;;  %v2503_v45 = vmul.f32 %v7417_v41, %v2497_v37 }
 0x3b5   : > { %v2517_v46 = vmul.f32 %v2513_v40, %v2504_v42  ;;  %v2516_v47 = vmul.f32 %v2509_v39, %v2503_v45 }
 0x3b7   : > { %v2530_v48 = vadd.f32 %v2526_v44, %v2517_v46  ;;  %v2529_v49 = vadd.f32 %v2522_v43, %v2516_v47 }
 0x3b9   : > { %v2532_v50 = vpack.c.bf16 %v2530_v48, %v2530_v48  ;;  %v2531_v51 = vpack.c.bf16 %v2529_v49, %v2529_v49 }
 0x3bb   : > { %2885 = vmatprep.mubr.bf16.mxu1 %v2532_v50 }
 0x3bc   : > { %2886 = vmatmul.mubr.bf16.vlgmr.msra.gmra.mrb[4].mxu1 %v2531_v51 }
 0x3bd   : > { %6609 = vmatpush3.bf16.msra.mxu1 %v7401_v52  ;;  %2926 = vmatprep.mubr.bf16.mxu1 %v2532_v50 }
 0x3be   : > { %6610 = vmatprep.subr.bf16.mxu1 %v7402_v53 }
 0x3c1   : > { %6611 = vmatpush3.bf16.msra.mxu1 %v7403_v54 }
 0x3c2   : > { %6612 = vmatprep.subr.bf16.mxu1 %v7404_v55 }
 0x3c5   : > { %6613 = vmatpush3.bf16.msra.mxu1 %v7405_v56 }
 0x3c6   : > { %6614 = vmatprep.subr.bf16.mxu1 %v7406_v57 }
 0x3c9   : > { %6615 = vmatpush3.bf16.msra.mxu1 %v7407_v58 }
 0x3ca   : > { %6616 = vmatprep.subr.bf16.mxu1 %v7408_v59 }
 0x3cd   : > { %6617 = vmatpush3.bf16.msra.mxu1 %v7409_v60 }
 0x3ce   : > { %6618 = vmatprep.subr.bf16.mxu1 %v7410_v61 }
 0x3d1   : > { %6619 = vmatpush3.bf16.msra.mxu1 %v7411_v62 }
 0x3d2   : > { %6620 = vmatprep.subr.bf16.mxu1 %v7412_v63 }
 0x3d5   : > { %6621 = vmatpush3.bf16.msra.mxu1 %v7413_v0 }
 0x3d6   : > { %6622 = vmatprep.subr.bf16.mxu1 %v7414_v1 }
 0x3d9   : > { %6623 = vmatpush3.bf16.msra.mxu1 %v7415_v2 }
 0x3da   : > { %6712 = vmatprep.subr.mxu1 %v8118_v3 }
 0x3dc   : > { %2927 = vmatmul.mubr.bf16.vlgmr.msra.gmra.mrb[8].mxu1 %v2531_v51 }
 0x3dd   : > { %6714 = vmatprep.mubr.msk.f32.mxu1 %vm8119_vm1, %v8118_v3 }
 0x48f   : > { %v2887_v4 = vpop.f32.mrb[4].mxu1 }
 0x490   : > { %2934 = vst [vmem:[#allocation2] sm:$0x7] %v2887_v4  ;;  %v2889_v5 = vpop.f32.mrb[5].mxu1 }
 0x491   : > { %2935 = vst [vmem:[#allocation3] sm:$0x7] %v2889_v5  ;;  %v2891_v6 = vpop.f32.mrb[6].mxu1  ;;  %6713 = vmatpush3.xpose.msra.mxu1 %v2889_v5 }
 0x492   : > { %v2892_v7 = vpop.f32.mrb[7].mxu1  ;;  %6717 = vmatprep.subr.mxu1 %v8118_v3 }
 0x494   : > { %6715 = vmatmul.mubr.f32.vlgmr.msra.gmra.mrb[12].mxu1 %v2887_v4 }
 0x495   : > { %6719 = vmatprep.mubr.msk.f32.mxu1 %vm8119_vm1, %v8118_v3 }
 0x4af   : > { %v6624_v8 = vpop.f32.mrb[8].mxu1 }
 0x4b0   : > { %v6625_v9 = vpop.f32.mrb[9].mxu1 }
 0x4b1   : > { %v6626_v10 = vadd.f32 %v6625_v9, %v6624_v8  ;;  %v6627_v11 = vpop.f32.mrb[10].mxu1 }
 0x4b2   : > { %v6628_v12 = vpop.f32.mrb[11].mxu1 }
 0x4b3   : > { %2936 = vst [vmem:[#allocation4] sm:$0x7] %v6626_v10  ;;  %6718 = vmatpush3.msk.msra.mxu1 %vm2481_vm0, %v6626_v10 }
 0x567   : > { %v3003_v13 = vpop.f32.mrb[12].mxu1 }
 0x568   : > { %v6716_v14 = vpop.f32.mrb[13].mxu1  ;;  %v3008_v15 = vsel %vm3007_vm2, %v3003_v13, -inf }
 0x569   : > { %3009 = vmax.xlane.f32.xlu1 %v3008_v15 }
 0x5f6   : > { %v3010_v18 = vpop.xlane.xlu1 %3009 }
 0x5f7   : > { %v3011_v19 = vsub.f32 %v3003_v13, %v3010_v18  ;;  %v3018_v20 = vsel %vm8606_vm3, %v3010_v18, -inf }
 0x5f8   : > { %3020 = vst.msk [vmem:[#allocation5] sm:$0x7] %vm3019_vm4, %v3018_v20 }
 0x5f9   : > { %v3012_v21 = vmul.f32 1.442695, %v3011_v19 }
 0x5fb   : > { %7418 = vpow2.f32 %v3012_v21 }
 0x605   : > { %v7419_v24 = vpop.eup %7418 }
 0x606   : > { %6720 = vmatmul.mubr.msk.f32.vlgmr.msra.gmra.mrb[14].mxu1 %vm3026_vm5, %v7419_v24  ;;  %v3021_v25 = vsel %vm3007_vm2, %v7419_v24, 0.0 }
 0x607   : > { %3022 = vadd.xlane.f32.xlu1 %v3021_v25 }
 0x694   : > { %v3023_v26 = vpop.xlane.xlu1 %3022 }
 0x695   : > { %v3024_v27 = vsel %vm8606_vm3, %v3023_v26, 0.0 }
 0x696   : > { %3025 = vst.msk [vmem:[#allocation6] sm:$0x7] %vm3019_vm4, %v3024_v27 }
 0x6d9   : > { %v3099_v28 = vpop.f32.mrb[14].mxu1 }
 0x6da   : > { %v3103_v29 = vsel %vm8606_vm3, %v3099_v28, 0.0  ;;  %v6721_v30 = vpop.f32.mrb[15].mxu1 }
 0x6db   : > { %3104 = vst [vmem:[#allocation7] sm:$0x7] %v3103_v29 }
 0x6dc PF: > { %v7422_v31 = vld [vmem:[#allocation12 + $0x4] ss:$8 sps:$4 sm:$0xff]   ;;  %v7424_v32 = vld [vmem:[#allocation12] ss:$8 sps:$4 sm:$0xff]   ;;  %v7425_v33 = vld [vmem:[#allocation12 + $0x14] ss:$8 sps:$4 sm:$0xff]  }
 0x6dd   : > { %3910 = vmatprep.subr.bf16.mxu0 %v7422_v31  ;;  %v7427_v34 = vld [vmem:[#allocation12 + $0x10] ss:$8 sps:$4 sm:$0xff]   ;;  %v7428_v35 = vld [vmem:[#allocation12 + $0x24] ss:$8 sps:$4 sm:$0xff]   ;;  %v7430_v22 = vld [vmem:[#allocation12 + $0x20] ss:$8 sps:$4 sm:$0xff]  }
 0x6de   : > { %3911 = vmatpush1.bf16.msra.mxu0 %v7424_v32  ;;  %v7431_v23 = vld [vmem:[#allocation12 + $0x34] ss:$8 sps:$4 sm:$0xff]   ;;  %v7433_v36 = vld [vmem:[#allocation12 + $0x30] ss:$8 sps:$4 sm:$0xff]   ;;  %v7434_v37 = vld [vmem:[#allocation12 + $0x44] ss:$8 sps:$4 sm:$0xff]  }
 0x6df   : > { %3912 = vmatprep.subr.bf16.mxu0 %v7425_v33  ;;  %v7436_v38 = vld [vmem:[#allocation12 + $0x40] ss:$8 sps:$4 sm:$0xff]   ;;  %v7437_v39 = vld [vmem:[#allocation12 + $0x54] ss:$8 sps:$4 sm:$0xff]   ;;  %v7439_v40 = vld [vmem:[#allocation12 + $0x50] ss:$8 sps:$4 sm:$0xff]  }
 0x6e0   : > { %v7440_v41 = vld [vmem:[#allocation12 + $0x64] ss:$8 sps:$4 sm:$0xff]   ;;  %v7442_v45 = vld [vmem:[#allocation12 + $0x60] ss:$8 sps:$4 sm:$0xff]   ;;  %v7443_v46 = vld [vmem:[#allocation12 + $0x74] ss:$8 sps:$4 sm:$0xff]  }
 0x6e1   : > { %v3107_v42 = vld [vmem:[%s8474_s8 + $0x8] sm:$0xff]  ;;  %v7445_v47 = vld [vmem:[#allocation12 + $0x70] ss:$8 sps:$4 sm:$0xff]   ;;  %v7449_v50 = vld [vmem:[#allocation12 + $0x94] ss:$8 sps:$4 sm:$0xff]   ;;  %s8940_s17 = sld [smem:[#allocation41_spill]] }
 0x6e2   : > { %3913 = vmatpush1.bf16.msra.mxu0 %v7427_v34  ;;  %v3115_v43 = vld [vmem:[%s8474_s8 + $0x48] sm:$0xff]  ;;  %v7451_v51 = vld [vmem:[#allocation12 + $0x90] ss:$8 sps:$4 sm:$0xff]   ;;  %v7455_v54 = vld [vmem:[#allocation12 + $0xb4] ss:$8 sps:$4 sm:$0xff]   ;;  %vm4644_vm6 = vcmask 23552  }
 0x6e3   : > { %3914 = vmatprep.subr.bf16.mxu0 %v7428_v35  ;;  %v3123_v44 = vpack.c.bf16 %v3115_v43, %v3107_v42  ;;  %v7446_v48 = vld [vmem:[#allocation12 + $0x84] ss:$8 sps:$4 sm:$0xff]   ;;  %v7448_v49 = vld [vmem:[#allocation12 + $0x80] ss:$8 sps:$4 sm:$0xff]   ;;  %v7457_v55 = vld [vmem:[#allocation12 + $0xb0] ss:$8 sps:$4 sm:$0xff]  }
 0x6e4   : > { %v7452_v52 = vld [vmem:[#allocation12 + $0xa4] ss:$8 sps:$4 sm:$0xff]   ;;  %v7454_v53 = vld [vmem:[#allocation12 + $0xa0] ss:$8 sps:$4 sm:$0xff]   ;;  %v7461_v58 = vld [vmem:[#allocation12 + $0xd4] ss:$8 sps:$4 sm:$0xff]  }
 0x6e5   : > { %3942 = vmatprep.mubr.bf16.mxu0 %v3123_v44  ;;  %v7458_v56 = vld [vmem:[#allocation12 + $0xc4] ss:$8 sps:$4 sm:$0xff]   ;;  %v7460_v57 = vld [vmem:[#allocation12 + $0xc0] ss:$8 sps:$4 sm:$0xff]   ;;  %v7463_v59 = vld [vmem:[#allocation12 + $0xd0] ss:$8 sps:$4 sm:$0xff]  }
 0x6e6   : > { %3915 = vmatpush1.bf16.msra.mxu0 %v7430_v22  ;;  %v7464_v60 = vld [vmem:[#allocation12 + $0xe4] ss:$8 sps:$4 sm:$0xff]   ;;  %v7466_v61 = vld [vmem:[#allocation12 + $0xe0] ss:$8 sps:$4 sm:$0xff]   ;;  %v7467_v62 = vld [vmem:[#allocation12 + $0xf4] ss:$8 sps:$4 sm:$0xff]  }
 0x6e7   : > { %3916 = vmatprep.subr.bf16.mxu0 %v7431_v23  ;;  %v7469_v63 = vld [vmem:[#allocation12 + $0xf0] ss:$8 sps:$4 sm:$0xff]   ;;  %v7472_v0 = vld [vmem:[#allocation12 + $0x104] ss:$8 sps:$4 sm:$0xff]   ;;  %v7470_v6 = vld [vmem:[#allocation12 + $0x100] ss:$8 sps:$4 sm:$0xff]  }
 0x6e8   : > { %v3106_v1 = vld [vmem:[%s8474_s8] sm:$0xff]  ;;  %v3109_v3 = vld [vmem:[%s8474_s8 + $0x18] sm:$0xff]  ;;  %v3119_v42 = vld [vmem:[%s8474_s8 + $0x68] sm:$0xff]  ;;  %vm4674_vm7 = vcmask 1042432   ;;  %s8941_s2 = sld [smem:[#allocation30_spill]]  ;;  %s8942_s11 = sld [smem:[#allocation29_spill]] }
 0x6e9   : > { %v3114_v2 = vld [vmem:[%s8474_s8 + $0x40] sm:$0xff]  ;;  %v3117_v4 = vld [vmem:[%s8474_s8 + $0x58] sm:$0xff]  ;;  %vm8122_vm8 = vmmov 0   ;;  %vm5659_vm13 = vcmask 124928   ;;  %vm5681_vm14 = vcmask 2048   ;;  %vm5690_vm15 = vcmask 130048  }
 0x6ea   : > { %3917 = vmatpush1.bf16.msra.mxu0 %v7433_v36  ;;  %v3122_v5 = vpack.c.bf16 %v3114_v2, %v3106_v1  ;;  %v3125_v7 = vpack.c.bf16 %v3117_v4, %v3109_v3  ;;  %v7475_v8 = vld [vmem:[#allocation12 + $0x114] ss:$8 sps:$4 sm:$0xff]   ;;  %v7473_v9 = vld [vmem:[#allocation12 + $0x110] ss:$8 sps:$4 sm:$0xff]   ;;  %v7478_v10 = vld [vmem:[#allocation12 + $0x124] ss:$8 sps:$4 sm:$0xff]  }
 0x6eb   : > { %3918 = vmatprep.subr.bf16.mxu0 %v7434_v37  ;;  %v7476_v11 = vld [vmem:[#allocation12 + $0x120] ss:$8 sps:$4 sm:$0xff]   ;;  %v7481_v12 = vld [vmem:[#allocation12 + $0x134] ss:$8 sps:$4 sm:$0xff]   ;;  %v7479_v13 = vld [vmem:[#allocation12 + $0x130] ss:$8 sps:$4 sm:$0xff]  }
 0x6ec   : > { %v7484_v14 = vld [vmem:[#allocation12 + $0x144] ss:$8 sps:$4 sm:$0xff]   ;;  %v7482_v15 = vld [vmem:[#allocation12 + $0x140] ss:$8 sps:$4 sm:$0xff]   ;;  %v7487_v16 = vld [vmem:[#allocation12 + $0x154] ss:$8 sps:$4 sm:$0xff]  }
 0x6ed   : > { %v7485_v17 = vld [vmem:[#allocation12 + $0x150] ss:$8 sps:$4 sm:$0xff]   ;;  %v7490_v18 = vld [vmem:[#allocation12 + $0x164] ss:$8 sps:$4 sm:$0xff]   ;;  %v7488_v19 = vld [vmem:[#allocation12 + $0x160] ss:$8 sps:$4 sm:$0xff]  }
 0x6ee   : > { %3919 = vmatpush1.bf16.msra.mxu0 %v7436_v38  ;;  %v7493_v20 = vld [vmem:[#allocation12 + $0x174] ss:$8 sps:$4 sm:$0xff]   ;;  %v7491_v21 = vld [vmem:[#allocation12 + $0x170] ss:$8 sps:$4 sm:$0xff]   ;;  %v7496_v24 = vld [vmem:[#allocation12 + $0x184] ss:$8 sps:$4 sm:$0xff]  }
 0x6ef   : > { %3920 = vmatprep.subr.bf16.mxu0 %v7437_v39  ;;  %v7494_v25 = vld [vmem:[#allocation12 + $0x180] ss:$8 sps:$4 sm:$0xff]   ;;  %v7499_v26 = vld [vmem:[#allocation12 + $0x194] ss:$8 sps:$4 sm:$0xff]   ;;  %v7497_v27 = vld [vmem:[#allocation12 + $0x190] ss:$8 sps:$4 sm:$0xff]  }
 0x6f0   : > { %v7502_v28 = vld [vmem:[#allocation12 + $0x1a4] ss:$8 sps:$4 sm:$0xff]   ;;  %v7500_v29 = vld [vmem:[#allocation12 + $0x1a0] ss:$8 sps:$4 sm:$0xff]   ;;  %v7505_v30 = vld [vmem:[#allocation12 + $0x1b4] ss:$8 sps:$4 sm:$0xff]  }
 0x6f1   : > { %v7503_v31 = vld [vmem:[#allocation12 + $0x1b0] ss:$8 sps:$4 sm:$0xff]   ;;  %v7508_v32 = vld [vmem:[#allocation12 + $0x1c4] ss:$8 sps:$4 sm:$0xff]   ;;  %v7506_v33 = vld [vmem:[#allocation12 + $0x1c0] ss:$8 sps:$4 sm:$0xff]  }
 0x6f2   : > { %3921 = vmatpush1.bf16.msra.mxu0 %v7439_v40  ;;  %v7511_v34 = vld [vmem:[#allocation12 + $0x1d4] ss:$8 sps:$4 sm:$0xff]   ;;  %v7509_v35 = vld [vmem:[#allocation12 + $0x1d0] ss:$8 sps:$4 sm:$0xff]   ;;  %v7514_v22 = vld [vmem:[#allocation12 + $0x1e4] ss:$8 sps:$4 sm:$0xff]  }
 0x6f3   : > { %3922 = vmatprep.subr.bf16.mxu0 %v7440_v41  ;;  %v7512_v23 = vld [vmem:[#allocation12 + $0x1e0] ss:$8 sps:$4 sm:$0xff]   ;;  %v7517_v36 = vld [vmem:[#allocation12 + $0x1f4] ss:$8 sps:$4 sm:$0xff]   ;;  %v7515_v37 = vld [vmem:[#allocation12 + $0x1f0] ss:$8 sps:$4 sm:$0xff]  }
 0x6f4   : > { %v3108_v38 = vld [vmem:[%s8474_s8 + $0x10] sm:$0xff]  ;;  %v7520_v40 = vld [vmem:[#allocation12 + $0x204] ss:$8 sps:$4 sm:$0xff]   ;;  %v7518_v44 = vld [vmem:[#allocation12 + $0x200] ss:$8 sps:$4 sm:$0xff]   ;;  %s6524_s14 = sshll.u32 %s8941_s2, 1 }
 0x6f5   : > { %v3116_v39 = vld [vmem:[%s8474_s8 + $0x50] sm:$0xff]  ;;  %v3111_v41 = vld [vmem:[%s8474_s8 + $0x28] sm:$0xff]  ;;  %p6601_p6 = scmp.ne.s32.totalorder %s8942_s11, 1 }
 0x6f6   : > { %3923 = vmatpush1.bf16.msra.mxu0 %v7442_v45  ;;  %v3124_v43 = vpack.c.bf16 %v3116_v39, %v3108_v38  ;;  %v7523_v45 = vld [vmem:[#allocation12 + $0x214] ss:$8 sps:$4 sm:$0xff]   ;;  %v7548_v1 = vld [vmem:[#allocation12 + $0x2a0] ss:$8 sps:$4 sm:$0xff]   ;;  %v7551_v3 = vld [vmem:[#allocation12 + $0x2b0] ss:$8 sps:$4 sm:$0xff]  }
 0x6f7   : > { %3924 = vmatprep.subr.bf16.mxu0 %v7443_v46  ;;  %v3127_v46 = vpack.c.bf16 %v3119_v42, %v3111_v41  ;;  %v7553_v2 = vld [vmem:[#allocation12 + $0x2b4] ss:$8 sps:$4 sm:$0xff]   ;;  %v7556_v4 = vld [vmem:[#allocation12 + $0x2c4] ss:$8 sps:$4 sm:$0xff]   ;;  %v7596_v39 = vld [vmem:[#allocation12 + $0x3a0] ss:$8 sps:$4 sm:$0xff]  }
 0x6f8   : > { %v7598_v38 = vld [vmem:[#allocation12 + $0x3a4] ss:$8 sps:$4 sm:$0xff]   ;;  %v7599_v41 = vld [vmem:[#allocation12 + $0x3b0] ss:$8 sps:$4 sm:$0xff]  }
 0x6f9   : > { %v7604_v42 = vld [vmem:[#allocation12 + $0x3c4] ss:$8 sps:$4 sm:$0xff]  }
 0x6fa   : > { %3925 = vmatpush1.bf16.msra.mxu0 %v7445_v47  ;;  %v7521_v47 = vld [vmem:[#allocation12 + $0x210] ss:$8 sps:$4 sm:$0xff]  }
 0x6fb   : > { %3926 = vmatprep.subr.bf16.mxu0 %v7446_v48  ;;  %v7526_v48 = vld [vmem:[#allocation12 + $0x224] ss:$8 sps:$4 sm:$0xff]  }
 0x6fe   : > { %3927 = vmatpush1.bf16.msra.mxu0 %v7448_v49  ;;  %v7524_v49 = vld [vmem:[#allocation12 + $0x220] ss:$8 sps:$4 sm:$0xff]  }
 0x6ff   : > { %3928 = vmatprep.subr.bf16.mxu0 %v7449_v50  ;;  %v7529_v50 = vld [vmem:[#allocation12 + $0x234] ss:$8 sps:$4 sm:$0xff]  }
 0x702   : > { %3929 = vmatpush1.bf16.msra.mxu0 %v7451_v51  ;;  %v7527_v51 = vld [vmem:[#allocation12 + $0x230] ss:$8 sps:$4 sm:$0xff]  }
 0x703   : > { %3930 = vmatprep.subr.bf16.mxu0 %v7452_v52  ;;  %v7532_v52 = vld [vmem:[#allocation12 + $0x244] ss:$8 sps:$4 sm:$0xff]  }
 0x706   : > { %3931 = vmatpush1.bf16.msra.mxu0 %v7454_v53  ;;  %v7530_v53 = vld [vmem:[#allocation12 + $0x240] ss:$8 sps:$4 sm:$0xff]  }
 0x707   : > { %3932 = vmatprep.subr.bf16.mxu0 %v7455_v54  ;;  %v7535_v54 = vld [vmem:[#allocation12 + $0x254] ss:$8 sps:$4 sm:$0xff]  }
 0x70a   : > { %3933 = vmatpush1.bf16.msra.mxu0 %v7457_v55  ;;  %v7533_v55 = vld [vmem:[#allocation12 + $0x250] ss:$8 sps:$4 sm:$0xff]  }
 0x70b   : > { %3934 = vmatprep.subr.bf16.mxu0 %v7458_v56  ;;  %v7538_v56 = vld [vmem:[#allocation12 + $0x264] ss:$8 sps:$4 sm:$0xff]  }
 0x70e   : > { %3935 = vmatpush1.bf16.msra.mxu0 %v7460_v57  ;;  %v7536_v57 = vld [vmem:[#allocation12 + $0x260] ss:$8 sps:$4 sm:$0xff]  }
 0x70f   : > { %3936 = vmatprep.subr.bf16.mxu0 %v7461_v58  ;;  %v7541_v58 = vld [vmem:[#allocation12 + $0x274] ss:$8 sps:$4 sm:$0xff]  }
 0x712   : > { %3937 = vmatpush1.bf16.msra.mxu0 %v7463_v59  ;;  %v7539_v59 = vld [vmem:[#allocation12 + $0x270] ss:$8 sps:$4 sm:$0xff]  }
 0x713   : > { %3938 = vmatprep.subr.bf16.mxu0 %v7464_v60  ;;  %v7544_v60 = vld [vmem:[#allocation12 + $0x284] ss:$8 sps:$4 sm:$0xff]  }
 0x716   : > { %3939 = vmatpush1.bf16.msra.mxu0 %v7466_v61  ;;  %v7542_v61 = vld [vmem:[#allocation12 + $0x280] ss:$8 sps:$4 sm:$0xff]  }
 0x717   : > { %3940 = vmatprep.subr.bf16.mxu0 %v7467_v62  ;;  %v7547_v62 = vld [vmem:[#allocation12 + $0x294] ss:$8 sps:$4 sm:$0xff]  }
 0x71a   : > { %3941 = vmatpush1.bf16.msra.mxu0 %v7469_v63  ;;  %v7545_v63 = vld [vmem:[#allocation12 + $0x290] ss:$8 sps:$4 sm:$0xff]  }
 0x71b   : > { %3953 = vmatprep.subr.bf16.mxu0 %v7472_v0  ;;  %v7550_v0 = vld [vmem:[#allocation12 + $0x2a4] ss:$8 sps:$4 sm:$0xff]  }
 0x71d   : > { %3943 = vmatmul.mubr.bf16.vlgmr.msra.gmra.mrb[0].mxu0 %v3122_v5  ;;  %v7554_v5 = vld [vmem:[#allocation12 + $0x2c0] ss:$8 sps:$4 sm:$0xff]  }
 0x71e   : > { %3954 = vmatpush1.bf16.msra.mxu0 %v7470_v6  ;;  %3985 = vmatprep.mubr.bf16.mxu0 %v3125_v7  ;;  %v7559_v6 = vld [vmem:[#allocation12 + $0x2d4] ss:$8 sps:$4 sm:$0xff]   ;;  %v7557_v7 = vld [vmem:[#allocation12 + $0x2d0] ss:$8 sps:$4 sm:$0xff]  }
 0x71f   : > { %3955 = vmatprep.subr.bf16.mxu0 %v7475_v8  ;;  %v7562_v8 = vld [vmem:[#allocation12 + $0x2e4] ss:$8 sps:$4 sm:$0xff]  }
 0x722   : > { %3956 = vmatpush1.bf16.msra.mxu0 %v7473_v9  ;;  %v7560_v9 = vld [vmem:[#allocation12 + $0x2e0] ss:$8 sps:$4 sm:$0xff]  }
 0x723   : > { %3957 = vmatprep.subr.bf16.mxu0 %v7478_v10  ;;  %v7565_v10 = vld [vmem:[#allocation12 + $0x2f4] ss:$8 sps:$4 sm:$0xff]  }
 0x726   : > { %3958 = vmatpush1.bf16.msra.mxu0 %v7476_v11  ;;  %v7563_v11 = vld [vmem:[#allocation12 + $0x2f0] ss:$8 sps:$4 sm:$0xff]  }
 0x727   : > { %3959 = vmatprep.subr.bf16.mxu0 %v7481_v12  ;;  %v3110_v12 = vld [vmem:[%s8474_s8 + $0x20] sm:$0xff] }
 0x72a   : > { %3960 = vmatpush1.bf16.msra.mxu0 %v7479_v13  ;;  %v3118_v13 = vld [vmem:[%s8474_s8 + $0x60] sm:$0xff] }
 0x72b   : > { %3961 = vmatprep.subr.bf16.mxu0 %v7484_v14  ;;  %v7568_v14 = vld [vmem:[#allocation12 + $0x304] ss:$8 sps:$4 sm:$0xff]  }
 0x72e   : > { %3962 = vmatpush1.bf16.msra.mxu0 %v7482_v15  ;;  %v3113_v15 = vld [vmem:[%s8474_s8 + $0x38] sm:$0xff] }
 0x72f   : > { %3963 = vmatprep.subr.bf16.mxu0 %v7487_v16  ;;  %v3121_v16 = vld [vmem:[%s8474_s8 + $0x78] sm:$0xff] }
 0x732   : > { %3964 = vmatpush1.bf16.msra.mxu0 %v7485_v17  ;;  %v3126_v17 = vpack.c.bf16 %v3118_v13, %v3110_v12 }
 0x733   : > { %3965 = vmatprep.subr.bf16.mxu0 %v7490_v18  ;;  %v7566_v18 = vld [vmem:[#allocation12 + $0x300] ss:$8 sps:$4 sm:$0xff]  }
 0x736   : > { %3966 = vmatpush1.bf16.msra.mxu0 %v7488_v19  ;;  %v3129_v19 = vpack.c.bf16 %v3121_v16, %v3113_v15 }
 0x737   : > { %3967 = vmatprep.subr.bf16.mxu0 %v7493_v20  ;;  %v7571_v20 = vld [vmem:[#allocation12 + $0x314] ss:$8 sps:$4 sm:$0xff]  }
 0x73a   : > { %3968 = vmatpush1.bf16.msra.mxu0 %v7491_v21  ;;  %v7569_v21 = vld [vmem:[#allocation12 + $0x310] ss:$8 sps:$4 sm:$0xff]  }
 0x73b   : > { %3969 = vmatprep.subr.bf16.mxu0 %v7496_v24  ;;  %v7574_v24 = vld [vmem:[#allocation12 + $0x324] ss:$8 sps:$4 sm:$0xff]  }
 0x73e   : > { %3970 = vmatpush1.bf16.msra.mxu0 %v7494_v25  ;;  %v7572_v25 = vld [vmem:[#allocation12 + $0x320] ss:$8 sps:$4 sm:$0xff]  }
 0x73f   : > { %3971 = vmatprep.subr.bf16.mxu0 %v7499_v26  ;;  %v7577_v26 = vld [vmem:[#allocation12 + $0x334] ss:$8 sps:$4 sm:$0xff]  }
 0x742   : > { %3972 = vmatpush1.bf16.msra.mxu0 %v7497_v27  ;;  %v7575_v27 = vld [vmem:[#allocation12 + $0x330] ss:$8 sps:$4 sm:$0xff]  }
 0x743   : > { %3973 = vmatprep.subr.bf16.mxu0 %v7502_v28  ;;  %v7580_v28 = vld [vmem:[#allocation12 + $0x344] ss:$8 sps:$4 sm:$0xff]  }
 0x746   : > { %3974 = vmatpush1.bf16.msra.mxu0 %v7500_v29  ;;  %v7578_v29 = vld [vmem:[#allocation12 + $0x340] ss:$8 sps:$4 sm:$0xff]  }
 0x747   : > { %3975 = vmatprep.subr.bf16.mxu0 %v7505_v30  ;;  %v7583_v30 = vld [vmem:[#allocation12 + $0x354] ss:$8 sps:$4 sm:$0xff]  }
 0x74a   : > { %3976 = vmatpush1.bf16.msra.mxu0 %v7503_v31  ;;  %v7581_v31 = vld [vmem:[#allocation12 + $0x350] ss:$8 sps:$4 sm:$0xff]  }
 0x74b   : > { %3977 = vmatprep.subr.bf16.mxu0 %v7508_v32  ;;  %v7586_v32 = vld [vmem:[#allocation12 + $0x364] ss:$8 sps:$4 sm:$0xff]  }
 0x74e   : > { %3978 = vmatpush1.bf16.msra.mxu0 %v7506_v33  ;;  %v7584_v33 = vld [vmem:[#allocation12 + $0x360] ss:$8 sps:$4 sm:$0xff]  }
 0x74f   : > { %3979 = vmatprep.subr.bf16.mxu0 %v7511_v34  ;;  %v7589_v34 = vld [vmem:[#allocation12 + $0x374] ss:$8 sps:$4 sm:$0xff]  }
 0x752   : > { %3980 = vmatpush1.bf16.msra.mxu0 %v7509_v35  ;;  %v7587_v35 = vld [vmem:[#allocation12 + $0x370] ss:$8 sps:$4 sm:$0xff]  }
 0x753   : > { %3981 = vmatprep.subr.bf16.mxu0 %v7514_v22  ;;  %v7592_v22 = vld [vmem:[#allocation12 + $0x384] ss:$8 sps:$4 sm:$0xff]  }
 0x756   : > { %3982 = vmatpush1.bf16.msra.mxu0 %v7512_v23  ;;  %v7590_v23 = vld [vmem:[#allocation12 + $0x380] ss:$8 sps:$4 sm:$0xff]  }
 0x757   : > { %3983 = vmatprep.subr.bf16.mxu0 %v7517_v36  ;;  %v7595_v36 = vld [vmem:[#allocation12 + $0x394] ss:$8 sps:$4 sm:$0xff]  }
 0x75a   : > { %3984 = vmatpush1.bf16.msra.mxu0 %v7515_v37  ;;  %v7593_v37 = vld [vmem:[#allocation12 + $0x390] ss:$8 sps:$4 sm:$0xff]  }
 0x75b   : > { %3996 = vmatprep.subr.bf16.mxu0 %v7520_v40  ;;  %v7601_v40 = vld [vmem:[#allocation12 + $0x3b4] ss:$8 sps:$4 sm:$0xff]  }
 0x75d   : > { %3986 = vmatmul.mubr.bf16.vlgmr.msra.gmra.mrb[0].mxu0 %v3124_v43  ;;  %v7602_v43 = vld [vmem:[#allocation12 + $0x3c0] ss:$8 sps:$4 sm:$0xff]  }
 0x75e   : > { %3997 = vmatpush1.bf16.msra.mxu0 %v7518_v44  ;;  %4028 = vmatprep.mubr.bf16.mxu0 %v3127_v46  ;;  %v7607_v44 = vld [vmem:[#allocation12 + $0x3d4] ss:$8 sps:$4 sm:$0xff]   ;;  %v7610_v46 = vld [vmem:[#allocation12 + $0x3e4] ss:$8 sps:$4 sm:$0xff]  }
 0x75f   : > { %3998 = vmatprep.subr.bf16.mxu0 %v7523_v45  ;;  %v7605_v45 = vld [vmem:[#allocation12 + $0x3d0] ss:$8 sps:$4 sm:$0xff]  }
 0x762   : > { %3999 = vmatpush1.bf16.msra.mxu0 %v7521_v47  ;;  %v7608_v47 = vld [vmem:[#allocation12 + $0x3e0] ss:$8 sps:$4 sm:$0xff]  }
 0x763   : > { %4000 = vmatprep.subr.bf16.mxu0 %v7526_v48  ;;  %v7613_v48 = vld [vmem:[#allocation12 + $0x3f4] ss:$8 sps:$4 sm:$0xff]  }
 0x766   : > { %4001 = vmatpush1.bf16.msra.mxu0 %v7524_v49  ;;  %v7611_v49 = vld [vmem:[#allocation12 + $0x3f0] ss:$8 sps:$4 sm:$0xff]  }
 0x767   : > { %4002 = vmatprep.subr.bf16.mxu0 %v7529_v50  ;;  %v3112_v50 = vld [vmem:[%s8474_s8 + $0x30] sm:$0xff] }
 0x76a   : > { %4003 = vmatpush1.bf16.msra.mxu0 %v7527_v51  ;;  %v3120_v51 = vld [vmem:[%s8474_s8 + $0x70] sm:$0xff]  ;;  %s4558_s8 = sadd.s32 %s8942_s11, %s6524_s14 }
 0x76b   : > { %4004 = vmatprep.subr.bf16.mxu0 %v7532_v52  ;;  %v3128_v52 = vpack.c.bf16 %v3120_v51, %v3112_v50  ;;  %s6525_s29 = sshll.u32 %s4558_s8, 4 }
 0x76e   : > { %4005 = vmatpush1.bf16.msra.mxu0 %v7530_v53  ;;  %v7614_v53 = vld [vmem:[#allocation15 + $0x4] ss:$12 sps:$4 sm:$0xff]  }
 0x76f   : > { %4006 = vmatprep.subr.bf16.mxu0 %v7535_v54  ;;  %v7616_v54 = vld [vmem:[#allocation15] ss:$12 sps:$4 sm:$0xff]   ;;  %4473 = vmatprep.subr.bf16.mxu1 %v7614_v53 }
 0x770   : > { %4474 = vmatpush1.bf16.msra.mxu1 %v7616_v54 }
 0x772   : > { %4007 = vmatpush1.bf16.msra.mxu0 %v7533_v55  ;;  %v7617_v55 = vld [vmem:[#allocation15 + $0x1c] ss:$12 sps:$4 sm:$0xff]  }
 0x773   : > { %4008 = vmatprep.subr.bf16.mxu0 %v7538_v56  ;;  %v7619_v56 = vld [vmem:[#allocation15 + $0x18] ss:$12 sps:$4 sm:$0xff]   ;;  %4475 = vmatprep.subr.bf16.mxu1 %v7617_v55 }
 0x774   : > { %4476 = vmatpush1.bf16.msra.mxu1 %v7619_v56 }
 0x776   : > { %4009 = vmatpush1.bf16.msra.mxu0 %v7536_v57  ;;  %v7620_v57 = vld [vmem:[#allocation15 + $0x34] ss:$12 sps:$4 sm:$0xff]  }
 0x777   : > { %4010 = vmatprep.subr.bf16.mxu0 %v7541_v58  ;;  %v7622_v58 = vld [vmem:[#allocation15 + $0x30] ss:$12 sps:$4 sm:$0xff]   ;;  %4477 = vmatprep.subr.bf16.mxu1 %v7620_v57 }
 0x778   : > { %4478 = vmatpush1.bf16.msra.mxu1 %v7622_v58 }
 0x77a   : > { %4011 = vmatpush1.bf16.msra.mxu0 %v7539_v59  ;;  %v7623_v59 = vld [vmem:[#allocation15 + $0x4c] ss:$12 sps:$4 sm:$0xff]  }
 0x77b   : > { %4012 = vmatprep.subr.bf16.mxu0 %v7544_v60  ;;  %v7625_v60 = vld [vmem:[#allocation15 + $0x48] ss:$12 sps:$4 sm:$0xff]   ;;  %4479 = vmatprep.subr.bf16.mxu1 %v7623_v59 }
 0x77c   : > { %4480 = vmatpush1.bf16.msra.mxu1 %v7625_v60  ;;  %v4082_v59 = vld [vmem:[%s8940_s17 + $0x4] sm:$0x3] }
 0x77e   : > { %4013 = vmatpush1.bf16.msra.mxu0 %v7542_v61  ;;  %v7626_v61 = vld [vmem:[#allocation15 + $0x64] ss:$12 sps:$4 sm:$0xff]  }
 0x77f   : > { %4014 = vmatprep.subr.bf16.mxu0 %v7547_v62  ;;  %v7628_v62 = vld [vmem:[#allocation15 + $0x60] ss:$12 sps:$4 sm:$0xff]   ;;  %4481 = vmatprep.subr.bf16.mxu1 %v7626_v61 }
 0x780   : > { %4482 = vmatpush1.bf16.msra.mxu1 %v7628_v62 }
 0x782   : > { %4015 = vmatpush1.bf16.msra.mxu0 %v7545_v63  ;;  %v7629_v63 = vld [vmem:[#allocation15 + $0x7c] ss:$12 sps:$4 sm:$0xff]  }
 0x783   : > { %4016 = vmatprep.subr.bf16.mxu0 %v7550_v0  ;;  %v7631_v0 = vld [vmem:[#allocation15 + $0x78] ss:$12 sps:$4 sm:$0xff]   ;;  %4483 = vmatprep.subr.bf16.mxu1 %v7629_v63  ;;  %v4083_v63 = vld [vmem:[%s8940_s17 + $0x6] sm:$0x3] }
 0x784   : > { %4484 = vmatpush1.bf16.msra.mxu1 %v7631_v0 }
 0x786   : > { %4017 = vmatpush1.bf16.msra.mxu0 %v7548_v1  ;;  %v7632_v1 = vld [vmem:[#allocation15 + $0x94] ss:$12 sps:$4 sm:$0xff]  }
 0x787   : > { %4018 = vmatprep.subr.bf16.mxu0 %v7553_v2  ;;  %v7634_v2 = vld [vmem:[#allocation15 + $0x90] ss:$12 sps:$4 sm:$0xff]   ;;  %4485 = vmatprep.subr.bf16.mxu1 %v7632_v1 }
 0x788   : > { %4486 = vmatpush1.bf16.msra.mxu1 %v7634_v2 }
 0x78a   : > { %4019 = vmatpush1.bf16.msra.mxu0 %v7551_v3  ;;  %v7635_v3 = vld [vmem:[#allocation15 + $0xac] ss:$12 sps:$4 sm:$0xff]  }
 0x78b   : > { %4020 = vmatprep.subr.bf16.mxu0 %v7556_v4  ;;  %v7637_v4 = vld [vmem:[#allocation15 + $0xa8] ss:$12 sps:$4 sm:$0xff]   ;;  %4487 = vmatprep.subr.bf16.mxu1 %v7635_v3 }
 0x78c   : > { %4488 = vmatpush1.bf16.msra.mxu1 %v7637_v4 }
 0x78e   : > { %4021 = vmatpush1.bf16.msra.mxu0 %v7554_v5  ;;  %v7638_v5 = vld [vmem:[#allocation15 + $0xc4] ss:$12 sps:$4 sm:$0xff]  }
 0x78f   : > { %4022 = vmatprep.subr.bf16.mxu0 %v7559_v6  ;;  %4489 = vmatprep.subr.bf16.mxu1 %v7638_v5  ;;  %v3260_v6 = vlaneseq }
 0x792   : > { %4023 = vmatpush1.bf16.msra.mxu0 %v7557_v7  ;;  %v8634_v7 = vshrl.u32 %v3260_v6, 7 }
 0x793   : > { %4024 = vmatprep.subr.bf16.mxu0 %v7562_v8 }
 0x794   : > { %v8637_v8 = vsub.s32 0, %v8634_v7 }
 0x796   : > { %4025 = vmatpush1.bf16.msra.mxu0 %v7560_v9  ;;  %v3258_v9 = vld [vmem:[%s8940_s17] sm:$0x3]  ;;  %v4125_v1 = vrot.slane %v4082_v59, %v8637_v8 }
 0x797   : > { %4026 = vmatprep.subr.bf16.mxu0 %v7565_v10  ;;  %v8643_v10 = vsub.s32 1, %v8634_v7 }
 0x799   : > { %v3267_v12 = vrot.slane %v3258_v9, %v8643_v10  ;;  %v4129_v2 = vrot.slane %v4082_v59, %v8643_v10 }
 0x79a   : > { %4027 = vmatpush1.bf16.msra.mxu0 %v7563_v11  ;;  %v3263_v11 = vrot.slane %v3258_v9, %v8637_v8 }
 0x79b   : > { %4039 = vmatprep.subr.bf16.mxu0 %v7568_v14 }
 0x79d   : > { %4029 = vmatmul.mubr.bf16.vlgmr.msra.gmra.mrb[0].mxu0 %v3126_v17 }
 0x79e   : > { %4040 = vmatpush1.bf16.msra.mxu0 %v7566_v18  ;;  %4071 = vmatprep.mubr.bf16.mxu0 %v3129_v19 }
 0x79f   : > { %4041 = vmatprep.subr.bf16.mxu0 %v7571_v20 }
 0x7a2   : > { %4042 = vmatpush1.bf16.msra.mxu0 %v7569_v21 }
 0x7a3   : > { %4043 = vmatprep.subr.bf16.mxu0 %v7574_v24 }
 0x7a6   : > { %4044 = vmatpush1.bf16.msra.mxu0 %v7572_v25 }
 0x7a7   : > { %4045 = vmatprep.subr.bf16.mxu0 %v7577_v26 }
 0x7aa   : > { %4046 = vmatpush1.bf16.msra.mxu0 %v7575_v27 }
 0x7ab   : > { %4047 = vmatprep.subr.bf16.mxu0 %v7580_v28 }
 0x7ae   : > { %4048 = vmatpush1.bf16.msra.mxu0 %v7578_v29 }
 0x7af   : > { %4049 = vmatprep.subr.bf16.mxu0 %v7583_v30 }
 0x7b2   : > { %4050 = vmatpush1.bf16.msra.mxu0 %v7581_v31  ;;  %v7640_v31 = vld [vmem:[#allocation15 + $0xc0] ss:$12 sps:$4 sm:$0xff]  }
 0x7b3   : > { %4051 = vmatprep.subr.bf16.mxu0 %v7586_v32  ;;  %4490 = vmatpush1.bf16.msra.mxu1 %v7640_v31  ;;  %v7641_v32 = vld [vmem:[#allocation15 + $0xdc] ss:$12 sps:$4 sm:$0xff]   ;;  %v7667_v31 = vld [vmem:[#allocation15 + $0x38] ss:$12 sps:$4 sm:$0xff]  }
 0x7b4   : > { %4491 = vmatprep.subr.bf16.mxu1 %v7641_v32  ;;  %v7668_v32 = vld [vmem:[#allocation15 + $0x110] ss:$12 sps:$4 sm:$0xff]  }
 0x7b6   : > { %4052 = vmatpush1.bf16.msra.mxu0 %v7584_v33  ;;  %v7643_v33 = vld [vmem:[#allocation15 + $0xd8] ss:$12 sps:$4 sm:$0xff]  }
 0x7b7   : > { %4053 = vmatprep.subr.bf16.mxu0 %v7589_v34  ;;  %4492 = vmatpush1.bf16.msra.mxu1 %v7643_v33  ;;  %v7644_v34 = vld [vmem:[#allocation15 + $0xf4] ss:$12 sps:$4 sm:$0xff]   ;;  %v7669_v33 = vld [vmem:[#allocation15 + $0x50] ss:$12 sps:$4 sm:$0xff]  }
 0x7b8   : > { %4493 = vmatprep.subr.bf16.mxu1 %v7644_v34  ;;  %v7670_v34 = vld [vmem:[#allocation15 + $0x128] ss:$12 sps:$4 sm:$0xff]  }
 0x7ba   : > { %4054 = vmatpush1.bf16.msra.mxu0 %v7587_v35  ;;  %v7646_v35 = vld [vmem:[#allocation15 + $0xf0] ss:$12 sps:$4 sm:$0xff]  }
 0x7bb   : > { %4055 = vmatprep.subr.bf16.mxu0 %v7592_v22  ;;  %4494 = vmatpush1.bf16.msra.mxu1 %v7646_v35  ;;  %v7647_v22 = vld [vmem:[#allocation15 + $0x10c] ss:$12 sps:$4 sm:$0xff]   ;;  %v7671_v35 = vld [vmem:[#allocation15 + $0x68] ss:$12 sps:$4 sm:$0xff]  }
 0x7bc   : > { %4495 = vmatprep.subr.bf16.mxu1 %v7647_v22  ;;  %v7672_v22 = vld [vmem:[#allocation15 + $0x140] ss:$12 sps:$4 sm:$0xff]  }
 0x7be   : > { %4056 = vmatpush1.bf16.msra.mxu0 %v7590_v23  ;;  %v7649_v23 = vld [vmem:[#allocation15 + $0x108] ss:$12 sps:$4 sm:$0xff]  }
 0x7bf   : > { %4057 = vmatprep.subr.bf16.mxu0 %v7595_v36  ;;  %4496 = vmatpush1.bf16.msra.mxu1 %v7649_v23  ;;  %v7650_v36 = vld [vmem:[#allocation15 + $0x124] ss:$12 sps:$4 sm:$0xff]   ;;  %v7673_v23 = vld [vmem:[#allocation15 + $0x80] ss:$12 sps:$4 sm:$0xff]  }
 0x7c0   : > { %4497 = vmatprep.subr.bf16.mxu1 %v7650_v36  ;;  %v7674_v36 = vld [vmem:[#allocation15 + $0x158] ss:$12 sps:$4 sm:$0xff]  }
 0x7c2   : > { %4058 = vmatpush1.bf16.msra.mxu0 %v7593_v37  ;;  %v7652_v37 = vld [vmem:[#allocation15 + $0x120] ss:$12 sps:$4 sm:$0xff]  }
 0x7c3   : > { %4059 = vmatprep.subr.bf16.mxu0 %v7598_v38  ;;  %v7653_v38 = vld [vmem:[#allocation15 + $0x13c] ss:$12 sps:$4 sm:$0xff]   ;;  %4498 = vmatpush1.bf16.msra.mxu1 %v7652_v37  ;;  %v7675_v37 = vld [vmem:[#allocation15 + $0x98] ss:$12 sps:$4 sm:$0xff]  }
 0x7c4   : > { %4499 = vmatprep.subr.bf16.mxu1 %v7653_v38  ;;  %v7676_v38 = vld [vmem:[#allocation15 + $0x170] ss:$12 sps:$4 sm:$0xff]  }
 0x7c6   : > { %4060 = vmatpush1.bf16.msra.mxu0 %v7596_v39  ;;  %v7655_v39 = vld [vmem:[#allocation15 + $0x138] ss:$12 sps:$4 sm:$0xff]  }
 0x7c7   : > { %4061 = vmatprep.subr.bf16.mxu0 %v7601_v40  ;;  %v7656_v40 = vld [vmem:[#allocation15 + $0x154] ss:$12 sps:$4 sm:$0xff]   ;;  %4500 = vmatpush1.bf16.msra.mxu1 %v7655_v39  ;;  %v7677_v39 = vld [vmem:[#allocation15 + $0xb0] ss:$12 sps:$4 sm:$0xff]  }
 0x7c8   : > { %4501 = vmatprep.subr.bf16.mxu1 %v7656_v40  ;;  %v4568_v40 = vld [vmem:[#allocation3] sm:$0x7] }
 0x7ca   : > { %4062 = vmatpush1.bf16.msra.mxu0 %v7599_v41  ;;  %v7658_v41 = vld [vmem:[#allocation15 + $0x150] ss:$12 sps:$4 sm:$0xff]  }
 0x7cb   : > { %4063 = vmatprep.subr.bf16.mxu0 %v7604_v42  ;;  %v7659_v42 = vld [vmem:[#allocation15 + $0x16c] ss:$12 sps:$4 sm:$0xff]   ;;  %4502 = vmatpush1.bf16.msra.mxu1 %v7658_v41 }
 0x7cc   : > { %4503 = vmatprep.subr.bf16.mxu1 %v7659_v42 }
 0x7ce   : > { %4064 = vmatpush1.bf16.msra.mxu0 %v7602_v43  ;;  %v7661_v43 = vld [vmem:[#allocation15 + $0x168] ss:$12 sps:$4 sm:$0xff]  }
 0x7cf   : > { %4065 = vmatprep.subr.bf16.mxu0 %v7607_v44  ;;  %4504 = vmatpush1.bf16.msra.mxu1 %v7661_v43  ;;  %v7662_v44 = vld [vmem:[#allocation15 + $0xc8] ss:$12 sps:$4 sm:$0xff]  }
 0x7d0   : > { %6634 = vmatprep.subr.bf16.mxu1 %v7662_v44 }
 0x7d2   : > { %4066 = vmatpush1.bf16.msra.mxu0 %v7605_v45 }
 0x7d3   : > { %4067 = vmatprep.subr.bf16.mxu0 %v7610_v46 }
 0x7d6   : > { %4068 = vmatpush1.bf16.msra.mxu0 %v7608_v47 }
 0x7d7   : > { %4069 = vmatprep.subr.bf16.mxu0 %v7613_v48 }
 0x7da   : > { %4070 = vmatpush1.bf16.msra.mxu0 %v7611_v49 }
 0x7dd   : > { %4072 = vmatmul.mubr.bf16.vlgmr.msra.gmra.mrb[0].mxu0 %v3128_v52 }
 0x8b0   : > { %v4073_v13 = vpop.f32.mrb[0].mxu0 }
 0x8b1   : > { %v8647_v14 = vadd.f32 %v4073_v13, %v3263_v11  ;;  %v4075_v15 = vpop.f32.mrb[1].mxu0 }
 0x8b2   : > { %v8649_v16 = vadd.f32 %v4075_v15, %v3267_v12  ;;  %v4077_v17 = vpop.f32.mrb[2].mxu0 }
 0x8b3   : > { %v8651_v18 = vadd.f32 %v4077_v17, %v3263_v11  ;;  %v4079_v19 = vpop.f32.mrb[3].mxu0  ;;  %v4093_v20 = vmul.f32 %v8647_v14, %v8647_v14  ;;  %v4140_v11 = vrot.slane %v4083_v63, %v8637_v8 }
 0x8b4   : > { %v8655_v21 = vadd.f32 %v4079_v19, %v3267_v12  ;;  %v4084_v24 = vadd.f32 %v8649_v16, %v8647_v14  ;;  %v4094_v25 = vmul.f32 %v8649_v16, %v8649_v16  ;;  %v4144_v12 = vrot.slane %v4083_v63, %v8643_v10 }
 0x8b5   : > { %v4095_v27 = vmul.f32 %v8651_v18, %v8651_v18 }
 0x8b6   : > { %4085 = vadd.xlane.f32.xlu0 %v4084_v24  ;;  %v4097_v26 = vadd.f32 %v4094_v25, %v4093_v20  ;;  %v4096_v28 = vmul.f32 %v8655_v21, %v8655_v21  ;;  %v4087_v29 = vadd.f32 %v8655_v21, %v8651_v18 }
 0x8b8   : > { %4098 = vadd.xlane.f32.xlu1 %v4097_v26  ;;  %v4100_v30 = vadd.f32 %v4096_v28, %v4095_v27 }
 0x8ba   : > { %4088 = vadd.xlane.f32.xlu0 %v4087_v29  ;;  %v7664_v29 = vld [vmem:[#allocation15 + $0xe0] ss:$12 sps:$4 sm:$0xff]  }
 0x8bc   : > { %4101 = vadd.xlane.f32.xlu1 %v4100_v30  ;;  %v7666_v30 = vld [vmem:[#allocation15 + $0xf8] ss:$12 sps:$4 sm:$0xff]  }
 0x943   : > { %v4086_v45 = vpop.xlane.xlu0 %4085 }
 0x944   : > { %v4091_v46 = vmul.f32 0.00390625, %v4086_v45 }
 0x945   : > { %v4099_v47 = vpop.xlane.xlu1 %4098 }
 0x946   : > { %v4103_v48 = vmul.f32 0.00390625, %v4099_v47  ;;  %v4109_v49 = vmul.f32 %v4091_v46, %v4091_v46  ;;  %v4105_v61 = vsub.f32 %v8647_v14, %v4091_v46  ;;  %v4106_v62 = vsub.f32 %v8649_v16, %v4091_v46 }
 0x947   : > { %v4089_v50 = vpop.xlane.xlu0 %4088 }
 0x948   : > { %v4111_v51 = vsub.f32 %v4103_v48, %v4109_v49  ;;  %v4092_v52 = vmul.f32 0.00390625, %v4089_v50 }
 0x949   : > { %v4102_v53 = vpop.xlane.xlu1 %4101 }
 0x94a   : > { %v4113_v54 = vadd.f32 1e-05, %v4111_v51  ;;  %v4104_v55 = vmul.f32 0.00390625, %v4102_v53  ;;  %v4110_v56 = vmul.f32 %v4092_v52, %v4092_v52  ;;  %v4107_v4 = vsub.f32 %v8651_v18, %v4092_v52  ;;  %v7663_v18 = vld [vmem:[#allocation15 + $0x8] ss:$12 sps:$4 sm:$0xff]  }
 0x94b   : > { %v4108_v5 = vsub.f32 %v8655_v21, %v4092_v52  ;;  %v7665_v21 = vld [vmem:[#allocation15 + $0x20] ss:$12 sps:$4 sm:$0xff]  }
 0x94c   : > { %7758 = vrsqrt.f32 %v4113_v54  ;;  %v4112_v57 = vsub.f32 %v4104_v55, %v4110_v56 }
 0x94e   : > { %v4114_v58 = vadd.f32 1e-05, %v4112_v57 }
 0x950   : > { %7760 = vrsqrt.f32 %v4114_v58 }
 0x956   : > { %v7759_v60 = vpop.eup %7758 }
 0x957   : > { %v4118_v0 = vmul.f32 %v7759_v60, %v4106_v62  ;;  %v4117_v3 = vmul.f32 %v7759_v60, %v4105_v61 }
 0x959   : > { %v4133_v14 = vmul.f32 %v4129_v2, %v4118_v0  ;;  %v4132_v16 = vmul.f32 %v4125_v1, %v4117_v3  ;;  %v4667_v3 = vld [vmem:[#allocation4] sm:$0x7] }
 0x95a   : > { %v7761_v9 = vpop.eup %7760 }
 0x95b   : > { %v4120_v13 = vmul.f32 %v7761_v9, %v4108_v5  ;;  %v4119_v15 = vmul.f32 %v7761_v9, %v4107_v4  ;;  %v4148_v20 = vadd.f32 %v4144_v12, %v4133_v14  ;;  %v4147_v25 = vadd.f32 %v4140_v11, %v4132_v16  ;;  %v7678_v14 = vld [vmem:[#allocation17] ss:$16 sps:$4 sm:$0xff]  }
 0x95d   : > { %v4135_v17 = vmul.f32 %v4129_v2, %v4120_v13  ;;  %v4134_v19 = vmul.f32 %v4125_v1, %v4119_v15  ;;  %v7680_v15 = vld [vmem:[#allocation17 + $0x4] ss:$16 sps:$4 sm:$0xff]  }
 0x95f   : > { %v4150_v24 = vadd.f32 %v4144_v12, %v4135_v17  ;;  %v4149_v26 = vadd.f32 %v4140_v11, %v4134_v19 }
 0x961   : > { %v4152_v27 = vpack.c.bf16 %v4150_v24, %v4148_v20  ;;  %v4151_v28 = vpack.c.bf16 %v4149_v26, %v4147_v25  ;;  %v7683_v24 = vld [vmem:[#allocation17 + $0x24] ss:$16 sps:$4 sm:$0xff]   ;;  %v7681_v25 = vld [vmem:[#allocation17 + $0x20] ss:$16 sps:$4 sm:$0xff]  }
 0x962   : > { %v7686_v26 = vld [vmem:[#allocation17 + $0x44] ss:$16 sps:$4 sm:$0xff]  }
 0x963   : > { %4505 = vmatprep.mubr.bf16.mxu1 %v4152_v27 }
 0x964   : > { %4506 = vmatmul.mubr.bf16.vlgmr.msra.gmra.mrb[0].mxu1 %v4151_v28 }
 0x965   : > { %6635 = vmatpush3.bf16.msra.mxu1 %v7663_v18  ;;  %4548 = vmatprep.mubr.bf16.mxu1 %v4152_v27  ;;  %v7684_v27 = vld [vmem:[#allocation17 + $0x40] ss:$16 sps:$4 sm:$0xff]  }
 0x966   : > { %6636 = vmatprep.subr.bf16.mxu1 %v7664_v29  ;;  %v7687_v18 = vld [vmem:[#allocation17 + $0x60] ss:$16 sps:$4 sm:$0xff]  }
 0x967   : > { %v7690_v29 = vld [vmem:[#allocation17 + $0x80] ss:$16 sps:$4 sm:$0xff]  }
 0x969   : > { %6637 = vmatpush3.bf16.msra.mxu1 %v7665_v21  ;;  %v7692_v21 = vld [vmem:[#allocation17 + $0x84] ss:$16 sps:$4 sm:$0xff]  }
 0x96a   : > { %6638 = vmatprep.subr.bf16.mxu1 %v7666_v30  ;;  %v7695_v30 = vld [vmem:[#allocation17 + $0xa4] ss:$16 sps:$4 sm:$0xff]  }
 0x96d   : > { %6639 = vmatpush3.bf16.msra.mxu1 %v7667_v31  ;;  %v8120_v31 = vmov 0  }
 0x96e   : > { %6640 = vmatprep.subr.bf16.mxu1 %v7668_v32  ;;  %7420 = vset.pattern.permute.xlu1 %v8120_v31  ;;  %v7693_v32 = vld [vmem:[#allocation17 + $0xa0] ss:$16 sps:$4 sm:$0xff]  }
 0x96f   : > { %7421 = vset.pattern.permute.xlu0 %v8120_v31 }
 0x971   : > { %6641 = vmatpush3.bf16.msra.mxu1 %v7669_v33  ;;  %v7698_v33 = vld [vmem:[#allocation17 + $0xc4] ss:$16 sps:$4 sm:$0xff]  }
 0x972   : > { %6642 = vmatprep.subr.bf16.mxu1 %v7670_v34  ;;  %v7696_v34 = vld [vmem:[#allocation17 + $0xc0] ss:$16 sps:$4 sm:$0xff]  }
 0x975   : > { %6643 = vmatpush3.bf16.msra.mxu1 %v7671_v35  ;;  %v7701_v35 = vld [vmem:[#allocation17 + $0xe4] ss:$16 sps:$4 sm:$0xff]  }
 0x976   : > { %6644 = vmatprep.subr.bf16.mxu1 %v7672_v22  ;;  %v7699_v22 = vld [vmem:[#allocation17 + $0xe0] ss:$16 sps:$4 sm:$0xff]  }
 0x979   : > { %6645 = vmatpush3.bf16.msra.mxu1 %v7673_v23  ;;  %v7704_v23 = vld [vmem:[#allocation17 + $0xc] ss:$16 sps:$4 sm:$0xff]  }
 0x97a   : > { %6646 = vmatprep.subr.bf16.mxu1 %v7674_v36 }
 0x97d   : > { %6647 = vmatpush3.bf16.msra.mxu1 %v7675_v37 }
 0x97e   : > { %6648 = vmatprep.subr.bf16.mxu1 %v7676_v38 }
 0x981   : > { %6649 = vmatpush3.bf16.msra.mxu1 %v7677_v39 }
 0x982   : > { %6722 = vmatprep.subr.mxu1 %v4568_v40 }
 0x984   : > { %4549 = vmatmul.mubr.bf16.vlgmr.msra.gmra.mrb[4].mxu1 %v4151_v28  ;;  %v7689_v28 = vld [vmem:[#allocation17 + $0x64] ss:$16 sps:$4 sm:$0xff]  }
 0x98a   : > { %6723 = vmatpush3.xpose.msra.mxu1 %v4568_v40 }
 0x98b   : > { %6727 = vmatprep.subr.msk.mxu1 %vm4674_vm7, %v4667_v3 }
 0xa37   : > { %v4507_v41 = vpop.f32.mrb[0].mxu1 }
 0xa38   : > { %v8681_v42 = vpop.f32.mrb[1].mxu1  ;;  %6724 = vmatprep.mubr.f32.mxu1 %v4507_v41 }
 0xa39   : > { %v4511_v43 = vpop.f32.mrb[2].mxu1 }
 0xa3a   : > { %v8683_v44 = vpop.f32.mrb[3].mxu1  ;;  %6725 = vmatmul.mubr.f32.vlgmr.msra.gmra.mrb[8].mxu1 %v4511_v43 }
 0xa3b   : > { %v6747_v45 = vpack.c.bf16 %v8683_v44, %v8681_v42  ;;  %6728 = vmatpush3.msk.msra.mxu1 %vm4674_vm7, %v4667_v3 }
 0xa3c   : > { %5013 = vmatprep.subr.bf16.mxu1 %v7680_v15  ;;  %v7711_v15 = vld [vmem:[#allocation17 + $0x68] ss:$16 sps:$4 sm:$0xff]  }
 0xa57   : > { %v6650_v46 = vpop.f32.mrb[4].mxu1 }
 0xa58   : > { %v6651_v47 = vpop.f32.mrb[5].mxu1 }
 0xa59   : > { %v8687_v48 = vadd.f32 %v6651_v47, %v6650_v46  ;;  %v6653_v49 = vpop.f32.mrb[6].mxu1 }
 0xa5a   : > { %v6654_v50 = vpop.f32.mrb[7].mxu1 }
 0xa5b   : > { %v8689_v51 = vadd.f32 %v6654_v50, %v6653_v49 }
 0xa5d   : > { %v6750_v52 = vpack.c.bf16 %v8689_v51, %v8687_v48  ;;  %v5654_v48 = vand.u32 127, %v3260_v6 }
 0xb0d   : > { %v6726_v53 = vpop.f32.mrb[8].mxu1 }
 0xb0e   : > { %v4635_v54 = vpop.f32.mrb[9].mxu1  ;;  %v4648_v55 = vsel %vm4644_vm6, %v6726_v53, -inf }
 0xb0f   : > { %4649 = vmax.xlane.f32.xlu1 %v4648_v55  ;;  %v4645_v56 = vsel %vm4644_vm6, %v4635_v54, -inf }
 0xb10   : > { %4646 = vmax.xlane.f32.xlu0 %v4645_v56 }
 0xb9c   : > { %v4650_v57 = vpop.xlane.xlu1 %4649 }
 0xb9d   : > { %v4652_v58 = vsub.f32 %v6726_v53, %v4650_v57  ;;  %v4647_v59 = vpop.xlane.xlu0 %4646 }
 0xb9e   : > { %v4651_v60 = vsub.f32 %v4635_v54, %v4647_v59  ;;  %v6529_v59 = vld [vmem:[%s8940_s17 + $0x8] ss:$0 sm:$0xff] }
 0xb9f   : > { %v4655_v61 = vmul.f32 1.442695, %v4652_v58 }
 0xba0   : > { %v4653_v62 = vmul.f32 1.442695, %v4651_v60 }
 0xba1   : > { %7762 = vpow2.f32 %v4655_v61 }
 0xba2   : > { %7764 = vpow2.f32 %v4653_v62  ;;  %v6530_v62 = vld [vmem:[%s8940_s17 + $0x9] ss:$0 sm:$0xff] }
 0xbab   : > { %v7763_v63 = vpop.eup %7762 }
 0xbac   : > { %v7765_v0 = vpop.eup %7764  ;;  %v4660_v1 = vsel %vm4644_vm6, %v7763_v63, 0.0 }
 0xbad   : > { %4661 = vadd.xlane.f32.xlu1 %v4660_v1  ;;  %v4657_v2 = vsel %vm4644_vm6, %v7765_v0, 0.0 }
 0xbae   : > { %4658 = vadd.xlane.f32.xlu0 %v4657_v2 }
 0xc3a   : > { %v4662_v4 = vpop.xlane.xlu1 %4661 }
 0xc3b   : > { %7766 = vrcp.f32 %v4662_v4  ;;  %v4659_v5 = vpop.xlane.xlu0 %4658  ;;  %v7702_v4 = vld [vmem:[#allocation17 + $0x8] ss:$16 sps:$4 sm:$0xff]  }
 0xc3c   : > { %7768 = vrcp.f32 %v4659_v5 }
 0xc45   : > { %v7767_v9 = vpop.eup %7766 }
 0xc46   : > { %v7769_v11 = vpop.eup %7768  ;;  %v4666_v13 = vmul.f32 %v7767_v9, %v7763_v63  ;;  %v7707_v9 = vld [vmem:[#allocation17 + $0x2c] ss:$16 sps:$4 sm:$0xff]  }
 0xc47   : > { %v4665_v12 = vmul.f32 %v7769_v11, %v7765_v0  ;;  %v7705_v11 = vld [vmem:[#allocation17 + $0x28] ss:$16 sps:$4 sm:$0xff]  }
 0xc49   : > { %6729 = vmatprep.mubr.msk.f32.mxu1 %vm4644_vm6, %v4665_v12  ;;  %v7710_v12 = vld [vmem:[#allocation17 + $0x4c] ss:$16 sps:$4 sm:$0xff]  }
 0xc4a   : > { %6730 = vmatmul.mubr.msk.f32.vlgmr.msra.gmra.mrb[10].mxu1 %vm4644_vm6, %v4666_v13  ;;  %v7708_v13 = vld [vmem:[#allocation17 + $0x48] ss:$16 sps:$4 sm:$0xff]  }
 0xc4b   : > { %5014 = vmatpush1.bf16.msra.mxu1 %v7678_v14  ;;  %5045 = vmatprep.mubr.bf16.mxu1 %v8120_v31  ;;  %v7713_v14 = vld [vmem:[#allocation17 + $0x6c] ss:$16 sps:$4 sm:$0xff]  }
 0xc4c   : > { %5015 = vmatprep.subr.bf16.mxu1 %v7683_v24  ;;  %v7722_v24 = vld [vmem:[#allocation17 + $0xcc] ss:$16 sps:$4 sm:$0xff]  }
 0xc4f   : > { %5016 = vmatpush1.bf16.msra.mxu1 %v7681_v25  ;;  %v7720_v25 = vld [vmem:[#allocation17 + $0xc8] ss:$16 sps:$4 sm:$0xff]  }
 0xc50   : > { %5017 = vmatprep.subr.bf16.mxu1 %v7686_v26  ;;  %v7725_v26 = vld [vmem:[#allocation17 + $0xec] ss:$16 sps:$4 sm:$0xff]  }
 0xc53   : > { %5018 = vmatpush1.bf16.msra.mxu1 %v7684_v27  ;;  %v7723_v27 = vld [vmem:[#allocation17 + $0xe8] ss:$16 sps:$4 sm:$0xff]  }
 0xc54   : > { %5019 = vmatprep.subr.bf16.mxu1 %v7689_v28  ;;  %v7726_v28 = vld [vmem:[#allocation18 + $0x40] sm:$0xff]  }
 0xc57   : > { %5020 = vmatpush1.bf16.msra.mxu1 %v7687_v18  ;;  %v7727_v18 = vld [vmem:[#allocation18] sm:$0xff]  }
 0xc58   : > { %5021 = vmatprep.subr.bf16.mxu1 %v7692_v21  ;;  %v7729_v21 = vld [vmem:[#allocation18 + $0x8] sm:$0xff]  }
 0xc5b   : > { %5022 = vmatpush1.bf16.msra.mxu1 %v7690_v29  ;;  %v7728_v29 = vld [vmem:[#allocation18 + $0x48] sm:$0xff]  }
 0xc5c   : > { %5023 = vmatprep.subr.bf16.mxu1 %v7695_v30  ;;  %v7730_v30 = vld [vmem:[#allocation18 + $0x50] sm:$0xff]  }
 0xc5f   : > { %5024 = vmatpush1.bf16.msra.mxu1 %v7693_v32  ;;  %v7732_v32 = vld [vmem:[#allocation18 + $0x58] sm:$0xff]  }
 0xc60   : > { %5025 = vmatprep.subr.bf16.mxu1 %v7698_v33  ;;  %v7733_v33 = vld [vmem:[#allocation18 + $0x18] sm:$0xff]  }
 0xc63   : > { %5026 = vmatpush1.bf16.msra.mxu1 %v7696_v34  ;;  %v7734_v34 = vld [vmem:[#allocation18 + $0x60] sm:$0xff]  }
 0xc64   : > { %5027 = vmatprep.subr.bf16.mxu1 %v7701_v35  ;;  %v7735_v35 = vld [vmem:[#allocation18 + $0x20] sm:$0xff]  }
 0xc67   : > { %5028 = vmatpush1.bf16.msra.mxu1 %v7699_v22  ;;  %v7736_v22 = vld [vmem:[#allocation18 + $0x68] sm:$0xff]  }
 0xc68   : > { %5056 = vmatprep.subr.bf16.mxu1 %v7704_v23  ;;  %v7737_v23 = vld [vmem:[#allocation18 + $0x28] sm:$0xff]  }
 0xd1d   : > { %v8699_v16 = vpop.f32.mrb[10].mxu1 }
 0xd1e   : > { %4757 = vadd.xlane.f32.xlu1 %v8699_v16  ;;  %v8702_v17 = vpop.f32.mrb[11].mxu1  ;;  %v4763_v19 = vmul.f32 %v8699_v16, %v8699_v16 }
 0xd1f   : > { %4755 = vadd.xlane.f32.xlu0 %v8702_v17  ;;  %v4762_v20 = vmul.f32 %v8702_v17, %v8702_v17 }
 0xd22   : > { %4766 = vadd.xlane.f32.xlu1 %v4763_v19  ;;  %v7719_v19 = vld [vmem:[#allocation17 + $0xac] ss:$16 sps:$4 sm:$0xff]  }
 0xd23   : > { %4764 = vadd.xlane.f32.xlu0 %v4762_v20  ;;  %v7717_v20 = vld [vmem:[#allocation17 + $0xa8] ss:$16 sps:$4 sm:$0xff]  }
 0xdab   : > { %v4758_v36 = vpop.xlane.xlu1 %4757 }
 0xdac   : > { %v4761_v37 = vmul.f32 0.0078125, %v4758_v36  ;;  %v4756_v38 = vpop.xlane.xlu0 %4755  ;;  %v7738_v36 = vld [vmem:[#allocation18 + $0x70] sm:$0xff]  }
 0xdad   : > { %v4760_v39 = vmul.f32 0.0078125, %v4756_v38  ;;  %v7740_v38 = vld [vmem:[#allocation18 + $0x78] sm:$0xff]  }
 0xdae   : > { %v4773_v41 = vmul.f32 %v4761_v37, %v4761_v37  ;;  %v4771_v56 = vsub.f32 %v8699_v16, %v4761_v37  ;;  %v7716_v16 = vld [vmem:[#allocation17 + $0x8c] ss:$16 sps:$4 sm:$0xff]   ;;  %v7739_v37 = vld [vmem:[#allocation18 + $0x30] sm:$0xff]  }
 0xdaf   : > { %v4767_v40 = vpop.xlane.xlu1 %4766  ;;  %v4772_v47 = vmul.f32 %v4760_v39, %v4760_v39  ;;  %v4770_v58 = vsub.f32 %v8702_v17, %v4760_v39  ;;  %v7714_v17 = vld [vmem:[#allocation17 + $0x88] ss:$16 sps:$4 sm:$0xff]  }
 0xdb0   : > { %v4769_v43 = vmul.f32 0.0078125, %v4767_v40  ;;  %v4765_v46 = vpop.xlane.xlu0 %4764  ;;  %v7741_v39 = vld [vmem:[#allocation18 + $0x38] sm:$0xff]   ;;  %v7742_v40 = vld [vmem:[#allocation18 + $0xc0] sm:$0xff]  }
 0xdb1   : > { %v4768_v49 = vmul.f32 0.0078125, %v4765_v46 }
 0xdb2   : > { %v4775_v50 = vsub.f32 %v4769_v43, %v4773_v41  ;;  %v4831_v41 = vld [vmem:[%s8940_s17 + $0xd] sm:$0xf] }
 0xdb3   : > { %v4774_v53 = vsub.f32 %v4768_v49, %v4772_v47  ;;  %v4836_v43 = vrot.slane %v4831_v41, %v8637_v8  ;;  %v4840_v46 = vrot.slane %v4831_v41, %v8643_v10 }
 0xdb4   : > { %v4777_v54 = vadd.f32 1e-05, %v4775_v50 }
 0xdb5   : > { %v4776_v55 = vadd.f32 1e-05, %v4774_v53 }
 0xdb6   : > { %7770 = vrsqrt.f32 %v4777_v54 }
 0xdb7   : > { %7772 = vrsqrt.f32 %v4776_v55 }
 0xdc0   : > { %v7771_v57 = vpop.eup %7770 }
 0xdc1   : > { %v7773_v60 = vpop.eup %7772  ;;  %v4781_v61 = vmul.f32 %v7771_v57, %v4771_v56 }
 0xdc2   : > { %v4780_v63 = vmul.f32 %v7773_v60, %v4770_v58 }
 0xdc3   : > { %v4789_v0 = vmul.f32 %v6529_v59, %v4781_v61 }
 0xdc4   : > { %v4788_v1 = vmul.f32 %v6529_v59, %v4780_v63 }
 0xdc5   : > { %v4797_v2 = vadd.f32 %v6530_v62, %v4789_v0 }
 0xdc6   : > { %v4796_v3 = vadd.f32 %v6530_v62, %v4788_v1 }
 0xdc8   : > { %v4798_v5 = vpack.c.bf16 %v4797_v2, %v4796_v3 }
 0xdca   : > { %5046 = vmatmul.mubr.bf16.vlgmr.msra.gmra.mrb[12].mxu1 %v4798_v5 }
 0xdcb   : > { %5057 = vmatpush1.bf16.msra.mxu1 %v7702_v4  ;;  %5088 = vmatprep.mubr.bf16.mxu1 %v8120_v31  ;;  %v7731_v31 = vld [vmem:[#allocation18 + $0x10] sm:$0xff]  }
 0xdcc   : > { %5058 = vmatprep.subr.bf16.mxu1 %v7707_v9 }
 0xdcf   : > { %5059 = vmatpush1.bf16.msra.mxu1 %v7705_v11 }
 0xdd0   : > { %5060 = vmatprep.subr.bf16.mxu1 %v7710_v12 }
 0xdd3   : > { %5061 = vmatpush1.bf16.msra.mxu1 %v7708_v13 }
 0xdd4   : > { %5062 = vmatprep.subr.bf16.mxu1 %v7713_v14 }
 0xdd7   : > { %5063 = vmatpush1.bf16.msra.mxu1 %v7711_v15 }
 0xdd8   : > { %5064 = vmatprep.subr.bf16.mxu1 %v7716_v16 }
 0xddb   : > { %5065 = vmatpush1.bf16.msra.mxu1 %v7714_v17 }
 0xddc   : > { %5066 = vmatprep.subr.bf16.mxu1 %v7719_v19 }
 0xddf   : > { %5067 = vmatpush1.bf16.msra.mxu1 %v7717_v20 }
 0xde0   : > { %5068 = vmatprep.subr.bf16.mxu1 %v7722_v24  ;;  %v4843_v24 = vsub.s32 2, %v8634_v7 }
 0xde3   : > { %5069 = vmatpush1.bf16.msra.mxu1 %v7720_v25 }
 0xde4   : > { %5070 = vmatprep.subr.bf16.mxu1 %v7725_v26 }
 0xde7   : > { %5071 = vmatpush1.bf16.msra.mxu1 %v7723_v27 }
 0xde8   : > { %6662 = vmatprep.subr.bf16.mxu1 %v7726_v28 }
 0xdea   : > { %5089 = vmatmul.mubr.bf16.vlgmr.msra.gmra.mrb[16].mxu1 %v4798_v5 }
 0xdeb   : > { %6663 = vmatpush3.bf16.msra.mxu1 %v7727_v18  ;;  %v4847_v18 = vsub.s32 3, %v8634_v7 }
 0xdec   : > { %6664 = vmatprep.subr.bf16.mxu1 %v7728_v29 }
 0xdef   : > { %6665 = vmatpush3.bf16.msra.mxu1 %v7729_v21 }
 0xdf0   : > { %6666 = vmatprep.subr.bf16.mxu1 %v7730_v30 }
 0xdf3   : > { %6667 = vmatpush3.bf16.msra.mxu1 %v7731_v31 }
 0xdf4   : > { %6668 = vmatprep.subr.bf16.mxu1 %v7732_v32 }
 0xdf7   : > { %6669 = vmatpush3.bf16.msra.mxu1 %v7733_v33 }
 0xdf8   : > { %6670 = vmatprep.subr.bf16.mxu1 %v7734_v34  ;;  %v4844_v34 = vrot.slane %v4831_v41, %v4843_v24  ;;  %v7753_v24 = vld [vmem:[#allocation18 + $0xa8] sm:$0xff]  }
 0xdfb   : > { %6671 = vmatpush3.bf16.msra.mxu1 %v7735_v35 }
 0xdfc   : > { %6672 = vmatprep.subr.bf16.mxu1 %v7736_v22 }
 0xdff   : > { %6673 = vmatpush3.bf16.msra.mxu1 %v7737_v23  ;;  %v4848_v23 = vrot.slane %v4831_v41, %v4847_v18  ;;  %v7756_v18 = vld [vmem:[#allocation18 + $0xf8] sm:$0xff]  }
 0xe00   : > { %6674 = vmatprep.subr.bf16.mxu1 %v7738_v36 }
 0xe03   : > { %6675 = vmatpush3.bf16.msra.mxu1 %v7739_v37 }
 0xe04   : > { %6676 = vmatprep.subr.bf16.mxu1 %v7740_v38  ;;  %v7743_v38 = vld [vmem:[#allocation18 + $0x80] sm:$0xff]  }
 0xe07   : > { %6677 = vmatpush3.bf16.msra.mxu1 %v7741_v39 }
 0xe08   : > { %6684 = vmatprep.subr.bf16.mxu1 %v7742_v40  ;;  %v7744_v40 = vld [vmem:[#allocation18 + $0xc8] sm:$0xff]  }
 0xe9d   : > { %v5047_v47 = vpop.f32.mrb[12].mxu1 }
 0xe9e   : > { %v5048_v49 = vadd.f32 %v5047_v47, %v4836_v43  ;;  %v5049_v50 = vpop.f32.mrb[13].mxu1 }
 0xe9f   : > { %v5050_v53 = vadd.f32 %v5049_v50, %v4840_v46  ;;  %v5051_v54 = vpop.f32.mrb[14].mxu1 }
 0xea0   : > { %v5107_v55 = vmul.f32 %v5048_v49, %v5048_v49  ;;  %v5052_v56 = vadd.f32 %v5051_v54, %v4836_v43  ;;  %v5053_v57 = vpop.f32.mrb[15].mxu1  ;;  %v5099_v27 = vmul.f32 0.5, %v5048_v49 }
 0xea1   : > { %v5108_v58 = vmul.f32 %v5050_v53, %v5050_v53  ;;  %v5054_v59 = vadd.f32 %v5053_v57, %v4840_v46  ;;  %v5100_v21 = vmul.f32 0.5, %v5050_v53  ;;  %v7746_v57 = vld [vmem:[#allocation18 + $0xd0] sm:$0xff]  }
 0xea2   : > { %v5115_v60 = vmul.f32 %v5107_v55, %v5048_v49  ;;  %v5111_v61 = vmul.f32 %v5052_v56, %v5052_v56  ;;  %v5103_v28 = vmul.f32 0.5, %v5052_v56  ;;  %v7745_v55 = vld [vmem:[#allocation18 + $0x88] sm:$0xff]  }
 0xea3   : > { %v5116_v62 = vmul.f32 %v5108_v58, %v5050_v53  ;;  %v5112_v63 = vmul.f32 %v5054_v59, %v5054_v59  ;;  %v5104_v30 = vmul.f32 0.5, %v5054_v59 }
 0xea4   : > { %v5123_v0 = vmul.f32 0.044715, %v5115_v60  ;;  %v5119_v1 = vmul.f32 %v5111_v61, %v5052_v56 }
 0xea5   : > { %v5124_v2 = vmul.f32 0.044715, %v5116_v62  ;;  %v5120_v8 = vmul.f32 %v5112_v63, %v5054_v59 }
 0xea6   : > { %v5131_v3 = vadd.f32 %v5123_v0, %v5048_v49  ;;  %v5127_v10 = vmul.f32 0.044715, %v5119_v1  ;;  %v7747_v0 = vld [vmem:[#allocation18 + $0x90] sm:$0xff]  }
 0xea7   : > { %v5132_v4 = vadd.f32 %v5124_v2, %v5050_v53  ;;  %v5128_v5 = vmul.f32 0.044715, %v5120_v8  ;;  %v7748_v8 = vld [vmem:[#allocation18 + $0xd8] sm:$0xff]  }
 0xea8   : > { %v5139_v9 = vmul.f32 0.7978846, %v5131_v3  ;;  %v5135_v11 = vadd.f32 %v5127_v10, %v5052_v56 }
 0xea9   : > { %v5140_v12 = vmul.f32 0.7978846, %v5132_v4  ;;  %v5136_v13 = vadd.f32 %v5128_v5, %v5054_v59 }
 0xeaa   : > { %7774 = vtanh.f32 %v5139_v9  ;;  %v5143_v14 = vmul.f32 0.7978846, %v5135_v11 }
 0xeab   : > { %7776 = vtanh.f32 %v5140_v12  ;;  %v5144_v15 = vmul.f32 0.7978846, %v5136_v13  ;;  %v7749_v12 = vld [vmem:[#allocation18 + $0x98] sm:$0xff]  }
 0xeac   : > { %7778 = vtanh.f32 %v5143_v14 }
 0xead   : > { %7780 = vtanh.f32 %v5144_v15  ;;  %v7750_v15 = vld [vmem:[#allocation18 + $0xe0] sm:$0xff]  }
 0xeb4   : > { %v7775_v16 = vpop.eup %7774 }
 0xeb5   : > { %v7777_v17 = vpop.eup %7776  ;;  %v5155_v19 = vadd.f32 1.0, %v7775_v16 }
 0xeb6   : > { %v7779_v20 = vpop.eup %7778  ;;  %v5156_v25 = vadd.f32 1.0, %v7777_v17 }
 0xeb7   : > { %v7781_v26 = vpop.eup %7780  ;;  %v5159_v29 = vadd.f32 1.0, %v7779_v20  ;;  %v5163_v32 = vmul.f32 %v5155_v19, %v5099_v27  ;;  %v7751_v19 = vld [vmem:[#allocation18 + $0xa0] sm:$0xff]   ;;  %v7752_v20 = vld [vmem:[#allocation18 + $0xe8] sm:$0xff]   ;;  %v7755_v27 = vld [vmem:[#allocation18 + $0xb0] sm:$0xff]  }
 0xeb8   : > { %v5160_v31 = vadd.f32 1.0, %v7781_v26  ;;  %v5164_v35 = vmul.f32 %v5156_v25, %v5100_v21  ;;  %v7754_v25 = vld [vmem:[#allocation18 + $0xf0] sm:$0xff]  }
 0xeb9   : > { %v5167_v33 = vmul.f32 %v5159_v29, %v5103_v28 }
 0xeba   : > { %v5168_v22 = vmul.f32 %v5160_v31, %v5104_v30 }
 0xebb   : > { %v5171_v36 = vpack.c.bf16 %v5167_v33, %v5163_v32 }
 0xebc   : > { %v5172_v37 = vpack.c.bf16 %v5168_v22, %v5164_v35  ;;  %v7757_v35 = vld [vmem:[#allocation18 + $0xb8] sm:$0xff]  }
 0xebd   : > { %v5090_v39 = vpop.f32.mrb[16].mxu1 }
 0xebe   : > { %v5091_v43 = vadd.f32 %v5090_v39, %v4844_v34  ;;  %v5092_v46 = vpop.f32.mrb[17].mxu1  ;;  %5470 = vmatprep.mubr.bf16.mxu1 %v5172_v37 }
 0xebf   : > { %v8724_v47 = vadd.f32 %v5092_v46, %v4848_v23  ;;  %v5094_v49 = vpop.f32.mrb[18].mxu1  ;;  %5471 = vmatmul.mubr.bf16.vlgmr.msra.gmra.mrb[20].mxu1 %v5171_v36 }
 0xec0   : > { %v5109_v50 = vmul.f32 %v5091_v43, %v5091_v43  ;;  %v5095_v53 = vadd.f32 %v5094_v49, %v4844_v34  ;;  %v5096_v54 = vpop.f32.mrb[19].mxu1  ;;  %6685 = vmatpush3.bf16.msra.mxu1 %v7743_v38  ;;  %v5101_v32 = vmul.f32 0.5, %v5091_v43 }
 0xec1   : > { %v5110_v41 = vmul.f32 %v8724_v47, %v8724_v47  ;;  %v5097_v56 = vadd.f32 %v5096_v54, %v4848_v23  ;;  %6686 = vmatprep.subr.bf16.mxu1 %v7744_v40  ;;  %v5102_v22 = vmul.f32 0.5, %v8724_v47 }
 0xec2   : > { %v5117_v58 = vmul.f32 %v5109_v50, %v5091_v43  ;;  %v5113_v59 = vmul.f32 %v5095_v53, %v5095_v53  ;;  %v5105_v33 = vmul.f32 0.5, %v5095_v53  ;;  %v8121_v50 = vmov 0.0|0.0  }
 0xec3   : > { %v5118_v60 = vmul.f32 %v5110_v41, %v8724_v47  ;;  %v5114_v61 = vmul.f32 %v5097_v56, %v5097_v56  ;;  %v5106_v23 = vmul.f32 0.5, %v5097_v56  ;;  %v5582_v41 = vld [vmem:[#allocation2] sm:$0x7] }
 0xec4   : > { %v5125_v62 = vmul.f32 0.044715, %v5117_v58  ;;  %v5121_v63 = vmul.f32 %v5113_v59, %v5095_v53  ;;  %6687 = vmatpush3.bf16.msra.mxu1 %v7745_v55  ;;  %v6563_v58 = vld [vmem:[%s8940_s17 + $0xa] ss:$0 sm:$0xff] }
 0xec5   : > { %v5126_v1 = vmul.f32 0.044715, %v5118_v60  ;;  %v5122_v2 = vmul.f32 %v5114_v61, %v5097_v56  ;;  %6688 = vmatprep.subr.bf16.mxu1 %v7746_v57 }
 0xec6   : > { %v5133_v3 = vadd.f32 %v5125_v62, %v5091_v43  ;;  %v5129_v10 = vmul.f32 0.044715, %v5121_v63  ;;  %v4562_v43 = vadd.s32 8, %v8634_v7 }
 0xec7   : > { %v5134_v4 = vadd.f32 %v5126_v1, %v8724_v47  ;;  %v5130_v5 = vmul.f32 0.044715, %v5122_v2  ;;  %v8123_v47 = vmov 0.0  }
 0xec8   : > { %v5141_v9 = vmul.f32 0.7978846, %v5133_v3  ;;  %v5137_v11 = vadd.f32 %v5129_v10, %v5095_v53  ;;  %6689 = vmatpush3.bf16.msra.mxu1 %v7747_v0  ;;  %v4563_v53 = vstv %s6525_s29 }
 0xec9   : > { %v5142_v13 = vmul.f32 0.7978846, %v5134_v4  ;;  %v5138_v14 = vadd.f32 %v5130_v5, %v5097_v56  ;;  %6690 = vmatprep.subr.bf16.mxu1 %v7748_v8  ;;  %v8735_v54 = vadd.s32 %v4563_v53, %v8634_v7  ;;  %v8737_v55 = vadd.s32 %v4563_v53, %v4562_v43 }
 0xeca   : > { %7782 = vtanh.f32 %v5141_v9  ;;  %v5145_v16 = vmul.f32 0.7978846, %v5137_v11  ;;  %v5655_v8 = vadd.s32 %v5654_v48, %v4563_v53  ;;  %v5658_v11 = vld [vmem:[#allocation5] sm:$0x7]  ;;  %v5683_v48 = vld [vmem:[#allocation7] sm:$0x7] }
 0xecb   : > { %7784 = vtanh.f32 %v5142_v13  ;;  %v5146_v17 = vmul.f32 0.7978846, %v5138_v14  ;;  %vm4566_vm9 = vcmp.lt.s32.totalorder %v8735_v54, 40  ;;  %vm4567_vm10 = vcmp.lt.s32.totalorder %v8737_v55, 40 }
 0xecc   : > { %7786 = vtanh.f32 %v5145_v16  ;;  %6691 = vmatpush3.bf16.msra.mxu1 %v7749_v12  ;;  %vm6751_vm11 = vmpackc.low %vm4567_vm10, %vm4566_vm9  ;;  %vm5656_vm12 = vcmp.lt.s32.totalorder %v5655_v8, 40 }
 0xecd   : > { %7788 = vtanh.f32 %v5146_v17  ;;  %6692 = vmatprep.subr.bf16.mxu1 %v7750_v15 }
 0xed0   : > { %6693 = vmatpush3.bf16.msra.mxu1 %v7751_v19 }
 0xed1   : > { %6694 = vmatprep.subr.bf16.mxu1 %v7752_v20 }
 0xed4   : > { %v7783_v26 = vpop.eup %7782  ;;  %6695 = vmatpush3.bf16.msra.mxu1 %v7753_v24 }
 0xed5   : > { %v7785_v28 = vpop.eup %7784  ;;  %6696 = vmatprep.subr.bf16.mxu1 %v7754_v25  ;;  %v5157_v29 = vadd.f32 1.0, %v7783_v26 }
 0xed6   : > { %v7787_v21 = vpop.eup %7786  ;;  %v5158_v30 = vadd.f32 1.0, %v7785_v28 }
 0xed7   : > { %v7789_v31 = vpop.eup %7788  ;;  %v5161_v34 = vadd.f32 1.0, %v7787_v21  ;;  %v5165_v37 = vmul.f32 %v5157_v29, %v5101_v32 }
 0xed8   : > { %6697 = vmatpush3.bf16.msra.mxu1 %v7755_v27  ;;  %v5162_v36 = vadd.f32 1.0, %v7789_v31  ;;  %v5166_v39 = vmul.f32 %v5158_v30, %v5102_v22 }
 0xed9   : > { %6698 = vmatprep.subr.bf16.mxu1 %v7756_v18  ;;  %v5169_v38 = vmul.f32 %v5161_v34, %v5105_v33 }
 0xeda   : > { %v5170_v40 = vmul.f32 %v5162_v36, %v5106_v23 }
 0xedb   : > { %v5173_v46 = vpack.c.bf16 %v5169_v38, %v5165_v37  ;;  %v6597_v38 = vld [vmem:[%s8940_s17 + $0xc] ss:$0 sm:$0xff] }
 0xedc   : > { %6699 = vmatpush3.bf16.msra.mxu1 %v7757_v35  ;;  %v5174_v49 = vpack.c.bf16 %v5170_v40, %v5166_v39  ;;  %v6596_v35 = vld [vmem:[%s8940_s17 + $0xb] ss:$0 sm:$0xff] }
 0xedd   : > { %6746 = vmatprep.subr.bf16.mxu1 %v8121_v50 }
 0xede   : > { %5511 = vmatprep.mubr.bf16.mxu1 %v5174_v49 }
 0xedf   : > { %5512 = vmatmul.mubr.bf16.vlgmr.msra.gmra.mrb[24].mxu1 %v5173_v46 }
 0xee0   : > { %6736 = vmatprep.mubr.msk.f32.mxu1 %vm8122_vm8, %v8123_v47 }
 0xee5   : > { %6748 = vmatpush3.bf16.xpose.msra.mxu1 %v6747_v45 }
 0xee6   : > { %6749 = vmatprep.subr.bf16.mxu1 %v8121_v50 }
 0xeec   : > { %6737 = vmatmul.mubr.f32.vlgmr.msra.gmra.mrb[28].mxu1 %v5582_v41 }
 0xeed   : > { %6752 = vmatpush3.bf16.msk.msra.mxu1 %vm6751_vm11, %v6750_v52  ;;  %6743 = vmatprep.mubr.msk.f32.mxu1 %vm8122_vm8, %v8123_v47 }
 0xf92   : > { %v6678_v7 = vpop.f32.mrb[20].mxu1 }
 0xf93   : > { %v6679_v42 = vpop.f32.mrb[21].mxu1 }
 0xf94   : > { %v6680_v44 = vadd.f32 %v6679_v42, %v6678_v7  ;;  %v6681_v45 = vpop.f32.mrb[22].mxu1 }
 0xf95   : > { %v6682_v56 = vpop.f32.mrb[23].mxu1 }
 0xf96   : > { %v6683_v57 = vadd.f32 %v6682_v56, %v6681_v45  ;;  %v5473_v61 = vadd.f32 %v6680_v44, %v6563_v58  ;;  %v5570_v45 = vld [vmem:[#allocation8] sm:$0x1] }
 0xf98   : > { %v5476_v51 = vadd.f32 %v6683_v57, %v6563_v58 }
 0xfb2   : > { %v6700_v59 = vpop.f32.mrb[24].mxu1 }
 0xfb3   : > { %v6701_v60 = vpop.f32.mrb[25].mxu1 }
 0xfb4   : > { %v6702_v62 = vadd.f32 %v6701_v60, %v6700_v59  ;;  %v6703_v63 = vpop.f32.mrb[26].mxu1 }
 0xfb5   : > { %v6704_v0 = vpop.f32.mrb[27].mxu1 }
 0xfb6   : > { %v5514_v52 = vadd.f32 %v6702_v62, %v5473_v61  ;;  %v6705_v1 = vadd.f32 %v6704_v0, %v6703_v63  ;;  %v5675_v61 = vld [vmem:[#allocation6] sm:$0x7] }
 0xfb8   : > { %v5517_v2 = vadd.f32 %v6705_v1, %v5476_v51  ;;  %v5528_v9 = vmul.f32 %v5514_v52, %v5514_v52 }
 0xfba   : > { %v5529_v6 = vmul.f32 %v5517_v2, %v5517_v2 }
 0xfbf   : > { %v5649_v3 = vpop.f32.mrb[28].mxu1 }
 0xfc0   : > { %v8755_v10 = vsel %vm5656_vm12, %v5649_v3, -1e+30  ;;  %v6738_v4 = vpop.f32.mrb[29].mxu1 }
 0xfc1   : > { %v5660_v5 = vsel %vm5659_vm13, %v8755_v10, -inf }
 0xfc2   : > { %5661 = vmax.xlane.f32.xlu0 %v5660_v5 }
 0xfc6   : > { %5522 = vadd.xlane.f32.xlu0 %v5514_v52 }
 0xfca   : > { %5524 = vadd.xlane.f32.xlu0 %v5517_v2 }
 0xfce   : > { %5530 = vadd.xlane.f32.xlu0 %v5528_v9 }
 0xfd2   : > { %5532 = vadd.xlane.f32.xlu0 %v5529_v6 }
0x104f   : > { %v5662_v12 = vpop.xlane.xlu0 %5661 }
0x1050   : > { %v5663_v13 = vmax.f32 %v5658_v11, %v5662_v12 }
0x1052   : > { %v5664_v14 = vsub.f32 %v5658_v11, %v5663_v13  ;;  %5766 = vst.msk [vmem:[#allocation5] sm:$0x7] %vm5681_vm14, %v5663_v13  ;;  %5669 = vperm.xlu1 %7420, %v5663_v13  }
0x1053   : > { %v5523_v15 = vpop.xlane.xlu0 %5522 }
0x1054   : > { %v5665_v16 = vmul.f32 1.442695, %v5664_v14  ;;  %v5526_v19 = vmul.f32 0.0078125, %v5523_v15 }
0x1056   : > { %7790 = vpow2.f32 %v5665_v16  ;;  %v5538_v24 = vmul.f32 %v5526_v19, %v5526_v19  ;;  %v5536_v33 = vsub.f32 %v5514_v52, %v5526_v19 }
0x1057   : > { %v5525_v17 = vpop.xlane.xlu0 %5524 }
0x1058   : > { %v5527_v25 = vmul.f32 0.0078125, %v5525_v17 }
0x1059   : > { %v5771_v3 = vld [vmem:[#allocation5] sm:$0x7] (!%p6601_p6) }
0x105a   : > { %v5539_v29 = vmul.f32 %v5527_v25, %v5527_v25  ;;  %v5537_v23 = vsub.f32 %v5517_v2, %v5527_v25  ;;  %5772 = vst.msk [vmem:[%s541_s20] sm:$0x7] (!%p6601_p6), %vm5681_vm14, %v5771_v3 }
0x105b   : > { %v5531_v20 = vpop.xlane.xlu0 %5530 }
0x105c   : > { %v5534_v26 = vmul.f32 0.0078125, %v5531_v20 }
0x105e   : > { %v5540_v27 = vsub.f32 %v5534_v26, %v5538_v24 }
0x105f   : > { %v5533_v28 = vpop.xlane.xlu0 %5532 }
0x1060   : > { %v7791_v18 = vpop.eup %7790  ;;  %v5542_v21 = vadd.f32 1e-05, %v5540_v27  ;;  %v5535_v30 = vmul.f32 0.0078125, %v5533_v28 }
0x1061   : > { %5686 = vperm.xlu0 %7421, %v7791_v18   ;;  %v5676_v62 = vmul.f32 %v7791_v18, %v5675_v61 }
0x1062   : > { %7792 = vrsqrt.f32 %v5542_v21  ;;  %v5541_v31 = vsub.f32 %v5535_v30, %v5539_v29 }
0x1064   : > { %v5543_v32 = vadd.f32 1e-05, %v5541_v31 }
0x1066   : > { %7794 = vrsqrt.f32 %v5543_v32 }
0x106c   : > { %v7793_v34 = vpop.eup %7792 }
0x106d   : > { %v5546_v22 = vmul.f32 %v7793_v34, %v5536_v33 }
0x106f   : > { %v5554_v36 = vmul.f32 %v6596_v35, %v5546_v22 }
0x1070   : > { %v7795_v37 = vpop.eup %7794 }
0x1071   : > { %v5547_v39 = vmul.f32 %v7795_v37, %v5537_v23  ;;  %v5562_v40 = vadd.f32 %v6597_v38, %v5554_v36 }
0x1073   : > { %v5555_v46 = vmul.f32 %v6596_v35, %v5547_v39  ;;  %v5568_v50 = vsel %vm4566_vm9, %v5562_v40, 0.0 }
0x1075   : > { %v5563_v49 = vadd.f32 %v6597_v38, %v5555_v46 }
0x1077   : > { %v5569_v43 = vsel %vm4567_vm10, %v5563_v49, 0.0 }
0x1078   : > { %v5571_v47 = vadd.f32 %v5569_v43, %v5568_v50 }
0x107a   : > { %v5572_v53 = vrot.slane %v5571_v47, 4 }
0x107c   : > { %v5573_v41 = vadd.f32 %v5572_v53, %v5571_v47 }
0x107e   : > { %v5574_v7 = vrot.slane %v5573_v41, 2 }
0x1080   : > { %v5575_v42 = vadd.f32 %v5574_v7, %v5573_v41 }
0x1082   : > { %v5576_v44 = vrot.slane %v5575_v42, 1 }
0x1084   : > { %v5577_v56 = vadd.f32 %v5576_v44, %v5575_v42 }
0x1086   : > { %v5578_v57 = vadd.f32 %v5577_v56, %v5570_v45 }
0x1088   : > { %5579 = vst [vmem:[#allocation8] sm:$0x1] %v5578_v57 }
0x108f   : > { %v5777_v5 = vld [vmem:[#allocation8] sm:$0x1] (!%p6601_p6) }
0x1090   : > { %5778 = vst [vmem:[%s8511_s1] sm:$0x1] (!%p6601_p6), %v5777_v5 }
0x10d1   : > { %v5670_v58 = vpop.permute.xlu1 %5669 }
0x10d2   : > { %v5672_v59 = vsub.f32 %v8755_v10, %v5670_v58 }
0x10d4   : > { %v5673_v60 = vmul.f32 1.442695, %v5672_v59 }
0x10d6   : > { %7796 = vpow2.f32 %v5673_v60 }
0x10e0   : > { %v7797_v54 = vpop.eup %7796  ;;  %v5687_v51 = vpop.permute.xlu0 %5686 }
0x10e1   : > { %6744 = vmatmul.mubr.msk.f32.vlgmr.msra.gmra.mrb[30].mxu1 %vm5690_vm15, %v7797_v54  ;;  %v5677_v55 = vsel %vm5659_vm13, %v7797_v54, 0.0  ;;  %v5689_v52 = vmul.f32 %v5687_v51, %v5683_v48 }
0x10e2   : > { %5678 = vadd.xlane.f32.xlu1 %v5677_v55 }
0x116f   : > { %v5679_v63 = vpop.xlane.xlu1 %5678 }
0x1170   : > { %v5680_v0 = vadd.f32 %v5679_v63, %v5676_v62 }
0x1172   : > { %5682 = vst.msk [vmem:[#allocation6] sm:$0x7] %vm5681_vm14, %v5680_v0 }
0x1179   : > { %v5773_v10 = vld [vmem:[#allocation6] sm:$0x7] (!%p6601_p6) }
0x117a   : > { %5774 = vst.msk [vmem:[%s545_s26] sm:$0x7] (!%p6601_p6), %vm5681_vm14, %v5773_v10 }
0x11b1   : > { %5770 = sbr.rel (%p6601_p6) target bundleno = 4544 (0x11c0), region = 84 }
0x11b4   : > { %v5760_v1 = vpop.f32.mrb[30].mxu1 }
0x11b5   : > { %v5764_v2 = vadd.f32 %v5760_v1, %v5689_v52  ;;  %v6745_v8 = vpop.f32.mrb[31].mxu1 }
0x11b7   : > { %5765 = vst [vmem:[#allocation7] sm:$0x7] %v5764_v2 }
0x11be   : > { %v5775_v4 = vld [vmem:[#allocation7] sm:$0x7] }
0x11bf   : > { %5776 = vst [vmem:[%s549_s13] sm:$0x7] %v5775_v4 }
0x11c0 PF: > { %s8946_s29 = sld [smem:[#allocation30_spill]]  ;;  %s8948_s23 = sld [smem:[#allocation37_spill]] }
0x11c1   : > { %s8949_s18 = sld [smem:[#allocation45_spill]]  ;;  %s5813_s7 = sshll.u32 %s8511_s1, 4  ;;  %s5814_s7 = int_to_ptr.vmem [resolvable:$true] %s5813_s7 }
0x11c2   : > { %s5792_s26 = scalar_lea.sflag [#allocation11], %s526_s24  ;;  %s7966_s25 = scalar_lea.vmem %s5814_s7, 16 }
0x11c3   : > { %p7967_p10 = scmp.ne.s32.totalorder %s5814_s7, %s7966_s25  ;;  %s8124_s19 = smov [#allocation20]  }
0x11c4   : > { %s7970_s13 = sshll.u32 %s8124_s19, 4  ;;  %s7971_s13 = int_to_ptr.vmem [resolvable:$false] %s7970_s13 }
0x11c5   : > { %s7972_s9 = scalar_lea.vmem %s7971_s13, 32  ;;  %p7973_p9 = scmp.lt.s32.totalorder %s5814_s7, %s7971_s13 }
0x11c6   : > { %s6602_s12 = sshll.u32 %s8946_s29, 4  ;;  %p8951_p5 = scmp.ne.s32.totalorder %s8948_s23, 0 }
0x11c7   : > { %s8950_s10 = smov %s8949_s18  ;;  %s8796_s17 = scalar_lea.hbm %s8949_s18, %s6602_s12 }
0x11c8   : > { %p7968_p7 = pnand %p7967_p10, %p8951_p5  ;;  %p7974_p2 = scmp.lt.s32.totalorder %s7972_s9, %s7966_s25 }
0x11ca   : > { %p7969_p13 = pneg %p7968_p7  ;;  %p7975_p8 = por %p7974_p2, %p7973_p9 }
0x11cc   : > { %p7976_p3 = pnand %p7975_p8, %p7969_p13 }
0x11ce   : > { %7979 = shalt.err (!%p7976_p3)
}
0x11cf   : > { %s7980_s24 = scalar_lea.hbm %s8796_s17, 16  ;;  %s7984_s2 = scalar_lea.hbm %s8950_s10, 32 }
0x11d0   : > { %p7981_p12 = scmp.ne.s32.totalorder %s8796_s17, %s7980_s24  ;;  %p7985_p1 = scmp.lt.u32.totalorder %s8796_s17, %s8950_s10 }
0x11d1   : > { %p7986_p4 = scmp.lt.u32.totalorder %s7984_s2, %s7980_s24  ;;  %p7988_p10 = scmp.lt.u32.totalorder %s7980_s24, %s8796_s17 }
0x11d2   : > { %p7982_p0 = pnand %p7981_p12, %p8951_p5 }
0x11d3   : > { %p7987_p6 = por %p7986_p4, %p7985_p1 }
0x11d4   : > { %p7983_p11 = pneg %p7982_p0 }
0x11d5   : > { %p7989_p7 = por %p7988_p10, %p7987_p6 }
0x11d7   : > { %p7990_p13 = pnand %p7989_p7, %p7983_p11 }
0x11d9   : > { %7993 = shalt.err (!%p7990_p13)
}
0x11da   : > { %6818 = dma.vmem_to_hbm [thread:$0]  (%p8951_p5), %s5814_s7, 16, %s8796_s17, %s5792_s26  }
0x11db PF: > { %s8952_s8 = sld [smem:[#allocation26_spill]]  ;;  %s8953_s29 = sld [smem:[#allocation38_spill]] }
0x11dc   : > { %p6850_p9 = scmp.ge.s32.totalorder %s8100_s27, 2 }
0x11e1   : > { %s5846_s28 = sand.u32 1, %s8952_s8   ;;  %p8954_p2 = scmp.ne.s32.totalorder %s8953_s29, 0 }
0x11e2   : > { %s5847_s12 = scalar_lea.sflag [#allocation11], %s5846_s28 }
0x11e3   : > { %p6837_p8 = pnand %p6850_p9, %p8954_p2 }
0x11e5   : > { %8055 = dma.done.wait (!%p6837_p8), %s5847_s12, 16  }
0x11e6   : > { %8057 = vsyncadd (!%p6837_p8), %s5847_s12, 4294967280  ;;  %s31_s27 = sadd.s32 1, %s8100_s27   ;;  %s8955_s17 = sld [smem:[#allocation27_spill]] }
0x11e7   : > { %p28_p3 = scmp.ge.s32.totalorder %s31_s27, 6   ;;  %s8956_s18 = sld [smem:[#allocation28_spill]] }
0x11e8   : > { %s8957_s19 = sld [smem:[#allocation35_spill]]  ;;  %s8958_s23 = sld [smem:[#allocation36_spill]] }
0x11e9   : > { %s8959_s15 = sld [smem:[#allocation31_spill]]  ;;  %s8960_s24 = sld [smem:[#allocation32_spill]] }
0x11ea   : > { %s8961_s25 = sld [smem:[#allocation33_spill]]  ;;  %s8962_s26 = sld [smem:[#allocation34_spill]] }
0x11eb   : > { %s8963_s20 = smov %s8076_s21  ;;  %s8964_s21 = smov %s8080_s22 }
0x11ec   :  { %30 = sbr.rel (!%p28_p3) target bundleno = 20 (0x14), region = 161 }
0x11ee   : > { %s8965_s22 = smov %s8958_s23 }
0x11ef   : > { %s8966_s23 = smov %s8959_s15 }
0x11f3   :  { %5851 = vsyncpa [#allocation10], 1 }
0x11f4   :  { %5853 = vsyncpa [#allocation10 + $0x1], 1 }
0x11f5   :  { %5854 = vsyncpa [#allocation13], 1 }
0x11f6   :  { %5855 = vsyncpa [#allocation16], 1 }
0x11f7   :  { %5856 = vsyncpa [#allocation19], 1 }
0x11f8   :  { %5857 = vsyncpa [#allocation11], 1 }
0x11f9   :  { %5859 = vsyncpa [#allocation11 + $0x1], 1 }

</bundles_post_ra>
